<compile_context>
chip_gen: v7x
topology: tpu7x:2x2x1
jax: 0.10.0
libtpu: 0.0.40
codegen_flags: <defaults>
</compile_context>

<pallas_src>
import numpy as np
import jax
import jax.numpy as jnp
from jax import lax
from jax.experimental import pallas as pl
from jax.experimental.pallas import tpu as pltpu


# ----------------------------------------------------------------------------
# Pallas kernel: one grid step == one timestep of one batch block.
# ----------------------------------------------------------------------------
def _conv_lstm_tam_kernel(
    x_ref,                      # (1, bn, H+2, W+2, C)  zero-padded feature_convNBN[t] (f32)
    w1v_ref, w1h_ref, b1_ref,   # fc_att1 (split W^T):  (C,M), (M,M), (1,M)      f32
    w2_ref, b2_ref,             # fc_att2:              (M,M), (1,M)             f32
    wcat_ref, bx_ref,           # fused conv weights:   (9*(C+M), 4M) bf16, bias (1,4M) f32
    wfc_ref, bfc_ref,           # classifier fc:        (M,Kp), (1,Kp)           f32
    feats_ref, feats1_ref,      # outputs:              (1,bn,Kp), (1,bn,M)
    h_ref, c_ref, col_ref,      # scratch: (bn,H+2,W+2,M) f32, (bn,H,W,M) f32, (Rp,9*(C+M)) bf16
):
    t = pl.program_id(1)

    bn = x_ref.shape[1]
    H = x_ref.shape[2] - 2
    W = x_ref.shape[3] - 2
    C = x_ref.shape[4]
    M = h_ref.shape[3]
    G = 4 * M
    R = bn * H * W                              # valid im2col rows (Rp >= R, mult of 8)

    # state = (zeros, zeros) at t == 0 (h kept zero-padded so the 3x3 conv needs no pad op);
    # also zero the im2col scratch once so its padded rows stay zero forever.
    @pl.when(t == 0)
    def _():
        h_ref[...] = jnp.zeros_like(h_ref)
        c_ref[...] = jnp.zeros_like(c_ref)
        col_ref[...] = jnp.zeros_like(col_ref)

    x_pad = x_ref[0]                            # (bn, H+2, W+2, C)
    x_in = x_pad[:, 1:1 + H, 1:1 + W, :]        # (bn, H, W, C) == feature_convNBN

    # ---------------- TAM attention ----------------
    vis = jnp.mean(x_in, axis=(1, 2))                               # GAP1 -> (bn, C)
    hid = jnp.mean(h_ref[:, 1:1 + H, 1:1 + W, :], axis=(1, 2))      # GAP2 -> (bn, M)

    a1 = (jnp.dot(vis, w1v_ref[...], preferred_element_type=jnp.float32)
          + jnp.dot(hid, w1h_ref[...], preferred_element_type=jnp.float32)
          + b1_ref[...])                                            # fc_att1(cat([vis, hid]))
    a1 = jnp.maximum(a1, 0.0)                                       # relu
    att = jax.nn.sigmoid(
        jnp.dot(a1, w2_ref[...], preferred_element_type=jnp.float32) + b2_ref[...]
    )                                                               # (bn, M) == (bn, C)

    # attentionFeat = feature * attWeights[:, :, None, None]  (zero border preserved)
    xa_bf = (x_pad * att[:, None, None, :]).astype(jnp.bfloat16)    # (bn, H+2, W+2, C)
    h_bf = h_ref[...].astype(jnp.bfloat16)                          # (bn, H+2, W+2, M)

    # ---------------- MyConvLSTMCell: fused 3x3 conv as one long-K matmul ----------------
    # Stage the 9 shifted taps (x first, then h) into the im2col scratch once.
    for k in range(9):
        di, dj = k // 3, k % 3
        col_ref[0:R, k * C:(k + 1) * C] = (
            xa_bf[:, di:di + H, dj:dj + W, :].reshape(R, C))
        col_ref[0:R, 9 * C + k * M:9 * C + (k + 1) * M] = (
            h_bf[:, di:di + H, dj:dj + W, :].reshape(R, M))

    gates = jnp.dot(col_ref[...], wcat_ref[...],
                    preferred_element_type=jnp.float32)              # (Rp, 4M) f32 acc
    gates = (gates[0:R, :] + bx_ref[...]).reshape(bn, H, W, G)       # bias added once

    i_g = jax.nn.sigmoid(gates[..., 0 * M:1 * M])
    f_g = jax.nn.sigmoid(gates[..., 1 * M:2 * M])
    g_g = jnp.tanh(gates[..., 2 * M:3 * M])
    o_g = jax.nn.sigmoid(gates[..., 3 * M:4 * M])

    c_new = g_g * i_g + c_ref[...] * f_g
    h_new = o_g * jnp.tanh(c_new)

    c_ref[...] = c_new
    h_ref[:, 1:1 + H, 1:1 + W, :] = h_new        # interior only; zero border persists

    # ---------------- classifier head (after last timestep of this batch block) --------
    @pl.when(t == pl.num_programs(1) - 1)
    def _():
        feats1 = jnp.mean(c_new, axis=(1, 2))    # avgpool(7) over cell state -> (bn, M)
        # Dropout(p=0.7) is identity in eval mode.
        feats = (jnp.dot(feats1, wfc_ref[...], preferred_element_type=jnp.float32)
                 + bfc_ref[...])
        feats1_ref[0] = feats1
        feats_ref[0] = feats


# ----------------------------------------------------------------------------
# Wrapper: layout transpose, zero padding, weight fusion/casting, specs.
# ----------------------------------------------------------------------------
def attention_model_forward(features, params, mem_size, num_classes, batch_block=1):
    """features: (T, N, C, H, W) float32 — per-timestep feature_convNBN (NCHW)."""
    T, N, C, H, W = features.shape
    M, K = mem_size, num_classes
    bn = batch_block
    assert N % bn == 0
    nb = N // bn

    x = jnp.transpose(features, (0, 1, 3, 4, 2))                    # -> (T, N, H, W, C)
    x_pad = jnp.pad(x, ((0, 0), (0, 0), (1, 1), (1, 1), (0, 0)))    # SAME pad for 3x3 conv

    p = params
    # Fuse the eight 3x3 convs into a single bf16 weight: rows = 9 x-taps then 9 h-taps.
    wcat = jnp.concatenate(
        [p["wx"].reshape(9 * C, 4 * M), p["wh"].reshape(9 * M, 4 * M)],
        axis=0).astype(jnp.bfloat16)                                 # (9*(C+M), 4M)
    # Lane-dense classifier output: pad K up to a multiple of 128.
    K_pad = max(128, ((K + 127) // 128) * 128)
    wfc_p = jnp.zeros((M, K_pad), jnp.float32).at[:, :K].set(p["wfc"])
    bfc_p = jnp.zeros((1, K_pad), jnp.float32).at[:, :K].set(p["bfc"])

    weights = [p["w1v"], p["w1h"], p["b1"], p["w2"], p["b2"],
               wcat, p["bx"], wfc_p, bfc_p]

    R = bn * H * W
    R_pad = ((R + 7) // 8) * 8                                       # MXU-friendly row count
    Kc = 9 * (C + M)                                                 # fused contraction dim

    full = lambda a: pl.BlockSpec(a.shape, lambda b, t: (0,) * a.ndim)

    # Explicit scoped-VMEM budget (blocks double-buffered + scratch + headroom).
    def nbytes(shape, dtype):
        return int(np.prod(shape)) * jnp.dtype(dtype).itemsize

    block_bytes = (nbytes((1, bn, H + 2, W + 2, C), jnp.float32)
                   + sum(nbytes(a.shape, a.dtype) for a in weights)
                   + nbytes((1, bn, K_pad), jnp.float32)
                   + nbytes((1, bn, M), jnp.float32))
    scratch_bytes = (nbytes((bn, H + 2, W + 2, M), jnp.float32)
                     + nbytes((bn, H, W, M), jnp.float32)
                     + nbytes((R_pad, Kc), jnp.bfloat16))
    vmem_limit = int(min(2 * block_bytes + scratch_bytes + (16 << 20), 100 << 20))

    grid_spec = pltpu.PrefetchScalarGridSpec(
        num_scalar_prefetch=0,
        grid=(nb, T),                                                # batch outer, time inner
        in_specs=[pl.BlockSpec((1, bn, H + 2, W + 2, C),
                               lambda b, t: (t, b, 0, 0, 0))]
                 + [full(a) for a in weights],
        out_specs=[
            pl.BlockSpec((1, bn, K_pad), lambda b, t: (b, 0, 0)),
            pl.BlockSpec((1, bn, M), lambda b, t: (b, 0, 0)),
        ],
        scratch_shapes=[
            pltpu.VMEM((bn, H + 2, W + 2, M), jnp.float32),          # h (zero-padded)
            pltpu.VMEM((bn, H, W, M), jnp.float32),                  # c
            pltpu.VMEM((R_pad, Kc), jnp.bfloat16),                   # im2col staging
        ],
    )

    feats_p, feats1 = pl.pallas_call(
        _conv_lstm_tam_kernel,
        grid_spec=grid_spec,
        out_shape=(
            jax.ShapeDtypeStruct((nb, bn, K_pad), jnp.float32),
            jax.ShapeDtypeStruct((nb, bn, M), jnp.float32),
        ),
        compiler_params=pltpu.CompilerParams(
            dimension_semantics=("parallel", "arbitrary"),
            vmem_limit_bytes=vmem_limit,
        ),
    )(x_pad, *weights)

    feats = feats_p.reshape(N, K_pad)[:, :K]
    feats1 = feats1.reshape(N, M)
    return feats, feats1


# ----------------------------------------------------------------------------
# Deterministic synthetic parameters (shapes follow the module's __init__).
# ----------------------------------------------------------------------------
def init_params(key, C, M, K):
    ks = jax.random.split(key, 10)

    def u(k, fan_in, shape):
        b = 1.0 / np.sqrt(fan_in)
        return jax.random.uniform(k, shape, jnp.float32, -b, b)

    return {
        # fc_att1: Linear(2M, M) — W^T split into visual / hidden halves
        "w1v": u(ks[0], 2 * M, (C, M)),
        "w1h": u(ks[1], 2 * M, (M, M)),
        "b1":  u(ks[2], 2 * M, (1, M)),
        # fc_att2: Linear(M, M)
        "w2":  u(ks[3], M, (M, M)),
        "b2":  u(ks[4], M, (1, M)),
        # MyConvLSTMCell: four 3x3 convs on x (with bias), four on h (no bias), gates [i,f,g,o]
        "wx":  u(ks[5], 9 * C, (3, 3, C, 4 * M)),
        "bx":  u(ks[6], 9 * C, (1, 4 * M)),
        "wh":  u(ks[7], 9 * M, (3, 3, M, 4 * M)),
        # classifier fc: Linear(M, K) — stored as W^T
        "wfc": u(ks[8], M, (M, K)),
        "bfc": u(ks[9], M, (1, K)),
    }


# ----------------------------------------------------------------------------
# Pure-JAX reference (same math; conv operands bf16-rounded like the kernel).
# ----------------------------------------------------------------------------
def reference_forward(features, params, mem_size, num_classes):
    T, N, C, H, W = features.shape
    M = mem_size
    p = params
    bf = lambda a: a.astype(jnp.bfloat16).astype(jnp.float32)
    x = jnp.transpose(features, (0, 1, 3, 4, 2))     # (T, N, H, W, C)
    dn = ("NHWC", "HWIO", "NHWC")
    wx_b, wh_b = bf(p["wx"]), bf(p["wh"])

    h = jnp.zeros((N, H, W, M), jnp.float32)
    c = jnp.zeros((N, H, W, M), jnp.float32)
    for t in range(T):
        xt = x[t]
        vis = xt.mean(axis=(1, 2))
        hid = h.mean(axis=(1, 2))
        a1 = jax.nn.relu(vis @ p["w1v"] + hid @ p["w1h"] + p["b1"])
        att = jax.nn.sigmoid(a1 @ p["w2"] + p["b2"])
        xa = xt * att[:, None, None, :]
        g = (lax.conv_general_dilated(bf(xa), wx_b, (1, 1), "SAME", dimension_numbers=dn)
             + p["bx"][0]
             + lax.conv_general_dilated(bf(h), wh_b, (1, 1), "SAME", dimension_numbers=dn))
        i_g = jax.nn.sigmoid(g[..., 0 * M:1 * M])
        f_g = jax.nn.sigmoid(g[..., 1 * M:2 * M])
        g_g = jnp.tanh(g[..., 2 * M:3 * M])
        o_g = jax.nn.sigmoid(g[..., 3 * M:4 * M])
        c = g_g * i_g + c * f_g
        h = o_g * jnp.tanh(c)
    feats1 = c.mean(axis=(1, 2))
    feats = feats1 @ p["wfc"] + p["bfc"]
    return feats, feats1


if __name__ == "__main__":
    # Small shapes consistent with the module: original has C = mem_size = 512,
    # H = W = 7, num_classes = 61; here C = mem_size = 32, num_classes = 10.
    T, N, H, W = 4, 2, 7, 7
    M = 32
    C = M          # attention weights (size mem_size) scale feature channels => C == mem_size
    K = 10

    key = jax.random.PRNGKey(0)
    kfeat, kparam = jax.random.split(key)
    features = jax.random.normal(kfeat, (T, N, C, H, W), jnp.float32)
    params = init_params(kparam, C, M, K)

    feats, feats1 = attention_model_forward(features, params, M, K)
    feats, feats1 = jax.block_until_ready((feats, feats1))

    ref_feats, ref_feats1 = reference_forward(features, params, M, K)
    np.testing.assert_allclose(np.asarray(feats1), np.asarray(ref_feats1),
                               rtol=1e-2, atol=2e-3)
    np.testing.assert_allclose(np.asarray(feats), np.asarray(ref_feats),
                               rtol=1e-2, atol=2e-3)
    print("KERNEL_OK")
</pallas_src>

<mosaic_0001>
module attributes {stable_mosaic.version = 11 : i64} {
  func.func @_conv_lstm_tam_kernel(%arg0: i32, %arg1: i32, %arg2: memref<1x1x9x9x32xf32, #tpu.memory_space<vmem>>, %arg3: memref<32x32xf32, #tpu.memory_space<vmem>>, %arg4: memref<32x32xf32, #tpu.memory_space<vmem>>, %arg5: memref<1x32xf32, #tpu.memory_space<vmem>>, %arg6: memref<32x32xf32, #tpu.memory_space<vmem>>, %arg7: memref<1x32xf32, #tpu.memory_space<vmem>>, %arg8: memref<576x128xbf16, #tpu.memory_space<vmem>>, %arg9: memref<1x128xf32, #tpu.memory_space<vmem>>, %arg10: memref<32x128xf32, #tpu.memory_space<vmem>>, %arg11: memref<1x128xf32, #tpu.memory_space<vmem>>, %arg12: memref<1x1x128xf32, #tpu.memory_space<vmem>>, %arg13: memref<1x1x32xf32, #tpu.memory_space<vmem>>, %arg14: memref<1x9x9x32xf32, #tpu.memory_space<vmem>>, %arg15: memref<1x7x7x32xf32, #tpu.memory_space<vmem>>, %arg16: memref<56x576xbf16, #tpu.memory_space<vmem>>) attributes {dimension_semantics = [#tpu.dimension_semantics<parallel>, #tpu.dimension_semantics<arbitrary>], iteration_bounds = array<i64: 2, 4>, scalar_prefetch = 0 : i64, scratch_operands = 3 : i64, tpu.core_type = #tpu.core_type<tc>, window_params = [{transform_indices = @transform_0, window_bounds = array<i64: 1, 1, 9, 9, 32>}, {pipeline_mode = #tpu.pipeline_mode<synchronous>, transform_indices = @transform_1, window_bounds = array<i64: 32, 32>}, {pipeline_mode = #tpu.pipeline_mode<synchronous>, transform_indices = @transform_2, window_bounds = array<i64: 32, 32>}, {pipeline_mode = #tpu.pipeline_mode<synchronous>, transform_indices = @transform_3, window_bounds = array<i64: 1, 32>}, {pipeline_mode = #tpu.pipeline_mode<synchronous>, transform_indices = @transform_4, window_bounds = array<i64: 32, 32>}, {pipeline_mode = #tpu.pipeline_mode<synchronous>, transform_indices = @transform_5, window_bounds = array<i64: 1, 32>}, {pipeline_mode = #tpu.pipeline_mode<synchronous>, transform_indices = @transform_6, window_bounds = array<i64: 576, 128>}, {pipeline_mode = #tpu.pipeline_mode<synchronous>, transform_indices = @transform_7, window_bounds = array<i64: 1, 128>}, {pipeline_mode = #tpu.pipeline_mode<synchronous>, transform_indices = @transform_8, window_bounds = array<i64: 32, 128>}, {pipeline_mode = #tpu.pipeline_mode<synchronous>, transform_indices = @transform_9, window_bounds = array<i64: 1, 128>}, {transform_indices = @transform_10, window_bounds = array<i64: 1, 1, 128>}, {transform_indices = @transform_11, window_bounds = array<i64: 1, 1, 32>}]} {
    %c0_i32 = arith.constant 0 : i32
    %0 = arith.cmpi eq, %arg1, %c0_i32 : i32
    %1 = arith.extui %0 : i1 to i32
    %c0_i32_0 = arith.constant 0 : i32
    %2 = arith.cmpi ne, %1, %c0_i32_0 : i32
    scf.if %2 {
      %cst_72 = arith.constant 0.000000e+00 : f32
      %130 = vector.broadcast %cst_72 : f32 to vector<1x9x9x32xf32>
      %c0_73 = arith.constant 0 : index
      %c0_74 = arith.constant 0 : index
      %c0_75 = arith.constant 0 : index
      %c0_76 = arith.constant 0 : index
      %131 = vector.load %arg14[%c0_73, %c0_74, %c0_75, %c0_76] : memref<1x9x9x32xf32, #tpu.memory_space<vmem>>, vector<1x9x9x32xf32>
      tpu.vector_store %arg14[%c0_73, %c0_74, %c0_75, %c0_76], %130 {strides = array<i32>} : memref<1x9x9x32xf32, #tpu.memory_space<vmem>>, vector<1x9x9x32xf32>,
      %cst_77 = arith.constant 0.000000e+00 : f32
      %132 = vector.broadcast %cst_77 : f32 to vector<1x7x7x32xf32>
      %c0_78 = arith.constant 0 : index
      %c0_79 = arith.constant 0 : index
      %c0_80 = arith.constant 0 : index
      %c0_81 = arith.constant 0 : index
      %133 = vector.load %arg15[%c0_78, %c0_79, %c0_80, %c0_81] : memref<1x7x7x32xf32, #tpu.memory_space<vmem>>, vector<1x7x7x32xf32>
      tpu.vector_store %arg15[%c0_78, %c0_79, %c0_80, %c0_81], %132 {strides = array<i32>} : memref<1x7x7x32xf32, #tpu.memory_space<vmem>>, vector<1x7x7x32xf32>,
      %cst_82 = arith.constant 0.000000e+00 : bf16
      %134 = vector.broadcast %cst_82 : bf16 to vector<56x576xbf16>
      %c0_83 = arith.constant 0 : index
      %c0_84 = arith.constant 0 : index
      %135 = vector.load %arg16[%c0_83, %c0_84] : memref<56x576xbf16, #tpu.memory_space<vmem>>, vector<56x576xbf16>
      tpu.vector_store %arg16[%c0_83, %c0_84], %134 {strides = array<i32>} : memref<56x576xbf16, #tpu.memory_space<vmem>>, vector<56x576xbf16>,
    } else {
    }
    %c0 = arith.constant 0 : index
    %c0_1 = arith.constant 0 : index
    %c0_2 = arith.constant 0 : index
    %c0_3 = arith.constant 0 : index
    %c0_4 = arith.constant 0 : index
    %3 = vector.load %arg2[%c0, %c0_1, %c0_2, %c0_3, %c0_4] : memref<1x1x9x9x32xf32, #tpu.memory_space<vmem>>, vector<1x1x9x9x32xf32>
    %4 = vector.shape_cast %3 : vector<1x1x9x9x32xf32> to vector<1x9x9x32xf32>
    %5 = vector.extract_strided_slice %4 {offsets = [0, 1, 1, 0], sizes = [1, 7, 7, 32], strides = [1, 1, 1, 1]} : vector<1x9x9x32xf32> to vector<1x7x7x32xf32>
    %cst = arith.constant dense<0.000000e+00> : vector<1x32xf32>
    %6 = vector.multi_reduction <add>, %5, %cst [1, 2] : vector<1x7x7x32xf32> to vector<1x32xf32>
    %cst_5 = arith.constant 4.900000e+01 : f32
    %7 = vector.broadcast %cst_5 : f32 to vector<1x32xf32>
    %8 = arith.divf %6, %7 : vector<1x32xf32>
    %c0_6 = arith.constant 0 : index
    %c1 = arith.constant 1 : index
    %c1_7 = arith.constant 1 : index
    %c0_8 = arith.constant 0 : index
    %9 = vector.load %arg14[%c0_6, %c1, %c1_7, %c0_8] : memref<1x9x9x32xf32, #tpu.memory_space<vmem>>, vector<1x7x7x32xf32>
    %cst_9 = arith.constant dense<0.000000e+00> : vector<1x32xf32>
    %10 = vector.multi_reduction <add>, %9, %cst_9 [1, 2] : vector<1x7x7x32xf32> to vector<1x32xf32>
    %cst_10 = arith.constant 4.900000e+01 : f32
    %11 = vector.broadcast %cst_10 : f32 to vector<1x32xf32>
    %12 = arith.divf %10, %11 : vector<1x32xf32>
    %c0_11 = arith.constant 0 : index
    %c0_12 = arith.constant 0 : index
    %13 = vector.load %arg3[%c0_11, %c0_12] : memref<32x32xf32, #tpu.memory_space<vmem>>, vector<32x32xf32>
    %cst_13 = arith.constant dense<0.000000e+00> : vector<1x32xf32>
    %14 = tpu.matmul %8, %13, %cst_13 {dimension_numbers = #tpu.dot_dimension_numbers<[1], [0], [0], [1], [0, 0, 1, 1], [], []>} : vector<1x32xf32>, vector<32x32xf32>, vector<1x32xf32> -> vector<1x32xf32>
    %c0_14 = arith.constant 0 : index
    %c0_15 = arith.constant 0 : index
    %15 = vector.load %arg4[%c0_14, %c0_15] : memref<32x32xf32, #tpu.memory_space<vmem>>, vector<32x32xf32>
    %cst_16 = arith.constant dense<0.000000e+00> : vector<1x32xf32>
    %16 = tpu.matmul %12, %15, %cst_16 {dimension_numbers = #tpu.dot_dimension_numbers<[1], [0], [0], [1], [0, 0, 1, 1], [], []>} : vector<1x32xf32>, vector<32x32xf32>, vector<1x32xf32> -> vector<1x32xf32>
    %17 = arith.addf %14, %16 : vector<1x32xf32>
    %c0_17 = arith.constant 0 : index
    %c0_18 = arith.constant 0 : index
    %18 = vector.load %arg5[%c0_17, %c0_18] : memref<1x32xf32, #tpu.memory_space<vmem>>, vector<1x32xf32>
    %19 = arith.addf %17, %18 : vector<1x32xf32>
    %cst_19 = arith.constant 0.000000e+00 : f32
    %20 = vector.broadcast %cst_19 : f32 to vector<1x32xf32>
    %21 = arith.maximumf %19, %20 : vector<1x32xf32>
    %c0_20 = arith.constant 0 : index
    %c0_21 = arith.constant 0 : index
    %22 = vector.load %arg6[%c0_20, %c0_21] : memref<32x32xf32, #tpu.memory_space<vmem>>, vector<32x32xf32>
    %cst_22 = arith.constant dense<0.000000e+00> : vector<1x32xf32>
    %23 = tpu.matmul %21, %22, %cst_22 {dimension_numbers = #tpu.dot_dimension_numbers<[1], [0], [0], [1], [0, 0, 1, 1], [], []>} : vector<1x32xf32>, vector<32x32xf32>, vector<1x32xf32> -> vector<1x32xf32>
    %c0_23 = arith.constant 0 : index
    %c0_24 = arith.constant 0 : index
    %24 = vector.load %arg7[%c0_23, %c0_24] : memref<1x32xf32, #tpu.memory_space<vmem>>, vector<1x32xf32>
    %25 = arith.addf %23, %24 : vector<1x32xf32>
    %26 = arith.negf %25 : vector<1x32xf32>
    %27 = math.exp %26 : vector<1x32xf32>
    %cst_25 = arith.constant 1.000000e+00 : f32
    %28 = vector.broadcast %cst_25 : f32 to vector<1x32xf32>
    %29 = arith.addf %28, %27 : vector<1x32xf32>
    %30 = arith.divf %28, %29 : vector<1x32xf32>
    %31 = vector.shape_cast %30 : vector<1x32xf32> to vector<1x1x1x32xf32>
    %32 = vector.broadcast %31 : vector<1x1x1x32xf32> to vector<1x9x9x32xf32>
    %33 = arith.mulf %4, %32 : vector<1x9x9x32xf32>
    %34 = arith.truncf %33 : vector<1x9x9x32xf32> to vector<1x9x9x32xbf16>
    %c0_26 = arith.constant 0 : index
    %c0_27 = arith.constant 0 : index
    %c0_28 = arith.constant 0 : index
    %c0_29 = arith.constant 0 : index
    %35 = vector.load %arg14[%c0_26, %c0_27, %c0_28, %c0_29] : memref<1x9x9x32xf32, #tpu.memory_space<vmem>>, vector<1x9x9x32xf32>
    %36 = arith.truncf %35 : vector<1x9x9x32xf32> to vector<1x9x9x32xbf16>
    %37 = vector.extract_strided_slice %34 {offsets = [0, 0, 0, 0], sizes = [1, 7, 7, 32], strides = [1, 1, 1, 1]} : vector<1x9x9x32xbf16> to vector<1x7x7x32xbf16>
    %38 = vector.shape_cast %37 : vector<1x7x7x32xbf16> to vector<49x32xbf16>
    %c0_30 = arith.constant 0 : index
    %c0_31 = arith.constant 0 : index
    %39 = vector.load %arg16[%c0_30, %c0_31] : memref<56x576xbf16, #tpu.memory_space<vmem>>, vector<49x32xbf16>
    tpu.vector_store %arg16[%c0_30, %c0_31], %38 {strides = array<i32>} : memref<56x576xbf16, #tpu.memory_space<vmem>>, vector<49x32xbf16>,
    %40 = vector.extract_strided_slice %36 {offsets = [0, 0, 0, 0], sizes = [1, 7, 7, 32], strides = [1, 1, 1, 1]} : vector<1x9x9x32xbf16> to vector<1x7x7x32xbf16>
    %41 = vector.shape_cast %40 : vector<1x7x7x32xbf16> to vector<49x32xbf16>
    %c0_32 = arith.constant 0 : index
    %c288 = arith.constant 288 : index
    %42 = vector.load %arg16[%c0_32, %c288] : memref<56x576xbf16, #tpu.memory_space<vmem>>, vector<49x32xbf16>
    tpu.vector_store %arg16[%c0_32, %c288], %41 {strides = array<i32>} : memref<56x576xbf16, #tpu.memory_space<vmem>>, vector<49x32xbf16>,
    %43 = vector.extract_strided_slice %34 {offsets = [0, 0, 1, 0], sizes = [1, 7, 7, 32], strides = [1, 1, 1, 1]} : vector<1x9x9x32xbf16> to vector<1x7x7x32xbf16>
    %44 = vector.shape_cast %43 : vector<1x7x7x32xbf16> to vector<49x32xbf16>
    %c0_33 = arith.constant 0 : index
    %c32 = arith.constant 32 : index
    %45 = vector.load %arg16[%c0_33, %c32] : memref<56x576xbf16, #tpu.memory_space<vmem>>, vector<49x32xbf16>
    tpu.vector_store %arg16[%c0_33, %c32], %44 {strides = array<i32>} : memref<56x576xbf16, #tpu.memory_space<vmem>>, vector<49x32xbf16>,
    %46 = vector.extract_strided_slice %36 {offsets = [0, 0, 1, 0], sizes = [1, 7, 7, 32], strides = [1, 1, 1, 1]} : vector<1x9x9x32xbf16> to vector<1x7x7x32xbf16>
    %47 = vector.shape_cast %46 : vector<1x7x7x32xbf16> to vector<49x32xbf16>
    %c0_34 = arith.constant 0 : index
    %c320 = arith.constant 320 : index
    %48 = vector.load %arg16[%c0_34, %c320] : memref<56x576xbf16, #tpu.memory_space<vmem>>, vector<49x32xbf16>
    tpu.vector_store %arg16[%c0_34, %c320], %47 {strides = array<i32>} : memref<56x576xbf16, #tpu.memory_space<vmem>>, vector<49x32xbf16>,
    %49 = vector.extract_strided_slice %34 {offsets = [0, 0, 2, 0], sizes = [1, 7, 7, 32], strides = [1, 1, 1, 1]} : vector<1x9x9x32xbf16> to vector<1x7x7x32xbf16>
    %50 = vector.shape_cast %49 : vector<1x7x7x32xbf16> to vector<49x32xbf16>
    %c0_35 = arith.constant 0 : index
    %c64 = arith.constant 64 : index
    %51 = vector.load %arg16[%c0_35, %c64] : memref<56x576xbf16, #tpu.memory_space<vmem>>, vector<49x32xbf16>
    tpu.vector_store %arg16[%c0_35, %c64], %50 {strides = array<i32>} : memref<56x576xbf16, #tpu.memory_space<vmem>>, vector<49x32xbf16>,
    %52 = vector.extract_strided_slice %36 {offsets = [0, 0, 2, 0], sizes = [1, 7, 7, 32], strides = [1, 1, 1, 1]} : vector<1x9x9x32xbf16> to vector<1x7x7x32xbf16>
    %53 = vector.shape_cast %52 : vector<1x7x7x32xbf16> to vector<49x32xbf16>
    %c0_36 = arith.constant 0 : index
    %c352 = arith.constant 352 : index
    %54 = vector.load %arg16[%c0_36, %c352] : memref<56x576xbf16, #tpu.memory_space<vmem>>, vector<49x32xbf16>
    tpu.vector_store %arg16[%c0_36, %c352], %53 {strides = array<i32>} : memref<56x576xbf16, #tpu.memory_space<vmem>>, vector<49x32xbf16>,
    %55 = vector.extract_strided_slice %34 {offsets = [0, 1, 0, 0], sizes = [1, 7, 7, 32], strides = [1, 1, 1, 1]} : vector<1x9x9x32xbf16> to vector<1x7x7x32xbf16>
    %56 = vector.shape_cast %55 : vector<1x7x7x32xbf16> to vector<49x32xbf16>
    %c0_37 = arith.constant 0 : index
    %c96 = arith.constant 96 : index
    %57 = vector.load %arg16[%c0_37, %c96] : memref<56x576xbf16, #tpu.memory_space<vmem>>, vector<49x32xbf16>
    tpu.vector_store %arg16[%c0_37, %c96], %56 {strides = array<i32>} : memref<56x576xbf16, #tpu.memory_space<vmem>>, vector<49x32xbf16>,
    %58 = vector.extract_strided_slice %36 {offsets = [0, 1, 0, 0], sizes = [1, 7, 7, 32], strides = [1, 1, 1, 1]} : vector<1x9x9x32xbf16> to vector<1x7x7x32xbf16>
    %59 = vector.shape_cast %58 : vector<1x7x7x32xbf16> to vector<49x32xbf16>
    %c0_38 = arith.constant 0 : index
    %c384 = arith.constant 384 : index
    %60 = vector.load %arg16[%c0_38, %c384] : memref<56x576xbf16, #tpu.memory_space<vmem>>, vector<49x32xbf16>
    tpu.vector_store %arg16[%c0_38, %c384], %59 {strides = array<i32>} : memref<56x576xbf16, #tpu.memory_space<vmem>>, vector<49x32xbf16>,
    %61 = vector.extract_strided_slice %34 {offsets = [0, 1, 1, 0], sizes = [1, 7, 7, 32], strides = [1, 1, 1, 1]} : vector<1x9x9x32xbf16> to vector<1x7x7x32xbf16>
    %62 = vector.shape_cast %61 : vector<1x7x7x32xbf16> to vector<49x32xbf16>
    %c0_39 = arith.constant 0 : index
    %c128 = arith.constant 128 : index
    %63 = vector.load %arg16[%c0_39, %c128] : memref<56x576xbf16, #tpu.memory_space<vmem>>, vector<49x32xbf16>
    tpu.vector_store %arg16[%c0_39, %c128], %62 {strides = array<i32>} : memref<56x576xbf16, #tpu.memory_space<vmem>>, vector<49x32xbf16>,
    %64 = vector.extract_strided_slice %36 {offsets = [0, 1, 1, 0], sizes = [1, 7, 7, 32], strides = [1, 1, 1, 1]} : vector<1x9x9x32xbf16> to vector<1x7x7x32xbf16>
    %65 = vector.shape_cast %64 : vector<1x7x7x32xbf16> to vector<49x32xbf16>
    %c0_40 = arith.constant 0 : index
    %c416 = arith.constant 416 : index
    %66 = vector.load %arg16[%c0_40, %c416] : memref<56x576xbf16, #tpu.memory_space<vmem>>, vector<49x32xbf16>
    tpu.vector_store %arg16[%c0_40, %c416], %65 {strides = array<i32>} : memref<56x576xbf16, #tpu.memory_space<vmem>>, vector<49x32xbf16>,
    %67 = vector.extract_strided_slice %34 {offsets = [0, 1, 2, 0], sizes = [1, 7, 7, 32], strides = [1, 1, 1, 1]} : vector<1x9x9x32xbf16> to vector<1x7x7x32xbf16>
    %68 = vector.shape_cast %67 : vector<1x7x7x32xbf16> to vector<49x32xbf16>
    %c0_41 = arith.constant 0 : index
    %c160 = arith.constant 160 : index
    %69 = vector.load %arg16[%c0_41, %c160] : memref<56x576xbf16, #tpu.memory_space<vmem>>, vector<49x32xbf16>
    tpu.vector_store %arg16[%c0_41, %c160], %68 {strides = array<i32>} : memref<56x576xbf16, #tpu.memory_space<vmem>>, vector<49x32xbf16>,
    %70 = vector.extract_strided_slice %36 {offsets = [0, 1, 2, 0], sizes = [1, 7, 7, 32], strides = [1, 1, 1, 1]} : vector<1x9x9x32xbf16> to vector<1x7x7x32xbf16>
    %71 = vector.shape_cast %70 : vector<1x7x7x32xbf16> to vector<49x32xbf16>
    %c0_42 = arith.constant 0 : index
    %c448 = arith.constant 448 : index
    %72 = vector.load %arg16[%c0_42, %c448] : memref<56x576xbf16, #tpu.memory_space<vmem>>, vector<49x32xbf16>
    tpu.vector_store %arg16[%c0_42, %c448], %71 {strides = array<i32>} : memref<56x576xbf16, #tpu.memory_space<vmem>>, vector<49x32xbf16>,
    %73 = vector.extract_strided_slice %34 {offsets = [0, 2, 0, 0], sizes = [1, 7, 7, 32], strides = [1, 1, 1, 1]} : vector<1x9x9x32xbf16> to vector<1x7x7x32xbf16>
    %74 = vector.shape_cast %73 : vector<1x7x7x32xbf16> to vector<49x32xbf16>
    %c0_43 = arith.constant 0 : index
    %c192 = arith.constant 192 : index
    %75 = vector.load %arg16[%c0_43, %c192] : memref<56x576xbf16, #tpu.memory_space<vmem>>, vector<49x32xbf16>
    tpu.vector_store %arg16[%c0_43, %c192], %74 {strides = array<i32>} : memref<56x576xbf16, #tpu.memory_space<vmem>>, vector<49x32xbf16>,
    %76 = vector.extract_strided_slice %36 {offsets = [0, 2, 0, 0], sizes = [1, 7, 7, 32], strides = [1, 1, 1, 1]} : vector<1x9x9x32xbf16> to vector<1x7x7x32xbf16>
    %77 = vector.shape_cast %76 : vector<1x7x7x32xbf16> to vector<49x32xbf16>
    %c0_44 = arith.constant 0 : index
    %c480 = arith.constant 480 : index
    %78 = vector.load %arg16[%c0_44, %c480] : memref<56x576xbf16, #tpu.memory_space<vmem>>, vector<49x32xbf16>
    tpu.vector_store %arg16[%c0_44, %c480], %77 {strides = array<i32>} : memref<56x576xbf16, #tpu.memory_space<vmem>>, vector<49x32xbf16>,
    %79 = vector.extract_strided_slice %34 {offsets = [0, 2, 1, 0], sizes = [1, 7, 7, 32], strides = [1, 1, 1, 1]} : vector<1x9x9x32xbf16> to vector<1x7x7x32xbf16>
    %80 = vector.shape_cast %79 : vector<1x7x7x32xbf16> to vector<49x32xbf16>
    %c0_45 = arith.constant 0 : index
    %c224 = arith.constant 224 : index
    %81 = vector.load %arg16[%c0_45, %c224] : memref<56x576xbf16, #tpu.memory_space<vmem>>, vector<49x32xbf16>
    tpu.vector_store %arg16[%c0_45, %c224], %80 {strides = array<i32>} : memref<56x576xbf16, #tpu.memory_space<vmem>>, vector<49x32xbf16>,
    %82 = vector.extract_strided_slice %36 {offsets = [0, 2, 1, 0], sizes = [1, 7, 7, 32], strides = [1, 1, 1, 1]} : vector<1x9x9x32xbf16> to vector<1x7x7x32xbf16>
    %83 = vector.shape_cast %82 : vector<1x7x7x32xbf16> to vector<49x32xbf16>
    %c0_46 = arith.constant 0 : index
    %c512 = arith.constant 512 : index
    %84 = vector.load %arg16[%c0_46, %c512] : memref<56x576xbf16, #tpu.memory_space<vmem>>, vector<49x32xbf16>
    tpu.vector_store %arg16[%c0_46, %c512], %83 {strides = array<i32>} : memref<56x576xbf16, #tpu.memory_space<vmem>>, vector<49x32xbf16>,
    %85 = vector.extract_strided_slice %34 {offsets = [0, 2, 2, 0], sizes = [1, 7, 7, 32], strides = [1, 1, 1, 1]} : vector<1x9x9x32xbf16> to vector<1x7x7x32xbf16>
    %86 = vector.shape_cast %85 : vector<1x7x7x32xbf16> to vector<49x32xbf16>
    %c0_47 = arith.constant 0 : index
    %c256 = arith.constant 256 : index
    %87 = vector.load %arg16[%c0_47, %c256] : memref<56x576xbf16, #tpu.memory_space<vmem>>, vector<49x32xbf16>
    tpu.vector_store %arg16[%c0_47, %c256], %86 {strides = array<i32>} : memref<56x576xbf16, #tpu.memory_space<vmem>>, vector<49x32xbf16>,
    %88 = vector.extract_strided_slice %36 {offsets = [0, 2, 2, 0], sizes = [1, 7, 7, 32], strides = [1, 1, 1, 1]} : vector<1x9x9x32xbf16> to vector<1x7x7x32xbf16>
    %89 = vector.shape_cast %88 : vector<1x7x7x32xbf16> to vector<49x32xbf16>
    %c0_48 = arith.constant 0 : index
    %c544 = arith.constant 544 : index
    %90 = vector.load %arg16[%c0_48, %c544] : memref<56x576xbf16, #tpu.memory_space<vmem>>, vector<49x32xbf16>
    tpu.vector_store %arg16[%c0_48, %c544], %89 {strides = array<i32>} : memref<56x576xbf16, #tpu.memory_space<vmem>>, vector<49x32xbf16>,
    %c0_49 = arith.constant 0 : index
    %c0_50 = arith.constant 0 : index
    %91 = vector.load %arg16[%c0_49, %c0_50] : memref<56x576xbf16, #tpu.memory_space<vmem>>, vector<56x576xbf16>
    %c0_51 = arith.constant 0 : index
    %c0_52 = arith.constant 0 : index
    %92 = vector.load %arg8[%c0_51, %c0_52] : memref<576x128xbf16, #tpu.memory_space<vmem>>, vector<576x128xbf16>
    %cst_53 = arith.constant dense<0.000000e+00> : vector<56x128xf32>
    %93 = tpu.matmul %91, %92, %cst_53 {dimension_numbers = #tpu.dot_dimension_numbers<[1], [0], [0], [1], [0, 0, 1, 1], [], []>} : vector<56x576xbf16>, vector<576x128xbf16>, vector<56x128xf32> -> vector<56x128xf32>
    %94 = vector.extract_strided_slice %93 {offsets = [0, 0], sizes = [49, 128], strides = [1, 1]} : vector<56x128xf32> to vector<49x128xf32>
    %c0_54 = arith.constant 0 : index
    %c0_55 = arith.constant 0 : index
    %95 = vector.load %arg9[%c0_54, %c0_55] : memref<1x128xf32, #tpu.memory_space<vmem>>, vector<1x128xf32>
    %96 = vector.broadcast %95 : vector<1x128xf32> to vector<49x128xf32>
    %97 = arith.addf %94, %96 : vector<49x128xf32>
    %98 = vector.shape_cast %97 : vector<49x128xf32> to vector<1x7x7x128xf32>
    %99 = vector.extract_strided_slice %98 {offsets = [0, 0, 0, 0], sizes = [1, 7, 7, 32], strides = [1, 1, 1, 1]} : vector<1x7x7x128xf32> to vector<1x7x7x32xf32>
    %100 = arith.negf %99 : vector<1x7x7x32xf32>
    %101 = math.exp %100 : vector<1x7x7x32xf32>
    %cst_56 = arith.constant 1.000000e+00 : f32
    %102 = vector.broadcast %cst_56 : f32 to vector<1x7x7x32xf32>
    %103 = arith.addf %102, %101 : vector<1x7x7x32xf32>
    %104 = arith.divf %102, %103 : vector<1x7x7x32xf32>
    %105 = vector.extract_strided_slice %98 {offsets = [0, 0, 0, 32], sizes = [1, 7, 7, 32], strides = [1, 1, 1, 1]} : vector<1x7x7x128xf32> to vector<1x7x7x32xf32>
    %106 = arith.negf %105 : vector<1x7x7x32xf32>
    %107 = math.exp %106 : vector<1x7x7x32xf32>
    %cst_57 = arith.constant 1.000000e+00 : f32
    %108 = vector.broadcast %cst_57 : f32 to vector<1x7x7x32xf32>
    %109 = arith.addf %108, %107 : vector<1x7x7x32xf32>
    %110 = arith.divf %108, %109 : vector<1x7x7x32xf32>
    %111 = vector.extract_strided_slice %98 {offsets = [0, 0, 0, 64], sizes = [1, 7, 7, 32], strides = [1, 1, 1, 1]} : vector<1x7x7x128xf32> to vector<1x7x7x32xf32>
    %112 = math.tanh %111 : vector<1x7x7x32xf32>
    %113 = vector.extract_strided_slice %98 {offsets = [0, 0, 0, 96], sizes = [1, 7, 7, 32], strides = [1, 1, 1, 1]} : vector<1x7x7x128xf32> to vector<1x7x7x32xf32>
    %114 = arith.negf %113 : vector<1x7x7x32xf32>
    %115 = math.exp %114 : vector<1x7x7x32xf32>
    %cst_58 = arith.constant 1.000000e+00 : f32
    %116 = vector.broadcast %cst_58 : f32 to vector<1x7x7x32xf32>
    %117 = arith.addf %116, %115 : vector<1x7x7x32xf32>
    %118 = arith.divf %116, %117 : vector<1x7x7x32xf32>
    %119 = arith.mulf %112, %104 : vector<1x7x7x32xf32>
    %c0_59 = arith.constant 0 : index
    %c0_60 = arith.constant 0 : index
    %c0_61 = arith.constant 0 : index
    %c0_62 = arith.constant 0 : index
    %120 = vector.load %arg15[%c0_59, %c0_60, %c0_61, %c0_62] : memref<1x7x7x32xf32, #tpu.memory_space<vmem>>, vector<1x7x7x32xf32>
    %121 = arith.mulf %120, %110 : vector<1x7x7x32xf32>
    %122 = arith.addf %119, %121 : vector<1x7x7x32xf32>
    %123 = math.tanh %122 : vector<1x7x7x32xf32>
    %124 = arith.mulf %118, %123 : vector<1x7x7x32xf32>
    %c0_63 = arith.constant 0 : index
    %c0_64 = arith.constant 0 : index
    %c0_65 = arith.constant 0 : index
    %c0_66 = arith.constant 0 : index
    %125 = vector.load %arg15[%c0_63, %c0_64, %c0_65, %c0_66] : memref<1x7x7x32xf32, #tpu.memory_space<vmem>>, vector<1x7x7x32xf32>
    tpu.vector_store %arg15[%c0_63, %c0_64, %c0_65, %c0_66], %122 {strides = array<i32>} : memref<1x7x7x32xf32, #tpu.memory_space<vmem>>, vector<1x7x7x32xf32>,
    %c0_67 = arith.constant 0 : index
    %c1_68 = arith.constant 1 : index
    %c1_69 = arith.constant 1 : index
    %c0_70 = arith.constant 0 : index
    %126 = vector.load %arg14[%c0_67, %c1_68, %c1_69, %c0_70] : memref<1x9x9x32xf32, #tpu.memory_space<vmem>>, vector<1x7x7x32xf32>
    tpu.vector_store %arg14[%c0_67, %c1_68, %c1_69, %c0_70], %124 {strides = array<i32>} : memref<1x9x9x32xf32, #tpu.memory_space<vmem>>, vector<1x7x7x32xf32>,
    %c3_i32 = arith.constant 3 : i32
    %127 = arith.cmpi eq, %arg1, %c3_i32 : i32
    %128 = arith.extui %127 : i1 to i32
    %c0_i32_71 = arith.constant 0 : i32
    %129 = arith.cmpi ne, %128, %c0_i32_71 : i32
    scf.if %129 {
      %cst_72 = arith.constant dense<0.000000e+00> : vector<1x32xf32>
      %130 = vector.multi_reduction <add>, %122, %cst_72 [1, 2] : vector<1x7x7x32xf32> to vector<1x32xf32>
      %cst_73 = arith.constant 4.900000e+01 : f32
      %131 = vector.broadcast %cst_73 : f32 to vector<1x32xf32>
      %132 = arith.divf %130, %131 : vector<1x32xf32>
      %c0_74 = arith.constant 0 : index
      %c0_75 = arith.constant 0 : index
      %133 = vector.load %arg10[%c0_74, %c0_75] : memref<32x128xf32, #tpu.memory_space<vmem>>, vector<32x128xf32>
      %cst_76 = arith.constant dense<0.000000e+00> : vector<1x128xf32>
      %134 = tpu.matmul %132, %133, %cst_76 {dimension_numbers = #tpu.dot_dimension_numbers<[1], [0], [0], [1], [0, 0, 1, 1], [], []>} : vector<1x32xf32>, vector<32x128xf32>, vector<1x128xf32> -> vector<1x128xf32>
      %c0_77 = arith.constant 0 : index
      %c0_78 = arith.constant 0 : index
      %135 = vector.load %arg11[%c0_77, %c0_78] : memref<1x128xf32, #tpu.memory_space<vmem>>, vector<1x128xf32>
      %136 = arith.addf %134, %135 : vector<1x128xf32>
      %c0_79 = arith.constant 0 : index
      %c0_80 = arith.constant 0 : index
      %c0_81 = arith.constant 0 : index
      %137 = vector.load %arg13[%c0_79, %c0_80, %c0_81] : memref<1x1x32xf32, #tpu.memory_space<vmem>>, vector<1x1x32xf32>
      %138 = vector.shape_cast %137 : vector<1x1x32xf32> to vector<1x32xf32>
      %139 = vector.shape_cast %132 : vector<1x32xf32> to vector<1x1x32xf32>
      tpu.vector_store %arg13[%c0_79, %c0_80, %c0_81], %139 {strides = array<i32>} : memref<1x1x32xf32, #tpu.memory_space<vmem>>, vector<1x1x32xf32>,
      %c0_82 = arith.constant 0 : index
      %c0_83 = arith.constant 0 : index
      %c0_84 = arith.constant 0 : index
      %140 = vector.load %arg12[%c0_82, %c0_83, %c0_84] : memref<1x1x128xf32, #tpu.memory_space<vmem>>, vector<1x1x128xf32>
      %141 = vector.shape_cast %140 : vector<1x1x128xf32> to vector<1x128xf32>
      %142 = vector.shape_cast %136 : vector<1x128xf32> to vector<1x1x128xf32>
      tpu.vector_store %arg12[%c0_82, %c0_83, %c0_84], %142 {strides = array<i32>} : memref<1x1x128xf32, #tpu.memory_space<vmem>>, vector<1x1x128xf32>,
    } else {
    }
    return
  }
  func.func @transform_0(%arg0: i32, %arg1: i32) -> (i32, i32, i32, i32, i32) {
    %c0_i32 = arith.constant 0 : i32
    %c0_i32_0 = arith.constant 0 : i32
    %c0_i32_1 = arith.constant 0 : i32
    %c0_i32_2 = arith.constant 0 : i32
    return %arg1, %arg0, %c0_i32, %c0_i32_0, %c0_i32_1 : i32, i32, i32, i32, i32
  }
  func.func @transform_1(%arg0: i32, %arg1: i32) -> (i32, i32) {
    %c0_i32 = arith.constant 0 : i32
    %c0_i32_0 = arith.constant 0 : i32
    %c0_i32_1 = arith.constant 0 : i32
    return %c0_i32, %c0_i32_0 : i32, i32
  }
  func.func @transform_2(%arg0: i32, %arg1: i32) -> (i32, i32) {
    %c0_i32 = arith.constant 0 : i32
    %c0_i32_0 = arith.constant 0 : i32
    %c0_i32_1 = arith.constant 0 : i32
    return %c0_i32, %c0_i32_0 : i32, i32
  }
  func.func @transform_3(%arg0: i32, %arg1: i32) -> (i32, i32) {
    %c0_i32 = arith.constant 0 : i32
    %c0_i32_0 = arith.constant 0 : i32
    %c0_i32_1 = arith.constant 0 : i32
    return %c0_i32, %c0_i32_0 : i32, i32
  }
  func.func @transform_4(%arg0: i32, %arg1: i32) -> (i32, i32) {
    %c0_i32 = arith.constant 0 : i32
    %c0_i32_0 = arith.constant 0 : i32
    %c0_i32_1 = arith.constant 0 : i32
    return %c0_i32, %c0_i32_0 : i32, i32
  }
  func.func @transform_5(%arg0: i32, %arg1: i32) -> (i32, i32) {
    %c0_i32 = arith.constant 0 : i32
    %c0_i32_0 = arith.constant 0 : i32
    %c0_i32_1 = arith.constant 0 : i32
    return %c0_i32, %c0_i32_0 : i32, i32
  }
  func.func @transform_6(%arg0: i32, %arg1: i32) -> (i32, i32) {
    %c0_i32 = arith.constant 0 : i32
    %c0_i32_0 = arith.constant 0 : i32
    %c0_i32_1 = arith.constant 0 : i32
    return %c0_i32, %c0_i32_0 : i32, i32
  }
  func.func @transform_7(%arg0: i32, %arg1: i32) -> (i32, i32) {
    %c0_i32 = arith.constant 0 : i32
    %c0_i32_0 = arith.constant 0 : i32
    %c0_i32_1 = arith.constant 0 : i32
    return %c0_i32, %c0_i32_0 : i32, i32
  }
  func.func @transform_8(%arg0: i32, %arg1: i32) -> (i32, i32) {
    %c0_i32 = arith.constant 0 : i32
    %c0_i32_0 = arith.constant 0 : i32
    %c0_i32_1 = arith.constant 0 : i32
    return %c0_i32, %c0_i32_0 : i32, i32
  }
  func.func @transform_9(%arg0: i32, %arg1: i32) -> (i32, i32) {
    %c0_i32 = arith.constant 0 : i32
    %c0_i32_0 = arith.constant 0 : i32
    %c0_i32_1 = arith.constant 0 : i32
    return %c0_i32, %c0_i32_0 : i32, i32
  }
  func.func @transform_10(%arg0: i32, %arg1: i32) -> (i32, i32, i32) {
    %c0_i32 = arith.constant 0 : i32
    %c0_i32_0 = arith.constant 0 : i32
    %c0_i32_1 = arith.constant 0 : i32
    return %arg0, %c0_i32, %c0_i32_0 : i32, i32, i32
  }
  func.func @transform_11(%arg0: i32, %arg1: i32) -> (i32, i32, i32) {
    %c0_i32 = arith.constant 0 : i32
    %c0_i32_0 = arith.constant 0 : i32
    %c0_i32_1 = arith.constant 0 : i32
    return %arg0, %c0_i32, %c0_i32_0 : i32, i32, i32
  }
}

</mosaic_0001>

<bundles_post_ra>
// kernel: tpu_custom_call.1
= control target key start
LH: loop header
LB: loop body
LE: loop exit
PB: predicated region body
PF: predicated region fallthrough
CT: control target
= control target key end

     0   :  { %s13340_s0 = inlined_call_operand.vmem [shape: f32[4,2,9,9,32], index: 0, kind: input, shape index: {}]   ;;  %s13341_s1 = inlined_call_operand.vmem [shape: f32[32,32], index: 1, kind: input, shape index: {}]   ;;  %s13342_s2 = inlined_call_operand.vmem [shape: f32[32,32], index: 2, kind: input, shape index: {}]   ;;  %s13343_s3 = inlined_call_operand.vmem [shape: f32[1,32], index: 3, kind: input, shape index: {}]   ;;  %s13344_s4 = inlined_call_operand.vmem [shape: f32[32,32], index: 4, kind: input, shape index: {}]   ;;  %s13345_s5 = inlined_call_operand.vmem [shape: f32[1,32], index: 5, kind: input, shape index: {}]   ;;  %s13346_s6 = inlined_call_operand.vmem [shape: bf16[576,128], index: 6, kind: input, shape index: {}]   ;;  %s13347_s7 = inlined_call_operand.vmem [shape: f32[1,128], index: 7, kind: input, shape index: {}]   ;;  %s13348_s8 = inlined_call_operand.vmem [shape: f32[32,128], index: 8, kind: input, shape index: {}]   ;;  %s13349_s9 = inlined_call_operand.vmem [shape: f32[1,128], index: 9, kind: input, shape index: {}]   ;;  %s13350_s10 = inlined_call_operand.hbm [shape: f32[2,1,128], index: 10, kind: output, shape index: {0}]   ;;  %s13351_s11 = inlined_call_operand.hbm [shape: f32[2,1,32], index: 11, kind: output, shape index: {1}]  }
   0x1   :  { %13555 = sst [smem:[#allocation118_spill]] %s13340_s0 }
   0x2   :  { %13556 = sst [smem:[#allocation119_spill]] %s13341_s1 }
   0x3   :  { %17 = vsyncpa [#allocation6], 0 }
   0x4   :  { %19 = vsyncpa [#allocation6 + $0x1], 0 }
   0x5   :  { %20 = vsyncpa [#allocation8], 0 }
   0x6   :  { %22 = vsyncpa [#allocation8 + $0x1], 0  ;;  %s9806_s17 = smov 0   ;;  %s9808_s18 = smov 0  }
   0x7   :  { %s9810_s19 = smov 0   ;;  %s9812_s20 = smov 0  }
   0x8   :  { %s9814_s21 = smov 0   ;;  %s9816_s22 = smov 0  }
   0x9   :  { %s9818_s23 = smov 0   ;;  %s9820_s24 = smov 0  }
   0xa LB: > { %13557 = sst [smem:[#allocation11_spill]] %s9708_s19  ;;  %s8612_s25 = sadd.s32 4294967295, %s9728_s24   ;;  %s9728_s24 = sphi %s9820_s24, %s28_s24   ;;  %s9724_s23 = sphi %s9818_s23, %s13949_s23   ;;  %s9720_s22 = sphi %s9816_s22, %s13948_s22   ;;  %s9716_s21 = sphi %s9814_s21, %s13947_s21   ;;  %s9712_s20 = sphi %s9812_s20, %s13946_s20   ;;  %s9708_s19 = sphi %s9810_s19, %s13945_s19   ;;  %s9704_s18 = sphi %s9808_s18, %s13951_s18   ;;  %s9700_s17 = sphi %s9806_s17, %s13950_s17  }
   0xb   : > { %13558 = sst [smem:[#allocation12_spill]] %s9720_s22  ;;  %s8613_s26 = sadd.s32 4294967294, %s9728_s24  }
   0xc   : > { %13559 = sst [smem:[#allocation13_spill]] %s9724_s23  ;;  %s37_s27 = sadd.s32 1, %s9720_s22 }
   0xd   : > { %p38_p0 = scmp.ge.s32.totalorder %s37_s27, 4  ;;  %s40_s28 = sadd.s32 1, %s9724_s23 }
   0xe   : > { %p274_p1 = scmp.ne.s32.totalorder %s9708_s19, %s9704_s18  ;;  %p275_p2 = scmp.eq.s32.totalorder %s8612_s25, 7 }
   0xf   : > { %s13953_s27 = smov (%p38_p0, %s37_s27), 0  ;;  %s13955_s28 = smov (!%p38_p0, %s40_s28), %s9724_s23 }
  0x10   : > { %13560 = sst [smem:[#allocation14_spill]] %s13953_s27  ;;  %p9855_p3 = por %p275_p2, %p274_p1 }
  0x11   : > { %p280_p4 = scmp.ne.s32.totalorder %s9704_s18, %s9700_s17  ;;  %p42_p5 = scmp.ge.s32.totalorder %s13955_s28, 2 }
  0x12   : > { %p281_p6 = scmp.eq.s32.totalorder %s8613_s26, 7  ;;  %p8616_p7 = scmp.ge.s32.totalorder %s9728_s24, 1 }
  0x13   : > { %p364_p8 = scmp.lt.s32.totalorder %s9728_s24, 9  ;;  %s13957_s28 = smov (%p42_p5, %s13955_s28), 0 }
  0x14   : > { %13562 = sst [smem:[#allocation15_spill]] %s13957_s28  ;;  %p9865_p9 = por %p281_p6, %p280_p4 }
  0x15   : > { %p365_p10 = pnand %p8616_p7, %p364_p8  ;;  %s261_s12 = ssub.s32 %s9724_s23, %s13957_s28 }
  0x16   : > { %s264_s13 = sadd.s32 1, %s9708_s19  ;;  %p262_p11 = scmp.eq.s32.totalorder %s261_s12, 0 }
  0x17   : > { %368 = sbr.rel (%p365_p10) target bundleno = 2044 (0x7fc), region = 60 }
  0x18   : > { %s9873_s14 = scalar_select %p262_p11, %s9708_s19, %s264_s13  }
  0x1a   : > { %13564 = sst [smem:[#allocation16_spill]] %s9873_s14 }
  0x1e   : > { %s9876_s15 = sand.u32 1, %s9704_s18   ;;  %p411_p12 = scmp.lt.s32.totalorder %s9712_s20, 3 }
  0x1f   : > { %p413_p13 = scmp.lt.s32.totalorder %s9716_s21, 1  ;;  %s13565_s0 = sld [smem:[#allocation118_spill]] }
  0x20   : > { %s412_s16 = scalar_select %p411_p12, %s9712_s20, 3 }
  0x21   : > { %s414_s26 = scalar_select %p413_p13, %s9716_s21, 1 }
  0x22   : > { %s9046_s25 = smul.u32 36, %s412_s16  ;;  %p8618_p0 = scmp.ne.s32.totalorder %s9712_s20, 0 }
  0x23   : > { %s9045_s28 = smul.u32 18, %s414_s26  ;;  %vm425_vm0 = vcmask (!%p8618_p0), 261120   ;;  %vm427_vm1 = vcmask (!%p8618_p0), 253952   ;;  %vm445_vm2 = vcmask (!%p8618_p0), 260096   ;;  %v9730_v0 = vmov (!%p8618_p0), 0.0  }
  0x24   : > { %424 = sbr.rel (%p8618_p0) target bundleno = 59 (0x3b), region = 64  ;;  %426 = vst.msk [vmem:[#allocation2] sm:$0xff] (!%p8618_p0), %vm425_vm0, %v9730_v0  ;;  %429 = vst.msk [vmem:[#allocation2 + $0x10] sm:$0xff] (!%p8618_p0), %vm425_vm0, %v9730_v0  ;;  %vm455_vm3 = vcmask (!%p8618_p0), 519168   ;;  %v9731_v1 = vmov (!%p8618_p0), 0  }
  0x25   : > { %s417_s27 = sadd.s32 %s9046_s25, %s9045_s28  ;;  %431 = vst.msk [vmem:[#allocation2 + $0x20] sm:$0xff] (!%p8618_p0), %vm425_vm0, %v9730_v0  ;;  %433 = vst.msk [vmem:[#allocation2 + $0x30] sm:$0xff] (!%p8618_p0), %vm425_vm0, %v9730_v0 }
  0x26   : > { %s8617_s12 = sshll.u32 %s417_s27, 3  ;;  %435 = vst.msk [vmem:[#allocation2 + $0x40] sm:$0xff] (!%p8618_p0), %vm425_vm0, %v9730_v0  ;;  %437 = vst.msk [vmem:[#allocation2 + $0x50] sm:$0xff] (!%p8618_p0), %vm425_vm0, %v9730_v0 }
  0x27   : > { %s9885_s22 = scalar_lea.vmem %s13565_s0, %s8617_s12  ;;  %439 = vst.msk [vmem:[#allocation2 + $0x60] sm:$0xff] (!%p8618_p0), %vm425_vm0, %v9730_v0  ;;  %441 = vst.msk [vmem:[#allocation2 + $0x70] sm:$0xff] (!%p8618_p0), %vm425_vm0, %v9730_v0 }
  0x28   : > { %443 = vst.msk [vmem:[#allocation2 + $0x80] sm:$0xff] (!%p8618_p0), %vm425_vm0, %v9730_v0  ;;  %453 = vst [vmem:[#allocation4] sm:$0xff] (!%p8618_p0), %v9731_v1 }
  0x29   : > { %428 = vst.msk [vmem:[#allocation2 + $0x8] sm:$0x1] (!%p8618_p0), %vm427_vm1, %v9730_v0  ;;  %430 = vst.msk [vmem:[#allocation2 + $0x18] sm:$0x1] (!%p8618_p0), %vm427_vm1, %v9730_v0 }
  0x2a   : > { %432 = vst.msk [vmem:[#allocation2 + $0x28] sm:$0x1] (!%p8618_p0), %vm427_vm1, %v9730_v0  ;;  %434 = vst.msk [vmem:[#allocation2 + $0x38] sm:$0x1] (!%p8618_p0), %vm427_vm1, %v9730_v0 }
  0x2b   : > { %436 = vst.msk [vmem:[#allocation2 + $0x48] sm:$0x1] %vm427_vm1, %v9730_v0  ;;  %438 = vst.msk [vmem:[#allocation2 + $0x58] sm:$0x1] %vm427_vm1, %v9730_v0 }
  0x2c   : > { %440 = vst.msk [vmem:[#allocation2 + $0x68] sm:$0x1] %vm427_vm1, %v9730_v0  ;;  %442 = vst.msk [vmem:[#allocation2 + $0x78] sm:$0x1] %vm427_vm1, %v9730_v0 }
  0x2d   : > { %444 = vst.msk [vmem:[#allocation2 + $0x88] sm:$0x1] %vm427_vm1, %v9730_v0  ;;  %454 = vst [vmem:[#allocation4 + $0x8] sm:$0xff] %v9731_v1 }
  0x2e   : > { %446 = vst.msk [vmem:[#allocation3] sm:$0x7f] %vm445_vm2, %v9730_v0  ;;  %447 = vst.msk [vmem:[#allocation3 + $0x8] sm:$0x7f] %vm445_vm2, %v9730_v0 }
  0x2f   : > { %448 = vst.msk [vmem:[#allocation3 + $0x10] sm:$0x7f] %vm445_vm2, %v9730_v0  ;;  %449 = vst.msk [vmem:[#allocation3 + $0x18] sm:$0x7f] %vm445_vm2, %v9730_v0 }
  0x30   : > { %450 = vst.msk [vmem:[#allocation3 + $0x20] sm:$0x7f] %vm445_vm2, %v9730_v0  ;;  %451 = vst.msk [vmem:[#allocation3 + $0x28] sm:$0x7f] %vm445_vm2, %v9730_v0 }
  0x31   : > { %452 = vst.msk [vmem:[#allocation3 + $0x30] sm:$0x7f] %vm445_vm2, %v9730_v0  ;;  %457 = vst [vmem:[#allocation4 + $0x14] sm:$0xff] %v9731_v1 }
  0x32   : > { %458 = vst [vmem:[#allocation4 + $0x1c] sm:$0xff] %v9731_v1  ;;  %460 = vst [vmem:[#allocation4 + $0x28] sm:$0xff] %v9731_v1 }
  0x33   : > { %461 = vst [vmem:[#allocation4 + $0x30] sm:$0xff] %v9731_v1  ;;  %463 = vst [vmem:[#allocation4 + $0x3c] sm:$0xff] %v9731_v1 }
  0x34   : > { %464 = vst [vmem:[#allocation4 + $0x44] sm:$0xff] %v9731_v1  ;;  %466 = vst [vmem:[#allocation4 + $0x50] sm:$0xff] %v9731_v1 }
  0x35   : > { %467 = vst [vmem:[#allocation4 + $0x58] sm:$0xff] %v9731_v1  ;;  %469 = vst [vmem:[#allocation4 + $0x64] sm:$0xff] %v9731_v1 }
  0x36   : > { %470 = vst [vmem:[#allocation4 + $0x6c] sm:$0xff] %v9731_v1  ;;  %472 = vst [vmem:[#allocation4 + $0x78] sm:$0xff] %v9731_v1 }
  0x37   : > { %473 = vst [vmem:[#allocation4 + $0x80] sm:$0xff] %v9731_v1  ;;  %456 = vst.msk [vmem:[#allocation4 + $0x10] sm:$0xf] %vm455_vm3, %v9731_v1 }
  0x38   : > { %459 = vst.msk [vmem:[#allocation4 + $0x24] sm:$0xf] %vm455_vm3, %v9731_v1  ;;  %462 = vst.msk [vmem:[#allocation4 + $0x38] sm:$0xf] %vm455_vm3, %v9731_v1 }
  0x39   : > { %465 = vst.msk [vmem:[#allocation4 + $0x4c] sm:$0xf] %vm455_vm3, %v9731_v1  ;;  %468 = vst.msk [vmem:[#allocation4 + $0x60] sm:$0xf] %vm455_vm3, %v9731_v1 }
  0x3a   : > { %471 = vst.msk [vmem:[#allocation4 + $0x74] sm:$0xf] %vm455_vm3, %v9731_v1  ;;  %474 = vst.msk [vmem:[#allocation4 + $0x88] sm:$0xf] %vm455_vm3, %v9731_v1 }
  0x3b PF: > { %v568_v2 = vld [vmem:[%s13342_s2] sm:$0xff]  ;;  %v569_v3 = vld [vmem:[%s13342_s2 + $0x8] sm:$0xff]  ;;  %s13566_s1 = sld [smem:[#allocation119_spill]]  ;;  %v9732_v5 = vmov 0.0|0.0   ;;  %v570_v8 = vld [vmem:[%s13342_s2 + $0x10] sm:$0xff]  ;;  %vm9733_vm4 = vmmov 0  }
  0x3c   : > { %9021 = vmatprep.subr.bf16.mxu0 %v9732_v5  ;;  %v9022_v6 = vpack.c.bf16 %v569_v3, %v568_v2  ;;  %9027 = vmatprep.subr.bf16.mxu1 %v9732_v5  ;;  %v571_v9 = vld [vmem:[%s13342_s2 + $0x18] sm:$0xff]  ;;  %v9734_v13 = vmov 0.0   ;;  %vm514_vm5 = vcmask 260096   ;;  %v537_v14 = vld [vmem:[#allocation2 + $0x11] sm:$0x7f]  ;;  %v479_v27 = vld [vmem:[%s9885_s22 + $0x20] sm:$0xff] }
  0x3d   : > { %8969 = vmatprep.mubr.msk.f32.mxu0 %vm9733_vm4, %v9734_v13  ;;  %8980 = vmatprep.mubr.msk.f32.mxu1 %vm9733_vm4, %v9734_v13  ;;  %v9025_v15 = vpack.c.bf16 %v571_v9, %v570_v8  ;;  %v538_v16 = vld [vmem:[#allocation2 + $0x21] sm:$0x7f]  ;;  %v539_v17 = vld [vmem:[#allocation2 + $0x31] sm:$0x7f]  ;;  %v544_v23 = vsel %vm514_vm5, %v537_v14, 0.0  ;;  %v501_v38 = vrot.slane %v479_v27, 1 }
  0x3e   : > { %9023 = vmatpush3.bf16.msra.mxu0 %v9022_v6  ;;  %v540_v18 = vld [vmem:[#allocation2 + $0x41] sm:$0x7f]  ;;  %v541_v20 = vld [vmem:[#allocation2 + $0x51] sm:$0x7f]  ;;  %v545_v24 = vsel %vm514_vm5, %v538_v16, 0.0  ;;  %v547_v25 = vsel %vm514_vm5, %v539_v17, 0.0 }
  0x3f   : > { %9024 = vmatprep.subr.bf16.mxu0 %v9732_v5  ;;  %v542_v21 = vld [vmem:[#allocation2 + $0x61] sm:$0x7f]  ;;  %v543_v22 = vld [vmem:[#allocation2 + $0x71] sm:$0x7f]  ;;  %v546_v28 = vadd.f32 %v545_v24, %v544_v23  ;;  %v549_v29 = vsel %vm514_vm5, %v540_v18, 0.0  ;;  %v551_v30 = vsel %vm514_vm5, %v541_v20, 0.0  ;;  %v806_v20 = vlaneseq }
  0x40   : > { %v477_v26 = vld [vmem:[%s9885_s22 + $0x10] sm:$0xff]  ;;  %v553_v31 = vsel %vm514_vm5, %v542_v21, 0.0  ;;  %v483_v33 = vld [vmem:[%s9885_s22 + $0x40] sm:$0xff]  ;;  %v555_v45 = vsel %vm514_vm5, %v543_v22, 0.0  ;;  %v516_v47 = vsel %vm514_vm5, %v501_v38, 0.0  ;;  %vm572_vm6 = vcmask 261120  }
  0x41   : > { %v564_v4 = vld [vmem:[%s13566_s1] sm:$0xff]  ;;  %v565_v7 = vld [vmem:[%s13566_s1 + $0x8] sm:$0xff]  ;;  %v566_v11 = vld [vmem:[%s13566_s1 + $0x10] sm:$0xff]  ;;  %v500_v37 = vrot.slane %v477_v26, 1  ;;  %v503_v40 = vrot.slane %v483_v33, 1  ;;  %v548_v41 = vadd.f32 %v547_v25, %v546_v28  ;;  %v9984_v28 = vshrl.u32 %v806_v20, 7 }
  0x42   : > { %v9028_v10 = vpack.c.bf16 %v565_v7, %v564_v4  ;;  %v567_v12 = vld [vmem:[%s13566_s1 + $0x18] sm:$0xff]  ;;  %v481_v32 = vld [vmem:[%s9885_s22 + $0x30] sm:$0xff]  ;;  %9026 = vmatpush3.bf16.msra.mxu0 %v9025_v15  ;;  %v487_v35 = vld [vmem:[%s9885_s22 + $0x60] sm:$0xff]  ;;  %v9735_v23 = vmov 1966171168   ;;  %s9737_s25 = smov 32  }
  0x43   : > { %v9031_v19 = vpack.c.bf16 %v567_v12, %v566_v11  ;;  %v485_v34 = vld [vmem:[%s9885_s22 + $0x50] sm:$0xff]  ;;  %v502_v39 = vrot.slane %v481_v32, 1  ;;  %v505_v43 = vrot.slane %v487_v35, 1  ;;  %9033 = vmatprep.subr.bf16.mxu0 %v9732_v5  ;;  %v515_v46 = vsel %vm514_vm5, %v500_v37, 0.0  ;;  %v722_v15 = vld [vmem:[%s13344_s4] sm:$0xff]  ;;  %v723_v16 = vld [vmem:[%s13344_s4 + $0x8] sm:$0xff] }
  0x44   : > { %9029 = vmatpush3.bf16.msra.mxu1 %v9028_v10  ;;  %v489_v36 = vld [vmem:[%s9885_s22 + $0x70] sm:$0xff]  ;;  %v504_v42 = vrot.slane %v485_v34, 1  ;;  %v550_v49 = vadd.f32 %v549_v29, %v548_v41  ;;  %v517_v50 = vadd.f32 %v516_v47, %v515_v46  ;;  %v520_v51 = vsel %vm514_vm5, %v503_v40, 0.0  ;;  %v849_v21 = vld [vmem:[#allocation2 + $0x60] sm:$0xff]  ;;  %v850_v22 = vld [vmem:[#allocation2 + $0x68] sm:$0x1] }
  0x45   : > { %9030 = vmatprep.subr.bf16.mxu1 %v9732_v5  ;;  %v506_v44 = vrot.slane %v489_v36, 1  ;;  %v518_v48 = vsel %vm514_vm5, %v502_v39, 0.0  ;;  %v524_v53 = vsel %vm514_vm5, %v505_v43, 0.0  ;;  %v9034_v17 = vpack.c.bf16 %v723_v16, %v722_v15  ;;  %v724_v18 = vld [vmem:[%s13344_s4 + $0x10] sm:$0xff]  ;;  %v837_v25 = vld [vmem:[#allocation2] sm:$0xff]  ;;  %s13362_s26 = smov 96  }
  0x46   : > { %v522_v52 = vsel %vm514_vm5, %v504_v42, 0.0  ;;  %v552_v55 = vadd.f32 %v551_v30, %v550_v49  ;;  %v519_v56 = vadd.f32 %v518_v48, %v517_v50  ;;  %v872_v24 = vunpack.c.l.s4 %v9735_v23  ;;  %v838_v26 = vld [vmem:[#allocation2 + $0x8] sm:$0x1]  ;;  %v839_v27 = vld [vmem:[#allocation2 + $0x10] sm:$0xff]  ;;  %v841_v33 = vld [vmem:[#allocation2 + $0x20] sm:$0xff]  ;;  %s9739_s19 = smov 64  }
  0x47   : > { %v526_v54 = vsel %vm514_vm5, %v506_v44, 0.0  ;;  %v9736_v29 = vmov 1935823168   ;;  %v855_v32 = vpack.c.bf16 %v838_v26, %v837_v25  ;;  %v8684_v36 = vpack.c.bf16 %v838_v26, %v838_v26  ;;  %v842_v37 = vld [vmem:[#allocation2 + $0x28] sm:$0x1]  ;;  %v843_v39 = vld [vmem:[#allocation2 + $0x30] sm:$0xff] }
  0x48   : > { %9032 = vmatpush3.bf16.msra.mxu1 %v9031_v19  ;;  %v554_v57 = vadd.f32 %v553_v31, %v552_v55  ;;  %v521_v58 = vadd.f32 %v520_v51, %v519_v56  ;;  %v1116_v30 = vunpack.c.l.s4 %v9736_v29  ;;  %v840_v31 = vld [vmem:[#allocation2 + $0x18] sm:$0x1]  ;;  %v873_v34 = vunpack.c.0.s8 %v872_v24  ;;  %v9991_v46 = vld [vmem:[#allocation2 + $0x48] sm:$0x1]  ;;  %v9993_v47 = vld [vmem:[#allocation2 + $0x50] sm:$0xff]  ;;  %p8847_p1 = scmp.ne.s32.totalorder %s9712_s20, 3 }
  0x49   : > { %v856_v35 = vpack.c.bf16 %v840_v31, %v839_v27  ;;  %v8685_v38 = vpack.c.bf16 %v840_v31, %v840_v31  ;;  %v9986_v40 = vld [vmem:[#allocation2 + $0x38] sm:$0x1]  ;;  %v857_v42 = vpack.c.bf16 %v842_v37, %v841_v33  ;;  %v8686_v44 = vpack.c.bf16 %v842_v37, %v842_v37  ;;  %s9743_s23 = smov (!%p8847_p1), 64   ;;  %s13940_s27 = scalar_lea.vmem (!%p8847_p1), [#allocation7], %s9876_s15 }
  0x4a   : > { %v556_v59 = vadd.f32 %v555_v45, %v554_v57  ;;  %v523_v60 = vadd.f32 %v522_v52, %v521_v58  ;;  %v1117_v41 = vunpack.c.0.s8 %v1116_v30  ;;  %v858_v43 = vpack.c.bf16 %v9986_v40, %v843_v39  ;;  %v9989_v45 = vld [vmem:[#allocation2 + $0x40] sm:$0xff]  ;;  %v10000_v50 = vld [vmem:[#allocation2 + $0x58] sm:$0x1]  ;;  %v10004_v52 = vld [vmem:[#allocation2 + $0x70] sm:$0xff] }
  0x4b   : > { %v9996_v48 = vsub.s32 %v873_v34, %v9984_v28  ;;  %v859_v49 = vpack.c.bf16 %v9991_v46, %v9989_v45  ;;  %v8687_v51 = vpack.c.bf16 %v9986_v40, %v9986_v40  ;;  %v860_v55 = vpack.c.bf16 %v10000_v50, %v9993_v47 }
  0x4c   : > { %v557_v61 = vrot.slane %v556_v59, 4  ;;  %v525_v62 = vadd.f32 %v524_v53, %v523_v60  ;;  %v10006_v53 = vld [vmem:[#allocation2 + $0x78] sm:$0x1]  ;;  %vm1726_vm7 = vcmask 516352   ;;  %vm1286_vm8 = vsmask.f32 256 }
  0x4d   : > { %v862_v56 = vpack.c.bf16 %v10006_v53, %v10004_v52  ;;  %v8716_v57 = vpack.c.bf16 %v10006_v53, %v10006_v53  ;;  %v1328_v60 = vrot.slane %v856_v35, %v9996_v48  ;;  %vm1719_vm9 = vcmask 519424   ;;  %vm10494_vm11 = vmand %vm1726_vm7, %vm1286_vm8 }
  0x4e   : > { %v558_v63 = vadd.f32 %v557_v61, %v556_v59  ;;  %v527_v0 = vadd.f32 %v526_v54, %v525_v62  ;;  %v10009_v54 = vsub.s32 %v1117_v41, %v9984_v28  ;;  %v1304_v59 = vrot.slane %v855_v32, %v9996_v48 }
  0x4f   : > { %v2484_v61 = vrot.slane %v8684_v36, %v9996_v48  ;;  %v1352_v62 = vrot.slane %v857_v42, %v9996_v48  ;;  %vm2162_vm10 = vcmask 781824   ;;  %vm2771_vm12 = vcmask 1044224  }
  0x50   : > { %v559_v1 = vrot.slane %v558_v63, 2  ;;  %v528_v2 = vrot.slane %v527_v0, 4  ;;  %vm1278_vm13 = vcmask 257024   ;;  %vm2169_vm14 = vcmask 778752  }
  0x51   : > { %vm10618_vm15 = vmand %vm2169_vm14, %vm1286_vm8  ;;  %vm1285_vm0 = vcmask 253952   ;;  %vm2778_vm2 = vcmask 1041152   ;;  %vm8374_vm7 = vcmask (!%p8847_p1), 784896  }
  0x52   : > { %v560_v3 = vadd.f32 %v559_v1, %v558_v63  ;;  %v529_v4 = vadd.f32 %v528_v2, %v527_v0  ;;  %v2499_v63 = vrot.slane %v8685_v38, %v9996_v48  ;;  %v1376_v0 = vrot.slane %v858_v43, %v9996_v48  ;;  %vm10646_vm1 = vmand %vm1285_vm0, %vm1286_vm8 }
  0x53   : > { %v10027_v1 = vrot.slane %v8686_v44, %v9996_v48  ;;  %vm11867_vm3 = vmand %vm2778_vm2, %vm1286_vm8 }
  0x54   : > { %v561_v6 = vrot.slane %v560_v3, 1  ;;  %v530_v7 = vrot.slane %v529_v4, 2  ;;  %v1377_v33 = vcombine.high %v1376_v0, %v1376_v0  ;;  %v10100_v34 = vrot.slane %v1376_v0, %v9996_v48 }
  0x56   : > { %v562_v8 = vadd.f32 %v561_v6, %v560_v3  ;;  %v531_v9 = vadd.f32 %v530_v7, %v529_v4  ;;  %v1305_v3 = vcombine.high %v1304_v59, %v1304_v59  ;;  %v10032_v4 = vrot.slane %v1304_v59, %v9996_v48 }
  0x57   : > { %v1329_v6 = vcombine.high %v1328_v60, %v1328_v60  ;;  %v2491_v7 = vrot.slane %v2484_v61, %v9996_v48  ;;  %v10109_v42 = vrot.slane %v1377_v33, %v9996_v48  ;;  %v1488_v43 = vunpack.i.h.s16 %v10100_v34 }
  0x58   : > { %v563_v10 = vmul.f32 0.020408163, %v562_v8  ;;  %v532_v11 = vrot.slane %v531_v9, 1  ;;  %v10036_v8 = vrot.slane %v1328_v60, %v9996_v48 }
  0x59   : > { %v10052_v15 = vrot.slane %v1329_v6, %v9996_v48  ;;  %13569 = vst [vmem:[#allocation19_spill] sm:$0xff] %v10109_v42  ;;  %v10119_v0 = vpack.i.b16 %v10109_v42, %v1488_v43 }
  0x5a   : > { %8970 = vmatmul.mubr.msk.f32.vlgmr.msra.gmra.mrb[0].mxu0 %vm572_vm6, %v563_v10  ;;  %v533_v12 = vadd.f32 %v532_v11, %v531_v9  ;;  %v1353_v9 = vcombine.high %v1352_v62, %v1352_v62  ;;  %v10039_v10 = vrot.slane %v1352_v62, %v9996_v48  ;;  %v10056_v16 = vcombine.high %v10036_v8, %v10036_v8 }
  0x5b   : > { %8991 = vmatprep.mubr.msk.f32.mxu0 %vm9733_vm4, %v9734_v13  ;;  %9035 = vmatpush3.bf16.msra.mxu0 %v9034_v17  ;;  %v725_v13 = vld [vmem:[%s13344_s4 + $0x18] sm:$0xff]  ;;  %v1474_v61 = vunpack.i.h.s16 %v10036_v8  ;;  %vm5162_vm4 = vcmask 523264  }
  0x5c   : > { %v535_v14 = vmul.f32 0.020408163, %v533_v12  ;;  %9036 = vmatprep.subr.bf16.mxu0 %v9732_v5  ;;  %v9037_v19 = vpack.c.bf16 %v725_v13, %v724_v18  ;;  %v861_v5 = vpack.c.bf16 %v850_v22, %v849_v21  ;;  %v10045_v12 = vrot.slane %v1305_v3, %v9996_v48 }
  0x5d   : > { %v10059_v17 = vrot.slane %v1353_v9, %v9996_v48  ;;  %v1481_v18 = vunpack.i.h.s16 %v10039_v10  ;;  %v2506_v13 = vrot.slane %v2499_v63, %v9996_v48  ;;  %v8691_v21 = vpack.i.b16 %v10052_v15, %v2491_v7 }
  0x5e   : > { %8981 = vmatmul.mubr.msk.f32.vlgmr.msra.gmra.mrb[0].mxu1 %vm572_vm6, %v535_v14  ;;  %v10018_v58 = vrot.slane %v861_v5, %v9996_v48  ;;  %v10049_v14 = vcombine.high %v10032_v4, %v10032_v4  ;;  %v10069_v20 = vcombine.high %v10045_v12, %v10045_v12  ;;  %v10074_v22 = vcombine.high %v10052_v15, %v10052_v15 }
  0x5f   : > { %9038 = vmatpush3.bf16.msra.mxu0 %v9037_v19  ;;  %v10079_v23 = vpack.i.b16 %v10059_v17, %v1481_v18  ;;  %v8717_v24 = vpack.i.b16 %v10059_v17, %v2506_v13  ;;  %v10084_v25 = vcombine.high %v10039_v10, %v10039_v10  ;;  %v10088_v26 = vcombine.high %v10059_v17, %v10059_v17 }
  0x60   : > { %v1449_v2 = vcombine.high %v10018_v58, %v10018_v58  ;;  %v2600_v5 = vcombine.low %v10045_v12, %v10069_v20  ;;  %v2601_v29 = vcombine.low %v10049_v14, %v8691_v21  ;;  %v2007_v30 = vcombine.low %v10052_v15, %v10074_v22 }
  0x61   : > { %v2008_v31 = vcombine.low %v10056_v16, %v10079_v23  ;;  %v3675_v32 = vcombine.low %v10056_v16, %v8717_v24  ;;  %v3355_v60 = vcombine.low %v10059_v17, %v10088_v26  ;;  %v1478_v7 = vunpack.i.h.s16 %v10056_v16 }
  0x62   : > { %v10042_v11 = vrot.slane %v1449_v2, %v9996_v48  ;;  %v2608_v36 = vrot.slane %v2600_v5, %v10009_v54  ;;  %v2615_v37 = vrot.slane %v2601_v29, %v10009_v54  ;;  %v2015_v38 = vrot.slane %v2007_v30, %v10009_v54 }
  0x63   : > { %v2022_v39 = vrot.slane %v2008_v31, %v10009_v54  ;;  %v3682_v41 = vrot.slane %v3675_v32, %v10009_v54  ;;  %v1476_v2 = vunpack.i.h.s16 %v10052_v15  ;;  %v10125_v6 = vrot.slane %v3355_v60, %v10009_v54 }
  0x64   : > { %13567 = vst [vmem:[#allocation17_spill] sm:$0xff] %v10042_v11  ;;  %v10065_v19 = vcombine.high %v10042_v11, %v10042_v11  ;;  %v2616_v59 = vcombine.low %v2608_v36, %v2615_v37  ;;  %v8636_v9 = vpack.i.b16 %v10052_v15, %v1474_v61  ;;  %v8638_v29 = vpack.i.b16 %v10074_v22, %v1478_v7 }
  0x65   : > { %v2023_v62 = vcombine.low %v2015_v38, %v2022_v39  ;;  %v3683_v63 = vcombine.low %v2015_v38, %v3682_v41  ;;  %v10134_v5 = vpack.i.b16 %v10056_v16, %v1476_v2  ;;  %v8635_v30 = vpack.i.b16 %v10036_v8, %v10069_v20 }
  0x66   : > { %13568 = vst [vmem:[#allocation18_spill] sm:$0xff] %v10065_v19  ;;  %v1514_v27 = vunpack.i.l.s16 %v10065_v19  ;;  %v2623_v3 = vrot.slane %v2616_v59, %v10009_v54  ;;  %v1540_v31 = vcombine.low %v10032_v4, %v10049_v14  ;;  %v8639_v32 = vpack.i.b16 %v10100_v34, %v10088_v26 }
  0x67   : > { %v2030_v21 = vrot.slane %v2023_v62, %v10009_v54  ;;  %v3690_v24 = vrot.slane %v3683_v63, %v10009_v54  ;;  %v4053_v36 = vcombine.low %v10039_v10, %v10084_v25  ;;  %v1952_v37 = vunpack.i.h.s16 %v10074_v22 }
  0x68   : > { %v1690_v35 = vrot.slane %v1514_v27, %v10009_v54  ;;  %v1589_v27 = vcombine.low %v10084_v25, %v10119_v0  ;;  %2750 = vrot.lane.b32.xlu1 %v2623_v3, %s13362_s26  ;;  %v1564_v38 = vcombine.low %v8636_v9, %v8638_v29  ;;  %v1541_v39 = vcombine.low %v10045_v12, %v8635_v30 }
  0x69   : > { %v1548_v41 = vrot.slane %v1540_v31, %v10009_v54  ;;  %v4060_v62 = vrot.slane %v4053_v36, %v10009_v54  ;;  %v8692_v63 = vpack.i.b16 %v2506_v13, %v1952_v37  ;;  %v2625_v9 = vcombine.low %v8638_v29, %v10059_v17 }
  0x6a   : > { %v1697_v44 = vrot.slane %v1690_v35, %v10009_v54  ;;  %v10145_v33 = vrot.slane %v1589_v27, %v10009_v54  ;;  %v1565_v35 = vcombine.low %v10134_v5, %v10039_v10  ;;  %v10162_v2 = vrot.slane %v1564_v38, %v10009_v54 }
  0x6b   : > { %v1555_v3 = vrot.slane %v1541_v39, %v10009_v54  ;;  %v2624_v27 = vcombine.low %v10134_v5, %v8692_v63  ;;  %v1467_v30 = vunpack.i.h.s16 %v10032_v4  ;;  %v1469_v13 = vunpack.i.h.s16 %v10045_v12 }
  0x6c   : > { %1710 = vrot.lane.b32.xlu0 %v1697_v44, %s9737_s25  ;;  %v1588_v44 = vcombine.low %v10059_v17, %v8639_v32  ;;  %v3363_v59 = vcombine.low %v10125_v6, %v10145_v33  ;;  %v1579_v60 = vrot.slane %v1565_v35, %v10009_v54  ;;  %3793 = vrot.lane.b32.xlu1 %v3690_v24, %s9739_s19  ;;  %v1471_v29 = vunpack.i.h.s16 %v10049_v14 }
  0x6d   : > { %v1556_v31 = vcombine.low %v1548_v41, %v1555_v3  ;;  %v2639_v35 = vrot.slane %v2625_v9, %v10009_v54  ;;  %v2632_v36 = vrot.slane %v2624_v27, %v10009_v54  ;;  %v1951_v38 = vunpack.i.h.s16 %v10069_v20 }
  0x6e   : > { %v10166_v7 = vrot.slane %v1588_v44, %v10009_v54  ;;  %v1580_v24 = vcombine.low %v10162_v2, %v1579_v60  ;;  %v8659_v39 = vpack.i.b16 %v10045_v12, %v1467_v30  ;;  %v1483_v3 = vunpack.i.h.s16 %v10059_v17 }
  0x6f   : > { %v1563_v44 = vrot.slane %v1556_v31, %v10009_v54  ;;  %v2640_v60 = vcombine.low %v2632_v36, %v2639_v35  ;;  %v1961_v63 = vpack.i.b16 %v1474_v61, %v1951_v38  ;;  %v1485_v9 = vunpack.i.h.s16 %v10084_v25 }
  0x70   : > { %2143 = vrot.lane.b32.xlu0 %v2030_v21, %s9739_s19  ;;  %v3370_v21 = vrot.slane %v3363_v59, %v10009_v54  ;;  %v4061_v32 = vcombine.low %v4060_v62, %v10166_v7  ;;  %v1587_v4 = vrot.slane %v1580_v24, %v10009_v54  ;;  %v8660_v59 = vpack.i.b16 %v10049_v14, %v1469_v13 }
  0x71   : > { %v8661_v62 = vpack.i.b16 %v10069_v20, %v1471_v29  ;;  %v1953_v12 = vunpack.i.h.s16 %v10088_v26  ;;  %v3332_v27 = vpack.i.b16 %v1481_v18, %v1952_v37  ;;  %v2647_v14 = vrot.slane %v2640_v60, %v10009_v54 }
  0x72   : > { %v4068_v41 = vrot.slane %v4061_v32, %v10009_v54  ;;  %1700 = vrot.lane.b32.xlu1 %v1587_v4, %s9737_s25  ;;  %v1984_v61 = vcombine.low %v8660_v59, %v1961_v63  ;;  %v10199_v17 = vpack.i.b16 %v10084_v25, %v1483_v3  ;;  %v10202_v30 = vpack.i.b16 %v10088_v26, %v1485_v9 }
  0x73   : > { %v1983_v20 = vcombine.low %v8659_v39, %v8661_v62  ;;  %v10208_v24 = vcombine.high %v10100_v34, %v10100_v34  ;;  %v10214_v31 = vcombine.high %v10109_v42, %v10109_v42  ;;  %v1400_v32 = vrot.slane %v859_v49, %v9996_v48 }
  0x74   : > { %3451 = vrot.lane.b32.xlu0 %v3370_v21, %s9737_s25  ;;  %v10192_v21 = vrot.slane %v10027_v1, %v9996_v48  ;;  %v3339_v1 = vcombine.low %v10134_v5, %v3332_v27  ;;  %v1998_v37 = vrot.slane %v1984_v61, %v10009_v54  ;;  %v2032_v5 = vcombine.low %v10202_v30, %v10109_v42 }
  0x75   : > { %v1991_v18 = vrot.slane %v1983_v20, %v10009_v54  ;;  %13570 = vst [vmem:[#allocation20_spill] sm:$0xff] %v10214_v31  ;;  %v1490_v29 = vunpack.i.h.s16 %v10109_v42  ;;  %v1401_v39 = vcombine.high %v1400_v32, %v1400_v32  ;;  %v10228_v4 = vrot.slane %v1400_v32, %v9996_v48 }
  0x76   : > { %v8718_v13 = vpack.i.b16 %v10192_v21, %v1953_v12  ;;  %4179 = vrot.lane.b32.xlu1 %v4068_v41, %s13362_s26  ;;  %v3346_v36 = vrot.slane %v3339_v1, %v10009_v54  ;;  %v1492_v45 = vunpack.i.h.s16 %v10208_v24  ;;  %v2046_v49 = vrot.slane %v2032_v5, %v10009_v54 }
  0x77   : > { %v1999_v38 = vcombine.low %v1991_v18, %v1998_v37  ;;  %v10235_v59 = vpack.i.b16 %v10208_v24, %v1490_v29  ;;  %v10239_v62 = vrot.slane %v1401_v39, %v9996_v48  ;;  %v10243_v63 = vcombine.high %v10228_v4, %v10228_v4 }
  0x78   : > { %1698 = vrot.lane.b32.xlu0 %v1563_v44, %s9737_s25  ;;  %v3691_v35 = vcombine.low %v10199_v17, %v8718_v13  ;;  %v3347_v41 = vcombine.low %v10162_v2, %v3346_v36  ;;  %v8642_v3 = vpack.i.b16 %v10214_v31, %v1492_v45  ;;  %v1968_v13 = vpack.i.b16 %v1488_v43, %v1953_v12 }
  0x79   : > { %v2006_v60 = vrot.slane %v1999_v38, %v10009_v54  ;;  %v1612_v2 = vcombine.low %v10235_v59, %v10228_v4  ;;  %v1495_v1 = vunpack.i.h.s16 %v10228_v4  ;;  %v1497_v5 = vunpack.i.h.s16 %v10239_v62 }
  0x7a   : > { %v3698_v44 = vrot.slane %v3691_v35, %v10009_v54  ;;  %v3354_v27 = vrot.slane %v3347_v41, %v10009_v54  ;;  %v1613_v20 = vcombine.low %v8642_v3, %v10239_v62  ;;  %v4069_v61 = vcombine.low %v10119_v0, %v8642_v3 }
  0x7b   : > { %2141 = vrot.lane.b32.xlu1 %v2006_v60, %s9739_s19  ;;  %v1620_v37 = vrot.slane %v1612_v2, %v10009_v54  ;;  %v2031_v0 = vcombine.low %v10199_v17, %v1968_v13  ;;  %v8665_v35 = vpack.i.b16 %v10239_v62, %v1495_v1  ;;  %v10269_v43 = vpack.i.b16 %v10243_v63, %v1497_v5 }
  0x7c   : > { %2752 = vrot.lane.b32.xlu0 %v2647_v14, %s13362_s26  ;;  %v3699_v9 = vcombine.low %v3698_v44, %v2046_v49  ;;  %v1604_v14 = vcombine.low %v10166_v7, %v10145_v33  ;;  %v4076_v33 = vrot.slane %v4069_v61, %v10009_v54  ;;  %v10263_v7 = vrot.slane %v1613_v20, %v10009_v54 }
  0x7d   : > { %13571 = vst [vmem:[#allocation21_spill] sm:$0xff] %v10269_v43  ;;  %v1954_v12 = vunpack.i.h.s16 %v10214_v31  ;;  %v10274_v36 = vcombine.high %v10239_v62, %v10239_v62  ;;  %v1424_v29 = vrot.slane %v860_v55, %v9996_v48  ;;  %v10283_v45 = vrot.slane %v2031_v0, %v10009_v54 }
  0x7e   : > { %v3706_v18 = vrot.slane %v3699_v9, %v10009_v54  ;;  %v1611_v32 = vrot.slane %v1604_v14, %v10009_v54  ;;  %v4077_v38 = vcombine.low %v4076_v33, %v1620_v37  ;;  %v1628_v39 = vcombine.low %v1620_v37, %v10263_v7 }
  0x7f   : > { %3449 = vrot.lane.b32.xlu1 %v3354_v27, %s9737_s25  ;;  %13572 = vst [vmem:[#allocation22_spill] sm:$0xff] %v10283_v45  ;;  %v2055_v44 = vcombine.low %v10208_v24, %v8665_v35  ;;  %v2056_v41 = vcombine.low %v10214_v31, %v10269_v43  ;;  %v3333_v60 = vpack.i.b16 %v1495_v1, %v1954_v12 }
  0x80   : > { %3795 = vrot.lane.b32.xlu0 %v3706_v18, %s9739_s19  ;;  %v1425_v3 = vcombine.high %v1424_v29, %v1424_v29  ;;  %v10289_v9 = vrot.slane %v1424_v29, %v9996_v48  ;;  %v4084_v47 = vrot.slane %v4077_v38, %v10009_v54  ;;  %v1635_v55 = vrot.slane %v1628_v39, %v10009_v54 }
  0x81   : > { %v2047_v27 = vcombine.low %v10283_v45, %v2046_v49  ;;  %v10295_v2 = vrot.slane %v2055_v44, %v10009_v54  ;;  %v10298_v14 = vrot.slane %v2056_v41, %v10009_v54  ;;  %v3371_v20 = vcombine.low %v10235_v59, %v3333_v60 }
  0x82   : > { %v10302_v61 = vrot.slane %v1425_v3, %v9996_v48  ;;  %v10306_v13 = vcombine.high %v10289_v9, %v10289_v9  ;;  %v13356_v1 = vunpack.i.h.s16 %v10289_v9  ;;  %v10313_v18 = vunpack.i.h.s16 %v10065_v19 }
  0x83   : > { %13573 = vst [vmem:[#allocation23_spill] sm:$0xff] %v10295_v2  ;;  %1702 = vrot.lane.b32.xlu1 %v1611_v32, %s9737_s25  ;;  %v2054_v49 = vrot.slane %v2047_v27, %v10009_v54  ;;  %v8693_v37 = vpack.i.b16 %v10109_v42, %v10192_v21  ;;  %v2071_v5 = vcombine.low %v10295_v2, %v10298_v14 }
  0x84   : > { %4181 = vrot.lane.b32.xlu0 %v4084_v47, %s13362_s26  ;;  %13574 = vst [vmem:[#allocation24_spill] sm:$0xff] %v10313_v18  ;;  %v3378_v33 = vrot.slane %v3371_v20, %v10009_v54  ;;  %v1504_v0 = vunpack.i.h.s16 %v10302_v61  ;;  %v2649_v32 = vcombine.low %v10088_v26, %v10235_v59  ;;  %v8644_v35 = vpack.i.b16 %v10302_v61, %v13356_v1 }
  0x85   : > { %v2133_v29 = vrot.slane %v10313_v18, %v10009_v54  ;;  %v2648_v38 = vcombine.low %v10084_v25, %v8693_v37  ;;  %v2529_v21 = vrot.slane %v8687_v51, %v9996_v48  ;;  %v8688_v41 = vpack.c.bf16 %v9991_v46, %v9991_v46 }
  0x86   : > { %v3379_v39 = vcombine.low %v3378_v33, %v10263_v7  ;;  %v10335_v44 = vpack.i.b16 %v10306_v13, %v1504_v0  ;;  %v2663_v26 = vrot.slane %v2649_v32, %v10009_v54  ;;  %v2078_v25 = vrot.slane %v2071_v5, %v10009_v54 }
  0x87   : > { %2145 = vrot.lane.b32.xlu1 %v2054_v49, %s9739_s19  ;;  %v1636_v60 = vcombine.low %v10243_v63, %v8644_v35  ;;  %v10345_v40 = vrot.slane %v2648_v38, %v10009_v54  ;;  %v1499_v51 = vunpack.i.h.s16 %v10243_v63  ;;  %v2536_v46 = vrot.slane %v2529_v21, %v9996_v48 }
  0x88   : > { %1704 = vrot.lane.b32.xlu0 %v1635_v55, %s9737_s25  ;;  %v3386_v3 = vrot.slane %v3379_v39, %v10009_v54  ;;  %v2688_v47 = vcombine.low %v10274_v36, %v10335_v44  ;;  %v10356_v55 = vrot.slane %v862_v56, %v9996_v48  ;;  %v2140_v20 = vrot.slane %v2133_v29, %v10009_v54 }
  0x89   : > { %v10359_v27 = vrot.slane %v1636_v60, %v10009_v54  ;;  %v2664_v49 = vcombine.low %v10345_v40, %v2663_v26  ;;  %v3658_v37 = vrot.slane %v8716_v57, %v9996_v48  ;;  %v10370_v33 = vpack.i.b16 %v2536_v46, %v1954_v12 }
  0x8a   : > { %13575 = vst [vmem:[#allocation25_spill] sm:$0xff] %v10356_v55  ;;  %v10368_v5 = vrot.slane %v2688_v47, %v10009_v54  ;;  %v3005_v52 = vcombine.high %v10356_v55, %v10356_v55  ;;  %v8719_v56 = vpack.i.b16 %v10239_v62, %v2536_v46  ;;  %v13357_v32 = vunpack.i.h.s16 %v10274_v36 }
  0x8b   : > { %3453 = vrot.lane.b32.xlu1 %v3386_v3, %s9737_s25  ;;  %v2671_v0 = vrot.slane %v2664_v49, %v10009_v54  ;;  %v8667_v53 = vpack.i.b16 %v10274_v36, %v1499_v51  ;;  %v1506_v57 = vunpack.i.h.s16 %v10306_v13  ;;  %v2672_v35 = vcombine.low %v10370_v33, %v10243_v63 }
  0x8c   : > { %13576 = vst [vmem:[#allocation26_spill] sm:$0xff] %v10368_v5  ;;  %2147 = vrot.lane.b32.xlu0 %v2078_v25, %s9739_s19  ;;  %v3387_v12 = vcombine.low %v10359_v27, %v10368_v5  ;;  %v10386_v29 = vrot.slane %v3005_v52, %v9996_v48  ;;  %v3707_v38 = vcombine.low %v10208_v24, %v8719_v56 }
  0x8d   : > { %v10390_v21 = vrot.slane %v3658_v37, %v9996_v48  ;;  %v2544_v39 = vrot.slane %v8688_v41, %v9996_v48  ;;  %v10395_v26 = vpack.i.b16 %v10289_v9, %v10274_v36  ;;  %v10399_v25 = vcombine.high %v10302_v61, %v10302_v61 }
  0x8e   : > { %13577 = vst [vmem:[#allocation27_spill] sm:$0xff] %v10386_v29  ;;  %v3394_v60 = vrot.slane %v3387_v12, %v10009_v54  ;;  %v2679_v51 = vrot.slane %v2672_v35, %v10009_v54  ;;  %v10405_v24 = vcombine.high %v10386_v29, %v10386_v29  ;;  %v3714_v3 = vrot.slane %v3707_v38, %v10009_v54 }
  0x8f   : > { %13578 = vst [vmem:[#allocation28_spill] sm:$0xff] %v10390_v21  ;;  %13579 = vst [vmem:[#allocation29_spill] sm:$0xff] %v10399_v25  ;;  %2153 = vrot.lane.b32.xlu1 %v2140_v20, %s9739_s19  ;;  %v2079_v41 = vcombine.low %v8667_v53, %v10302_v61  ;;  %v10411_v47 = vrot.slane %v2544_v39, %v9996_v48  ;;  %v4085_v46 = vcombine.low %v10239_v62, %v10395_v26 }
  0x90   : > { %13580 = vst [vmem:[#allocation30_spill] sm:$0xff] %v10405_v24  ;;  %v10417_v49 = vrot.slane %v10018_v58, %v9996_v48  ;;  %3455 = vrot.lane.b32.xlu0 %v3394_v60, %s9737_s25  ;;  %v2680_v37 = vcombine.low %v10263_v7, %v2679_v51  ;;  %v3331_v52 = vunpack.i.h.s16 %v10405_v24  ;;  %v3715_v20 = vcombine.low %v3714_v3, %v10298_v14 }
  0x91   : > { %v10424_v56 = vpack.i.b16 %v10399_v25, %v1506_v57  ;;  %v8720_v53 = vpack.i.b16 %v10411_v47, %v13357_v32  ;;  %v4092_v62 = vrot.slane %v4085_v46, %v10009_v54  ;;  %v10439_v57 = vrot.slane %v2079_v41, %v10009_v54 }
  0x92   : > { %13581 = vst [vmem:[#allocation31_spill] sm:$0xff] %v10417_v49  ;;  %v4101_v58 = vcombine.low %v10335_v44, %v10417_v49  ;;  %v2687_v12 = vrot.slane %v2680_v37, %v10009_v54  ;;  %v3441_v35 = vrot.slane %v3331_v52, %v10009_v54  ;;  %v10435_v38 = vpack.i.b16 %v10390_v21, %v3331_v52 }
  0x93   : > { %13582 = vst [vmem:[#allocation32_spill] sm:$0xff] %v10424_v56  ;;  %v3722_v14 = vrot.slane %v3715_v20, %v10009_v54  ;;  %13584 = vst [vmem:[#allocation34_spill] sm:$0xff] %v10439_v57  ;;  %v3723_v39 = vcombine.low %v8720_v53, %v10306_v13  ;;  %v1660_v60 = vcombine.low %v10424_v56, %v10042_v11 }
  0x94   : > { %13583 = vst [vmem:[#allocation33_spill] sm:$0xff] %v10435_v38  ;;  %2754 = vrot.lane.b32.xlu0 %v2671_v0, %s13362_s26  ;;  %2756 = vrot.lane.b32.xlu1 %v2687_v12, %s13362_s26  ;;  %v3448_v51 = vrot.slane %v3441_v35, %v10009_v54  ;;  %v4093_v3 = vcombine.low %v4092_v62, %v10359_v27 }
  0x95   : > { %v4108_v46 = vrot.slane %v4101_v58, %v10009_v54  ;;  %v3730_v37 = vrot.slane %v3723_v39, %v10009_v54  ;;  %v10451_v41 = vrot.slane %v1660_v60, %v10009_v54  ;;  %v3063_v21 = vcombine.low %v10079_v23, %v10202_v30 }
  0x96   : > { %v4100_v0 = vrot.slane %v4093_v3, %v10009_v54 }
  0x97   : > { %13585 = vst [vmem:[#allocation35_spill] sm:$0xff] %v10451_v41  ;;  %v3731_v52 = vcombine.low %v10439_v57, %v3730_v37  ;;  %v4109_v20 = vcombine.low %v4108_v46, %v10451_v41 }
  0x98   : > { %3461 = vrot.lane.b32.xlu0 %v3448_v51, %s9737_s25  ;;  %3797 = vrot.lane.b32.xlu1 %v3722_v14, %s9739_s19  ;;  %v719_v14 = vld [vmem:[%s13343_s3] sm:$0x1] }
  0x99   : > { %v3738_v53 = vrot.slane %v3731_v52, %v10009_v54  ;;  %v4116_v62 = vrot.slane %v4109_v20, %v10009_v54 }
  0x9c   : > { %3799 = vrot.lane.b32.xlu0 %v3738_v53, %s9739_s19  ;;  %4183 = vrot.lane.b32.xlu1 %v4100_v0, %s13362_s26 }
  0xa0   : > { %4185 = vrot.lane.b32.xlu0 %v4116_v62, %s13362_s26 }
  0xda   : > { %v2751_v37 = vpop.permute.xlu1 %2750 }
  0xde   : > { %v1711_v46 = vpop.permute.xlu0 %1710  ;;  %v10467_v0 = vpop.permute.xlu1 %3793 }
  0xe2   : > { %v2144_v52 = vpop.permute.xlu0 %2143 }
  0xe4   : > { %v1701_v53 = vpop.permute.xlu1 %1700 }
  0xe5   : > { %1721 = vst.msk [vmem:[#allocation4 + $0x1c] sm:$0xf] %vm1719_vm9, %v1701_v53 }
  0xe6   : > { %v10469_v20 = vpop.permute.xlu0 %3451  ;;  %2164 = vst.msk [vmem:[#allocation4 + $0x1c] sm:$0xf] %vm2162_vm10, %v2144_v52 }
  0xea   : > { %v1699_v62 = vpop.permute.xlu0 %1698 }
  0xeb   : > { %1720 = vst.msk [vmem:[#allocation4 + $0x8] sm:$0xf] %vm1719_vm9, %v1699_v62 }
  0xee   : > { %v2753_v1 = vpop.permute.xlu0 %2752 }
  0xef   : > { %2773 = vst.msk [vmem:[#allocation4 + $0x1c] sm:$0xf] %vm2771_vm12, %v2753_v1 }
  0xf2   : > { %v10473_v38 = vpop.permute.xlu0 %3795 }
 0x12d   : > { %v642_v58 = vpop.f32.mrb[0].mxu0 }
 0x12e   : > { %v8971_v12 = vpop.f32.mrb[1].mxu0 }
 0x12f   : > { %v10471_v12 = vpop.permute.xlu1 %4179 }
 0x131   : > { %v715_v35 = vpop.f32.mrb[0].mxu1 }
 0x132   : > { %v716_v39 = vadd.f32 %v715_v35, %v642_v58  ;;  %v8982_v60 = vpop.f32.mrb[1].mxu1  ;;  %v4637_v35 = vcombine.low %v10235_v59, %v10370_v33  ;;  %v13587_v59 = vmov 0  ;;  %v10499_v33 = vrot.slane %v3063_v21, %v10009_v54 }
 0x133   : > { %v2142_v32 = vpop.permute.xlu1 %2141  ;;  %v13588_v59 = vsel %vm10494_vm11, 4294967295, %v13587_v59 }
 0x134   : > { %v720_v51 = vadd.f32 %v719_v14, %v716_v39  ;;  %v8689_v14 = vpack.c.bf16 %v10000_v50, %v10000_v50  ;;  %v10481_v39 = vpop.permute.xlu0 %4181  ;;  %v4644_v60 = vrot.slane %v4637_v35, %v10009_v54  ;;  %v3064_v50 = vcombine.low %v10199_v17, %v10100_v34  ;;  %13589 = vst [vmem:[#allocation37_spill] sm:$0xff] %v13588_v59 }
 0x135   : > { %13590 = vst [vmem:[#allocation38_spill] sm:$0xff] %v10499_v33  ;;  %v4629_v34 = vcombine.low %v10125_v6, %v10345_v40  ;;  %2163 = vst.msk [vmem:[#allocation4 + $0x8] sm:$0xf] %vm2162_vm10, %v2142_v32  ;;  %v1637_v6 = vcombine.low %v10395_v26, %v10335_v44  ;;  %v10529_v44 = vpack.i.b16 %v10302_v61, %v10411_v47  ;;  %v13365_v26 = vunpack.i.h.s16 %v10399_v25 }
 0x136   : > { %v721_v3 = vmax.f32 %v720_v51, 0.0  ;;  %v10486_v51 = vcombine.high %v10417_v49, %v10417_v49  ;;  %v2559_v45 = vrot.slane %v8689_v14, %v9996_v48  ;;  %v4645_v17 = vcombine.low %v4644_v60, %v10263_v7  ;;  %2772 = vst.msk [vmem:[#allocation4 + $0x8] sm:$0xf] %vm2771_vm12, %v2751_v37 }
 0x137   : > { %v10475_v58 = vpop.permute.xlu1 %3449  ;;  %v3078_v35 = vrot.slane %v3064_v50, %v10009_v54  ;;  %v4636_v32 = vrot.slane %v4629_v34, %v10009_v54  ;;  %13591 = vst [vmem:[#allocation39_spill] sm:$0xff] %v10529_v44  ;;  %v1651_v1 = vrot.slane %v1637_v6, %v10009_v54  ;;  %v4653_v47 = vcombine.low %v10243_v63, %v10529_v44  ;;  %v9140_v63 = vld [vmem:[%s13346_s6 + $0x88] sm:$0xff]  }
 0x138   : > { %8992 = vmatmul.mubr.msk.f32.vlgmr.msra.gmra.mrb[2].mxu0 %vm572_vm6, %v721_v3  ;;  %13586 = vst [vmem:[#allocation36_spill] sm:$0xff] %v10486_v51  ;;  %v1728_v3 = vld [vmem:[#allocation4 + $0x80] sm:$0x1]  ;;  %v1705_v23 = vpop.permute.xlu0 %1704  ;;  %v1661_v7 = vcombine.low %v10417_v49, %v10486_v51  ;;  %v4652_v21 = vrot.slane %v4645_v17, %v10009_v54  ;;  %v10537_v53 = vrot.slane %v2559_v45, %v9996_v48 }
 0x139   : > { %v1729_v30 = vsel %vm10494_vm11, %v1711_v46, %v1728_v3  ;;  %1723 = vst.msk [vmem:[#allocation4 + $0x44] sm:$0xf] %vm1719_vm9, %v1705_v23  ;;  %v9138_v46 = vld [vmem:[%s13346_s6 + $0x80] sm:$0xff]   ;;  %v3079_v52 = vcombine.low %v10499_v33, %v3078_v35  ;;  %4731 = vrot.lane.b32.xlu1 %v4636_v32, %s9737_s25  ;;  %v1652_v14 = vcombine.low %v10359_v27, %v1651_v1  ;;  %v9139_v45 = vld [vmem:[%s13346_s6 + $0xc8] sm:$0xff]  }
 0x13a   : > { %1730 = vst [vmem:[#allocation4 + $0x80] sm:$0x1] %v1729_v30  ;;  %v1675_v37 = vrot.slane %v1661_v7, %v10009_v54  ;;  %13592 = vst [vmem:[#allocation40_spill] sm:$0xff] %v10537_v53  ;;  %4733 = vrot.lane.b32.xlu0 %v4652_v21, %s9737_s25  ;;  %v8696_v3 = vpack.i.b16 %v10537_v53, %v13365_v26  ;;  %v4660_v50 = vrot.slane %v4653_v47, %v10009_v54  ;;  %v9142_v47 = vld [vmem:[%s13346_s6 + $0x90] sm:$0xff]  }
 0x13b   : > { %v1703_v18 = vpop.permute.xlu1 %1702  ;;  %v3086_v62 = vrot.slane %v3079_v52, %v10009_v54  ;;  %v1659_v27 = vrot.slane %v1652_v14, %v10009_v54  ;;  %v8700_v17 = vpack.i.b16 %v10039_v10, %v10074_v22  ;;  %v8701_v10 = vpack.i.b16 %v10228_v4, %v10214_v31  ;;  %v9141_v52 = vld [vmem:[%s13346_s6 + $0xd0] sm:$0xff]  }
 0x13c   : > { %1722 = vst.msk [vmem:[#allocation4 + $0x30] sm:$0xf] %vm1719_vm9, %v1703_v18  ;;  %v9137_v18 = vld [vmem:[%s13346_s6 + $0xc0] sm:$0xff]   ;;  %v2148_v61 = vpop.permute.xlu0 %2147  ;;  %v1676_v60 = vcombine.low %v10451_v41, %v1675_v37  ;;  %v2712_v34 = vcombine.low %v8696_v3, %v10486_v51  ;;  %v3103_v21 = vcombine.low %v10269_v43, %v10289_v9 }
 0x13d   : > { %8908 = vmatprep.subr.bf16.mxu0 %v9137_v18  ;;  %2166 = vst.msk [vmem:[#allocation4 + $0x44] sm:$0xf] %vm2162_vm10, %v2148_v61  ;;  %v4661_v18 = vcombine.low %v4660_v50, %v10368_v5  ;;  %1706 = vrot.lane.b32.xlu1 %v1659_v27, %s9737_s25  ;;  %v3040_v7 = vcombine.low %v10052_v15, %v8700_v17  ;;  %v3028_v27 = vunpack.i.l.s16 %v10405_v24  ;;  %v9146_v17 = vld [vmem:[%s13346_s6 + $0xa0] sm:$0xff]  }
 0x13e   : > { %8909 = vmatpush3.bf16.msra.mxu0 %v9138_v46  ;;  %3189 = vst.msk [vmem:[#allocation4 + $0x20] sm:$0xf] %vm1278_vm13, %v3086_v62  ;;  %v1683_v23 = vrot.slane %v1676_v60, %v10009_v54  ;;  %v10571_v6 = vrot.slane %v2712_v34, %v10009_v54  ;;  %v3110_v61 = vrot.slane %v3103_v21, %v10009_v54  ;;  %v9145_v34 = vld [vmem:[%s13346_s6 + $0xe0] sm:$0xff]   ;;  %v9152_v21 = vld [vmem:[%s13346_s6 + $0xb8] sm:$0xff]  }
 0x13f   : > { %v2146_v40 = vpop.permute.xlu1 %2145  ;;  %8910 = vmatprep.subr.bf16.mxu0 %v9139_v45  ;;  %3471 = vst.msk [vmem:[#allocation4 + $0x20] sm:$0xf] %vm1719_vm9, %v10469_v20  ;;  %v3039_v20 = vcombine.low %v10036_v8, %v10056_v16  ;;  %v4668_v22 = vrot.slane %v4661_v18, %v10009_v54  ;;  %v3054_v32 = vrot.slane %v3040_v7, %v10009_v54 }
 0x140   : > { %2165 = vst.msk [vmem:[#allocation4 + $0x30] sm:$0xf] %vm2162_vm10, %v2146_v40  ;;  %v3456_v35 = vpop.permute.xlu0 %3455  ;;  %3815 = vst.msk [vmem:[#allocation4 + $0x20] sm:$0xf] %vm2162_vm10, %v10473_v38  ;;  %1708 = vrot.lane.b32.xlu0 %v1683_v23, %s9737_s25  ;;  %v4669_v38 = vcombine.low %v10451_v41, %v10571_v6  ;;  %v3087_v8 = vcombine.low %v10109_v42, %v8701_v10  ;;  %v3111_v14 = vcombine.low %v3110_v61, %v10439_v57  ;;  %v9147_v10 = vld [vmem:[%s13346_s6 + $0xe8] sm:$0xff]  }
 0x141   : > { %13593 = vst [vmem:[#allocation41_spill] sm:$0xff] %v10571_v6  ;;  %4201 = vst.msk [vmem:[#allocation4 + $0x20] sm:$0xf] %vm2771_vm12, %v10481_v39  ;;  %v3047_v40 = vrot.slane %v3039_v20, %v10009_v54  ;;  %4735 = vrot.lane.b32.xlu1 %v4668_v22, %s9737_s25  ;;  %v13597_v22 = vmov 0  ;;  %v490_v6 = vld [vmem:[%s9885_s22 + $0x78] sm:$0x1] }
 0x142   : > { %8911 = vmatpush3.bf16.msra.mxu0 %v9140_v63  ;;  %v4676_v15 = vrot.slane %v4669_v38, %v10009_v54  ;;  %v3094_v39 = vrot.slane %v3087_v8, %v10009_v54  ;;  %v3118_v60 = vrot.slane %v3111_v14, %v10009_v54  ;;  %v9144_v63 = vld [vmem:[%s13346_s6 + $0x98] sm:$0xff]   ;;  %v13598_v22 = vsel %vm10646_vm1, 4294967295, %v13597_v22  ;;  %v9148_v38 = vld [vmem:[%s13346_s6 + $0xa8] sm:$0xff]   ;;  %v9149_v8 = vld [vmem:[%s13346_s6 + $0xf0] sm:$0xff]  }
 0x143   : > { %v3454_v30 = vpop.permute.xlu1 %3453  ;;  %v3055_v4 = vcombine.low %v3047_v40, %v3054_v32  ;;  %8912 = vmatprep.subr.bf16.mxu0 %v9141_v52  ;;  %13599 = vst [vmem:[#allocation43_spill] sm:$0xff] %v13598_v22  ;;  %v1511_v14 = vunpack.i.h.s16 %v10042_v11 }
 0x144   : > { %v2755_v16 = vpop.permute.xlu0 %2754  ;;  %4737 = vrot.lane.b32.xlu0 %v4676_v15, %s9737_s25  ;;  %v3095_v37 = vcombine.low %v3094_v39, %v10295_v2  ;;  %3191 = vst.msk [vmem:[#allocation4 + $0x48] sm:$0xf] %vm1278_vm13, %v3118_v60  ;;  %v9151_v39 = vld [vmem:[%s13346_s6 + $0xf8] sm:$0xff]   ;;  %v808_v60 = vsub.s32 0, %v9984_v28 }
 0x145   : > { %2774 = vst.msk [vmem:[#allocation4 + $0x30] sm:$0xf] %vm2771_vm12, %v2755_v16  ;;  %v3062_v1 = vrot.slane %v3055_v4, %v10009_v54  ;;  %v9150_v16 = vld [vmem:[%s13346_s6 + $0xb0] sm:$0xff]  }
 0x146   : > { %v3102_v62 = vrot.slane %v3095_v37, %v10009_v54  ;;  %8913 = vmatpush3.bf16.msra.mxu0 %v9142_v47  ;;  %3473 = vst.msk [vmem:[#allocation4 + $0x48] sm:$0xf] %vm1719_vm9, %v3456_v35  ;;  %v3194_v35 = vld [vmem:[#allocation4 + $0x84] sm:$0x1] }
 0x147   : > { %v2154_v46 = vpop.permute.xlu1 %2153  ;;  %3188 = vst.msk [vmem:[#allocation4 + $0xc] sm:$0xf] %vm1278_vm13, %v3062_v1 }
 0x148   : > { %3470 = vst.msk [vmem:[#allocation4 + $0xc] sm:$0xf] %vm1719_vm9, %v10475_v58  ;;  %v2171_v58 = vld [vmem:[#allocation4 + $0x80] sm:$0x1]  ;;  %v3462_v50 = vpop.permute.xlu0 %3461 }
 0x149   : > { %3814 = vst.msk [vmem:[#allocation4 + $0xc] sm:$0xf] %vm2162_vm10, %v10467_v0  ;;  %v13594_v0 = vmov 0  ;;  %v2172_v3 = vsel %vm10618_vm15, %v2154_v46, %v2171_v58  ;;  %v726_v46 = vld [vmem:[%s13345_s5] sm:$0x1]  ;;  %v1513_v58 = vunpack.i.h.s16 %v10486_v51 }
 0x14a   : > { %3190 = vst.msk [vmem:[#allocation4 + $0x34] sm:$0xf] %vm1278_vm13, %v3102_v62  ;;  %v13595_v0 = vsel %vm10618_vm15, 4294967295, %v13594_v0  ;;  %2173 = vst [vmem:[#allocation4 + $0x80] sm:$0x1] %v2172_v3  ;;  %v10679_v3 = vpack.i.b16 %v10486_v51, %v1511_v14 }
 0x14b   : > { %v2757_v45 = vpop.permute.xlu1 %2756  ;;  %4200 = vst.msk [vmem:[#allocation4 + $0xc] sm:$0xf] %vm2771_vm12, %v10471_v12  ;;  %13596 = vst [vmem:[#allocation42_spill] sm:$0xff] %v13595_v0  ;;  %v9143_v12 = vld [vmem:[%s13346_s6 + $0xd8] sm:$0xff]  }
 0x14c   : > { %3472 = vst.msk [vmem:[#allocation4 + $0x34] sm:$0xf] %vm1719_vm9, %v3454_v30  ;;  %8914 = vmatprep.subr.bf16.mxu0 %v9143_v12  ;;  %v3173_v30 = vrot.slane %v3028_v27, %v10009_v54  ;;  %v3800_v18 = vpop.permute.xlu0 %3799  ;;  %13600 = vst [vmem:[#allocation44_spill] sm:$0xff] %v10679_v3 }
 0x14d   : > { %2775 = vst.msk [vmem:[#allocation4 + $0x44] sm:$0xf] %vm2771_vm12, %v2757_v45  ;;  %8915 = vmatpush3.bf16.msra.mxu0 %v9144_v63  ;;  %v13364_v45 = vunpack.i.h.s16 %v10417_v49  ;;  %v482_v63 = vld [vmem:[%s9885_s22 + $0x38] sm:$0x1] }
 0x14e   : > { %8916 = vmatprep.subr.bf16.mxu0 %v9145_v34  ;;  %v3180_v20 = vrot.slane %v3173_v30, %v10009_v54  ;;  %3817 = vst.msk [vmem:[#allocation4 + $0x48] sm:$0xf] %vm2162_vm10, %v3800_v18  ;;  %v486_v34 = vld [vmem:[%s9885_s22 + $0x58] sm:$0x1] }
 0x14f   : > { %v3798_v23 = vpop.permute.xlu1 %3797  ;;  %v10690_v28 = vpack.i.b16 %v10042_v11, %v13364_v45 }
 0x150   : > { %3816 = vst.msk [vmem:[#allocation4 + $0x34] sm:$0xf] %vm2162_vm10, %v3798_v23  ;;  %v3195_v40 = vsel %vm10646_vm1, %v3180_v20, %v3194_v35  ;;  %v4186_v32 = vpop.permute.xlu0 %4185  ;;  %v480_v23 = vld [vmem:[%s9885_s22 + $0x28] sm:$0x1]  ;;  %v9594_v35 = vld [vmem:[%s9885_s22 + $0x30] sm:$0xff] }
 0x151   : > { %8917 = vmatpush3.bf16.msra.mxu0 %v9146_v17  ;;  %3196 = vst [vmem:[#allocation4 + $0x84] sm:$0x1] %v3195_v40  ;;  %4203 = vst.msk [vmem:[#allocation4 + $0x48] sm:$0xf] %vm2771_vm12, %v4186_v32  ;;  %v10693_v17 = vpack.i.b16 %v10065_v19, %v1513_v58  ;;  %v9596_v40 = vld [vmem:[%s9885_s22 + $0x20] sm:$0xff] }
 0x152   : > { %8918 = vmatprep.subr.bf16.mxu0 %v9147_v10  ;;  %13601 = vst [vmem:[#allocation45_spill] sm:$0xff] %v10690_v28 }
 0x153   : > { %v4184_v7 = vpop.permute.xlu1 %4183  ;;  %13602 = vst [vmem:[#allocation46_spill] sm:$0xff] %v10693_v17 }
 0x154   : > { %4202 = vst.msk [vmem:[#allocation4 + $0x34] sm:$0xf] %vm2771_vm12, %v4184_v7  ;;  %v9595_v7 = vld [vmem:[%s9885_s22 + $0x40] sm:$0xff] }
 0x155   : > { %8919 = vmatpush3.bf16.msra.mxu0 %v9148_v38 }
 0x156   : > { %8920 = vmatprep.subr.bf16.mxu0 %v9149_v8 }
 0x158   : > { %v3476_v15 = vld [vmem:[#allocation4 + $0x84] sm:$0x1] }
 0x159   : > { %v3477_v4 = vsel %vm10494_vm11, %v3462_v50, %v3476_v15  ;;  %8921 = vmatpush3.bf16.msra.mxu0 %v9150_v16  ;;  %v484_v50 = vld [vmem:[%s9885_s22 + $0x48] sm:$0x1]  ;;  %v9597_v16 = vld [vmem:[%s9885_s22 + $0x50] sm:$0xff] }
 0x15a   : > { %3478 = vst [vmem:[#allocation4 + $0x84] sm:$0x1] %v3477_v4  ;;  %8922 = vmatprep.subr.bf16.mxu0 %v9151_v39 }
 0x15d   : > { %8923 = vmatpush3.bf16.msra.mxu0 %v9152_v21 }
 0x1ab   : > { %v10838_v2 = vpop.permute.xlu1 %4731 }
 0x1ac   : > { %13614 = vst [vmem:[#allocation57_spill] sm:$0xff] %v10838_v2  ;;  %v10840_v42 = vpop.permute.xlu0 %4733  ;;  %v492_v2 = vld [vmem:[%s9885_s22 + $0x88] sm:$0x1] }
 0x1ad   : > { %13615 = vst [vmem:[#allocation58_spill] sm:$0xff] %v10840_v42 }
 0x1af   : > { %v1707_v19 = vpop.permute.xlu1 %1706 }
 0x1b0   : > { %1724 = vst.msk [vmem:[#allocation4 + $0x58] sm:$0xf] %vm1719_vm9, %v1707_v19 }
 0x20b   : > { %v796_v52 = vpop.f32.mrb[2].mxu0 }
 0x20c   : > { %v797_v1 = vadd.f32 %v796_v52, %v726_v46  ;;  %v8993_v37 = vpop.f32.mrb[3].mxu0 }
 0x20e   : > { %v8622_v61 = vmul.f32 -1.442695, %v797_v1  ;;  %v488_v1 = vld [vmem:[%s9885_s22 + $0x68] sm:$0x1] }
 0x210   : > { %9198 = vpow2.f32 %v8622_v61 }
 0x21a   : > { %v9199_v47 = vpop.eup %9198 }
 0x21b   : > { %v803_v62 = vadd.f32 1.0, %v9199_v47 }
 0x21d   : > { %9200 = vrcp.f32 %v803_v62  ;;  %v9598_v62 = vld [vmem:[%s9885_s22 + $0x60] sm:$0xff] }
 0x227   : > { %v9201_v12 = vpop.eup %9200 }
 0x228   : > { %v10683_v27 = vrot.slane %v9201_v12, %v808_v60 }
 0x22a   : > { %v816_v18 = vmul.f32 %v9594_v35, %v10683_v27  ;;  %v817_v20 = vmul.f32 %v10683_v27, %v482_v63  ;;  %v818_v10 = vmul.f32 %v9595_v7, %v10683_v27  ;;  %v819_v38 = vmul.f32 %v10683_v27, %v484_v50 }
 0x22b   : > { %v814_v32 = vmul.f32 %v9596_v40, %v10683_v27  ;;  %v815_v8 = vmul.f32 %v10683_v27, %v480_v23  ;;  %v820_v15 = vmul.f32 %v9597_v16, %v10683_v27  ;;  %v10709_v4 = vmul.f32 %v10683_v27, %v486_v34 }
 0x22c   : > { %v831_v39 = vpack.c.bf16 %v817_v20, %v816_v18  ;;  %v832_v21 = vpack.c.bf16 %v819_v38, %v818_v10  ;;  %v8674_v46 = vpack.c.bf16 %v817_v20, %v817_v20  ;;  %v8675_v52 = vpack.c.bf16 %v819_v38, %v819_v38 }
 0x22d   : > { %v830_v37 = vpack.c.bf16 %v815_v8, %v814_v32  ;;  %v8673_v61 = vpack.c.bf16 %v815_v8, %v815_v8  ;;  %v833_v47 = vpack.c.bf16 %v10709_v4, %v820_v15  ;;  %v822_v14 = vmul.f32 %v9598_v62, %v10683_v27 }
 0x22e   : > { %v949_v60 = vrot.slane %v831_v39, %v9996_v48  ;;  %v973_v58 = vrot.slane %v832_v21, %v9996_v48  ;;  %v2226_v12 = vrot.slane %v8674_v46, %v9996_v48  ;;  %v2241_v63 = vrot.slane %v8675_v52, %v9996_v48 }
 0x22f   : > { %v925_v50 = vrot.slane %v830_v37, %v9996_v48  ;;  %v2211_v23 = vrot.slane %v8673_v61, %v9996_v48  ;;  %v997_v34 = vrot.slane %v833_v47, %v9996_v48  ;;  %v10723_v35 = vmul.f32 %v10683_v27, %v488_v1 }
 0x230   : > { %v950_v18 = vcombine.high %v949_v60, %v949_v60  ;;  %v10726_v20 = vrot.slane %v949_v60, %v9996_v48  ;;  %v974_v7 = vcombine.high %v973_v58, %v973_v58  ;;  %v10729_v10 = vrot.slane %v2226_v12, %v9996_v48 }
 0x231   : > { %v926_v38 = vcombine.high %v925_v50, %v925_v50  ;;  %v10732_v40 = vrot.slane %v925_v50, %v9996_v48  ;;  %v10735_v32 = vrot.slane %v2211_v23, %v9996_v48  ;;  %v10738_v8 = vrot.slane %v973_v58, %v9996_v48 }
 0x232   : > { %v10741_v16 = vrot.slane %v950_v18, %v9996_v48  ;;  %v10745_v15 = vcombine.high %v10726_v20, %v10726_v20  ;;  %v10748_v39 = vrot.slane %v974_v7, %v9996_v48  ;;  %v998_v21 = vcombine.high %v997_v34, %v997_v34 }
 0x233   : > { %13603 = vst [vmem:[#allocation47_spill] sm:$0xff] %v10732_v40  ;;  %13604 = vst [vmem:[#allocation48_spill] sm:$0xff] %v10735_v32  ;;  %v10751_v46 = vrot.slane %v926_v38, %v9996_v48  ;;  %v10755_v52 = vcombine.high %v10732_v40, %v10732_v40  ;;  %v10759_v1 = vcombine.high %v10738_v8, %v10738_v8 }
 0x234   : > { %13605 = vst [vmem:[#allocation49_spill] sm:$0xff] %v10738_v8  ;;  %v10762_v37 = vrot.slane %v997_v34, %v9996_v48  ;;  %v10766_v61 = vcombine.high %v10741_v16, %v10741_v16  ;;  %v1063_v47 = vunpack.i.h.s16 %v10741_v16  ;;  %v1065_v62 = vunpack.i.h.s16 %v10745_v15 }
 0x235   : > { %13606 = vst [vmem:[#allocation50_spill] sm:$0xff] %v10755_v52  ;;  %v8680_v60 = vpack.i.b16 %v10741_v16, %v10735_v32  ;;  %v10774_v58 = vcombine.high %v10751_v46, %v10751_v46  ;;  %v10778_v12 = vcombine.high %v10748_v39, %v10748_v39  ;;  %v10781_v50 = vrot.slane %v998_v21, %v9996_v48 }
 0x236   : > { %v10785_v23 = vcombine.high %v10762_v37, %v10762_v37  ;;  %v10788_v34 = vpack.i.b16 %v10745_v15, %v1063_v47  ;;  %v10791_v18 = vpack.i.b16 %v10766_v61, %v1065_v62  ;;  %v13370_v7 = vunpack.i.h.s16 %v10766_v61 }
 0x237   : > { %v2345_v38 = vcombine.low %v10755_v52, %v8680_v60  ;;  %v3221_v45 = vcombine.low %v10751_v46, %v10774_v58  ;;  %v1077_v21 = vunpack.i.h.s16 %v10781_v50  ;;  %v10799_v26 = vrot.slane %v2241_v63, %v9996_v48 }
 0x238   : > { %13607 = vst [vmem:[#allocation51_spill] sm:$0xff] %v10788_v34  ;;  %v834_v30 = vpack.c.bf16 %v10723_v35, %v822_v14  ;;  %v1186_v47 = vcombine.low %v10791_v18, %v10748_v39  ;;  %v10807_v62 = vpack.i.b16 %v10729_v10, %v13370_v7  ;;  %v10814_v0 = vcombine.high %v10781_v50, %v10781_v50 }
 0x239   : > { %13608 = vst [vmem:[#allocation52_spill] sm:$0xff] %v10799_v26  ;;  %v10810_v60 = vrot.slane %v2345_v38, %v10009_v54  ;;  %v10817_v63 = vrot.slane %v3221_v45, %v10009_v54  ;;  %v10820_v14 = vpack.i.b16 %v10785_v23, %v1077_v21  ;;  %v10824_v59 = vpack.i.b16 %v10781_v50, %v10799_v26 }
 0x23a   : > { %13609 = vst [vmem:[#allocation53_spill] sm:$0xff] %v10807_v62  ;;  %13610 = vst [vmem:[#allocation54_spill] sm:$0xff] %v10814_v0  ;;  %v1021_v7 = vrot.slane %v834_v30, %v9996_v48  ;;  %v4499_v38 = vcombine.low %v10788_v34, %v10807_v62  ;;  %v1079_v22 = vunpack.i.h.s16 %v10785_v23  ;;  %v13613_v21 = vcombine.low %v10399_v25, %v10679_v3 }
 0x23b   : > { %13611 = vst [vmem:[#allocation55_spill] sm:$0xff] %v10817_v63  ;;  %13612 = vst [vmem:[#allocation56_spill] sm:$0xff] %v10820_v14  ;;  %v4491_v30 = vcombine.low %v10817_v63, %v10810_v60  ;;  %v2385_v31 = vcombine.low %v10778_v12, %v10820_v14  ;;  %v4515_v33 = vcombine.low %v10759_v1, %v10824_v59  ;;  %v491_v63 = vld [vmem:[%s9885_s22 + $0x80] sm:$0xff] }
 0x23c   : > { %v10836_v43 = vrot.slane %v13613_v21, %v10009_v54  ;;  %v1022_v45 = vcombine.high %v1021_v7, %v1021_v7  ;;  %v10850_v41 = vrot.slane %v1186_v47, %v10009_v54  ;;  %v4506_v21 = vrot.slane %v4499_v38, %v10009_v54 }
 0x23d   : > { %v10854_v3 = vrot.slane %v1021_v7, %v9996_v48  ;;  %v8676_v42 = vpack.c.bf16 %v10709_v4, %v10709_v4  ;;  %v4498_v5 = vrot.slane %v4491_v30, %v10009_v54  ;;  %v10862_v24 = vrot.slane %v2385_v31, %v10009_v54  ;;  %v1709_v30 = vpop.permute.xlu0 %1708  ;;  %v478_v7 = vld [vmem:[%s9885_s22 + $0x18] sm:$0x1] }
 0x23e   : > { %13616 = vst [vmem:[#allocation59_spill] sm:$0xff] %v10850_v41  ;;  %v4522_v53 = vrot.slane %v4515_v33, %v10009_v54  ;;  %v10866_v47 = vpack.i.b16 %v10814_v0, %v1079_v22  ;;  %v4507_v38 = vcombine.low %v4506_v21, %v10850_v41  ;;  %v825_v4 = vmul.f32 %v10683_v27, %v490_v6 }
 0x23f   : > { %13617 = vst [vmem:[#allocation60_spill] sm:$0xff] %v10854_v3  ;;  %13618 = vst [vmem:[#allocation61_spill] sm:$0xff] %v10862_v24  ;;  %v2256_v11 = vrot.slane %v8676_v42, %v9996_v48  ;;  %v10875_v33 = vrot.slane %v1022_v45, %v9996_v48  ;;  %v826_v22 = vmul.f32 %v10683_v27, %v491_v63 }
 0x240   : > { %4600 = vst.msk [vmem:[#allocation4 + $0x8] sm:$0xf] %vm1278_vm13, %v4498_v5  ;;  %v4523_v31 = vcombine.low %v4522_v53, %v10862_v24  ;;  %v10879_v21 = vmul.f32 %v10683_v27, %v492_v2  ;;  %v4514_v42 = vrot.slane %v4507_v38, %v10009_v54  ;;  %v8709_v5 = vpack.c.bf16 %v825_v4, %v825_v4  ;;  %v9599_v53 = vld [vmem:[%s9885_s22 + $0x70] sm:$0xff] }
 0x241   : > { %1725 = vst.msk [vmem:[#allocation4 + $0x6c] sm:$0xf] %vm1719_vm9, %v1709_v30  ;;  %v10885_v6 = vrot.slane %v2256_v11, %v9996_v48  ;;  %v824_v45 = vmul.f32 %v9599_v53, %v10683_v27  ;;  %v10893_v2 = vcombine.high %v10854_v3, %v10854_v3  ;;  %v1233_v19 = vcombine.low %v10866_v47, %v10875_v33 }
 0x242   : > { %13619 = vst [vmem:[#allocation62_spill] sm:$0xff] %v10879_v21  ;;  %v4530_v63 = vrot.slane %v4523_v31, %v10009_v54  ;;  %v836_v38 = vpack.c.bf16 %v10879_v21, %v826_v22  ;;  %4601 = vst.msk [vmem:[#allocation4 + $0x1c] sm:$0xf] %vm1278_vm13, %v4514_v42  ;;  %v13621_v11 = vunpack.i.h.s16 %v10814_v0  ;;  %v3486_v53 = vrot.slane %v8709_v5, %v9996_v48  ;;  %v9600_v22 = vld [vmem:[%s9885_s22 + $0x10] sm:$0xff] }
 0x243   : > { %13620 = vst [vmem:[#allocation63_spill] sm:$0xff] %v10893_v2  ;;  %v835_v29 = vpack.c.bf16 %v825_v4, %v824_v45  ;;  %v8677_v31 = vpack.c.bf16 %v10723_v35, %v10723_v35  ;;  %v10909_v44 = vcombine.high %v10875_v33, %v10875_v33  ;;  %v812_v42 = vmul.f32 %v9600_v22, %v10683_v27 }
 0x244   : > { %v8683_v30 = vpack.i.b16 %v10885_v6, %v13621_v11  ;;  %4602 = vst.msk [vmem:[#allocation4 + $0x30] sm:$0xf] %vm1278_vm13, %v4530_v63  ;;  %v3830_v51 = vrot.slane %v836_v38, %v9996_v48  ;;  %v813_v21 = vmul.f32 %v10683_v27, %v478_v7  ;;  %v3493_v4 = vrot.slane %v3486_v53, %v9996_v48 }
 0x245   : > { %v10917_v5 = vrot.slane %v835_v29, %v9996_v48  ;;  %v2271_v35 = vrot.slane %v8677_v31, %v9996_v48  ;;  %v10921_v45 = vrot.slane %v1233_v19, %v10009_v54  ;;  %v10924_v38 = vunpack.i.h.s16 %v10909_v44 }
 0x246   : > { %v2409_v11 = vcombine.low %v8683_v30, %v10893_v2  ;;  %v3831_v63 = vcombine.high %v3830_v51, %v3830_v51  ;;  %v829_v56 = vpack.c.bf16 %v813_v21, %v812_v42  ;;  %v3494_v7 = vunpack.i.l.s16 %v3493_v4 }
 0x247   : > { %13622 = vst [vmem:[#allocation64_spill] sm:$0xff] %v10921_v45  ;;  %13623 = vst [vmem:[#allocation65_spill] sm:$0xff] %v10924_v38  ;;  %v2791_v30 = vcombine.high %v10917_v5, %v10917_v5  ;;  %v10932_v29 = vrot.slane %v2271_v35, %v9996_v48  ;;  %v10935_v53 = vrot.slane %v3830_v51, %v9996_v48 }
 0x248   : > { %v10927_v22 = vrot.slane %v2409_v11, %v10009_v54  ;;  %v10938_v19 = vrot.slane %v3831_v63, %v9996_v48  ;;  %v901_v31 = vrot.slane %v829_v56, %v9996_v48  ;;  %v13628_v42 = vcombine.low %v10690_v28, %v10693_v17 }
 0x249   : > { %13625 = vst [vmem:[#allocation67_spill] sm:$0xff] %v10932_v29  ;;  %13626 = vst [vmem:[#allocation68_spill] sm:$0xff] %v10935_v53  ;;  %v3613_v35 = vrot.slane %v3494_v7, %v10009_v54  ;;  %v10951_v49 = vrot.slane %v2791_v30, %v9996_v48  ;;  %v2285_v51 = vunpack.i.l.s16 %v10932_v29  ;;  %v1913_v56 = vrot.slane %v10924_v38, %v10009_v54  ;;  %v9153_v17 = vld [vmem:[#allocation4 + $0x8] ss:$20 sps:$4 sm:$0xff]  }
 0x24a   : > { %13624 = vst [vmem:[#allocation66_spill] sm:$0xff] %v10927_v22  ;;  %13627 = vst [vmem:[#allocation69_spill] sm:$0xff] %v10938_v19  ;;  %v10945_v11 = vrot.slane %v13628_v42, %v10009_v54  ;;  %v4531_v55 = vcombine.low %v10921_v45, %v10927_v22  ;;  %v10956_v63 = vcombine.high %v10938_v19, %v10938_v19  ;;  %v9155_v22 = vld [vmem:[#allocation4 + $0xc] ss:$20 sps:$4 sm:$0xff]  }
 0x24b   : > { %13629 = vst [vmem:[#allocation70_spill] sm:$0xff] %v10951_v49  ;;  %v902_v28 = vcombine.high %v901_v31, %v901_v31  ;;  %v10961_v42 = vrot.slane %v901_v31, %v9996_v48  ;;  %v3620_v30 = vrot.slane %v3613_v35, %v10009_v54  ;;  %v10967_v25 = vcombine.high %v10951_v49, %v10951_v49 }
 0x24c   : > { %13630 = vst [vmem:[#allocation71_spill] sm:$0xff] %v10956_v63  ;;  %v4538_v7 = vrot.slane %v4531_v55, %v10009_v54  ;;  %v2439_v41 = vrot.slane %v2285_v51, %v10009_v54  ;;  %v10972_v29 = vcombine.high %v10935_v53, %v10935_v53  ;;  %v3854_v38 = vunpack.i.l.s16 %v10956_v63  ;;  %5271 = vmatprep.mubr.bf16.mxu0 %v9155_v22 }
 0x24d   : > { %13631 = vst [vmem:[#allocation72_spill] sm:$0xff] %v10967_v25  ;;  %v4209_v31 = vunpack.i.h.s16 %v10956_v63  ;;  %v10977_v57 = vrot.slane %v902_v28, %v9996_v48  ;;  %3633 = vrot.lane.b32.xlu1 %v3620_v30, %s9737_s25  ;;  %v13417_v55 = vunpack.i.h.s16 %v10967_v25  ;;  %v2814_v51 = vunpack.i.l.s16 %v10967_v25  ;;  %5272 = vmatmul.mubr.bf16.vlgmr.msra.gmra.mrb[4].mxu0 %v9153_v17 }
 0x24e   : > { %13632 = vst [vmem:[#allocation73_spill] sm:$0xff] %v10972_v29  ;;  %4603 = vst.msk [vmem:[#allocation4 + $0x44] sm:$0xf] %vm1278_vm13, %v4538_v7  ;;  %v2446_v35 = vrot.slane %v2439_v41, %v10009_v54  ;;  %v8672_v26 = vpack.c.bf16 %v813_v21, %v813_v21  ;;  %v3978_v62 = vrot.slane %v3854_v38, %v10009_v54  ;;  %v475_v38 = vld [vmem:[%s9885_s22] sm:$0xff]  ;;  %v13638_v29 = vunpack.i.h.s16 %v10274_v36 }
 0x24f   : > { %v4309_v28 = vrot.slane %v4209_v31, %v10009_v54  ;;  %v10988_v22 = vcombine.high %v10977_v57, %v10977_v57  ;;  %v10993_v30 = vpack.i.b16 %v3493_v4, %v13417_v55  ;;  %v1920_v41 = vrot.slane %v1913_v56, %v10009_v54  ;;  %v476_v56 = vld [vmem:[%s9885_s22 + $0x8] sm:$0x1]  ;;  %s13636_s22 = smov 96  }
 0x250   : > { %2459 = vrot.lane.b32.xlu0 %v2446_v35, %s9739_s19  ;;  %v10999_v17 = vcombine.high %v10961_v42, %v10961_v42  ;;  %v2196_v21 = vrot.slane %v8672_v26, %v9996_v48  ;;  %v3985_v31 = vrot.slane %v3978_v62, %v10009_v54  ;;  %v2959_v32 = vrot.slane %v2814_v51, %v10009_v54 }
 0x251   : > { %13633 = vst [vmem:[#allocation74_spill] sm:$0xff] %v10993_v30  ;;  %v1787_v7 = vcombine.low %v10977_v57, %v10988_v22  ;;  %v13634_v4 = vunpack.i.h.s16 %v10732_v40  ;;  %v4316_v63 = vrot.slane %v4309_v28, %v10009_v54  ;;  %v13430_v62 = vunpack.i.h.s16 %v10738_v8 }
 0x252   : > { %v11017_v26 = vrot.slane %v2196_v21, %v9996_v48  ;;  %3998 = vrot.lane.b32.xlu1 %v3985_v31, %s9739_s19  ;;  %v810_v25 = vmul.f32 %v10683_v27, %v475_v38  ;;  %v811_v31 = vmul.f32 %v10683_v27, %v476_v56  ;;  %v2966_v55 = vrot.slane %v2959_v32, %v10009_v54 }
 0x253   : > { %v11010_v35 = vpack.i.b16 %v10751_v46, %v13634_v4  ;;  %v1795_v51 = vrot.slane %v1787_v7, %v10009_v54  ;;  %v4223_v4 = vcombine.low %v10741_v16, %v10766_v61  ;;  %v8653_v21 = vpack.i.b16 %v10748_v39, %v13430_v62 }
 0x254   : > { %13635 = vst [vmem:[#allocation75_spill] sm:$0xff] %v11017_v26  ;;  %1933 = vrot.lane.b32.xlu0 %v1920_v41, %s9737_s25  ;;  %v8710_v28 = vpack.i.b16 %v10751_v46, %v11017_v26  ;;  %v13435_v7 = vunpack.i.h.s16 %v10726_v20  ;;  %v1185_v38 = vcombine.low %v10788_v34, %v10738_v8  ;;  %v8627_v41 = vpack.i.b16 %v10726_v20, %v10774_v58 }
 0x255   : > { %v1788_v19 = vcombine.low %v10999_v17, %v11010_v35  ;;  %v1835_v24 = vcombine.low %v10745_v15, %v8653_v21  ;;  %v828_v53 = vpack.c.bf16 %v811_v31, %v810_v25  ;;  %v8671_v62 = vpack.c.bf16 %v811_v31, %v811_v31  ;;  %v9158_v21 = vld [vmem:[#allocation4 + $0x30] ss:$20 sps:$4 sm:$0xff]  }
 0x256   : > { %v3503_v26 = vcombine.low %v10999_v17, %v8710_v28  ;;  %2979 = vrot.lane.b32.xlu1 %v2966_v55, %s13636_s22  ;;  %v4230_v56 = vrot.slane %v4223_v4, %v10009_v54  ;;  %v11048_v32 = vpack.i.b16 %v10741_v16, %v13435_v7  ;;  %v13639_v49 = vunpack.i.h.s16 %v10289_v9 }
 0x257   : > { %v1802_v30 = vrot.slane %v1788_v19, %v10009_v54  ;;  %v9156_v19 = vld [vmem:[#allocation4 + $0x34] ss:$20 sps:$4 sm:$0xff]   ;;  %v11059_v55 = vrot.slane %v1835_v24, %v10009_v54  ;;  %v2181_v4 = vrot.slane %v8671_v62, %v9996_v48  ;;  %v11065_v36 = vrot.slane %v1185_v38, %v10009_v54 }
 0x258   : > { %13637 = vst [vmem:[#allocation76_spill] sm:$0xff] %v11048_v32  ;;  %v11054_v28 = vpack.i.b16 %v13639_v49, %v13638_v29  ;;  %4329 = vrot.lane.b32.xlu0 %v4316_v63, %s13636_s22  ;;  %v3510_v25 = vrot.slane %v3503_v26, %v10009_v54  ;;  %v3876_v9 = vcombine.low %v11048_v32, %v10791_v18  ;;  %v1056_v18 = vunpack.i.h.s16 %v10751_v46 }
 0x259   : > { %v1803_v27 = vcombine.low %v1795_v51, %v1802_v30  ;;  %v877_v30 = vrot.slane %v828_v53, %v9996_v48  ;;  %13640 = vst [vmem:[#allocation77_spill] sm:$0xff] %v11065_v36  ;;  %v1161_v49 = vcombine.low %v10751_v46, %v8627_v41  ;;  %5279 = vmatprep.mubr.bf16.mxu0 %v9156_v19 }
 0x25a   : > { %v3511_v29 = vcombine.low %v1795_v51, %v3510_v25  ;;  %v3860_v53 = vcombine.low %v10732_v40, %v10755_v52  ;;  %5280 = vmatmul.mubr.bf16.gmra.mrb[8].mxu0 %v9158_v21  ;;  %v4231_v26 = vcombine.low %v4230_v56, %v11059_v55  ;;  %v2188_v62 = vrot.slane %v2181_v4, %v9996_v48 }
 0x25b   : > { %v1810_v31 = vrot.slane %v1803_v27, %v10009_v54  ;;  %v878_v63 = vcombine.high %v877_v30, %v877_v30  ;;  %v11071_v24 = vrot.slane %v877_v30, %v9996_v48  ;;  %v3883_v38 = vrot.slane %v3876_v9, %v10009_v54 }
 0x25c   : > { %v3518_v41 = vrot.slane %v3511_v29, %v10009_v54  ;;  %v2119_v27 = vcombine.low %v10836_v43, %v10945_v11  ;;  %v2080_v19 = vcombine.low %v11054_v28, %v10306_v13  ;;  %v8678_v25 = vpack.i.b16 %v10977_v57, %v2188_v62 }
 0x25d   : > { %13641 = vst [vmem:[#allocation78_spill] sm:$0xff] %v11071_v24  ;;  %1923 = vrot.lane.b32.xlu0 %v1810_v31, %s9737_s25  ;;  %v11082_v51 = vrot.slane %v878_v63, %v9996_v48  ;;  %v11090_v56 = vcombine.high %v11071_v24, %v11071_v24  ;;  %v11094_v30 = vrot.slane %v1161_v49, %v10009_v54  ;;  %v1058_v4 = vunpack.i.h.s16 %v10755_v52 }
 0x25e   : > { %3621 = vrot.lane.b32.xlu1 %v3518_v41, %s9737_s25  ;;  %v3867_v11 = vrot.slane %v3860_v53, %v10009_v54  ;;  %v11104_v31 = vpack.i.b16 %v10755_v52, %v1056_v18  ;;  %v8697_v9 = vpack.i.b16 %v10732_v40, %v10988_v22  ;;  %v4238_v29 = vrot.slane %v4231_v26, %v10009_v54 }
 0x25f   : > { %13642 = vst [vmem:[#allocation79_spill] sm:$0xff] %v11094_v30  ;;  %v11100_v21 = vcombine.high %v11082_v51, %v11082_v51  ;;  %v2298_v49 = vcombine.low %v11090_v56, %v8678_v25  ;;  %v3884_v63 = vcombine.low %v3883_v38, %v11065_v36  ;;  %v11112_v62 = vpack.i.b16 %v10774_v58, %v1058_v4 }
 0x260   : > { %v2850_v53 = vcombine.low %v11104_v31, %v10726_v20  ;;  %v2825_v18 = vcombine.low %v10961_v42, %v10999_v17  ;;  %v2826_v7 = vcombine.low %v10977_v57, %v8697_v9  ;;  %v1070_v38 = vunpack.i.h.s16 %v10748_v39 }
 0x261   : > { %v2297_v41 = vcombine.low %v11082_v51, %v11100_v21  ;;  %v2312_v26 = vrot.slane %v2298_v49, %v10009_v54  ;;  %v2849_v25 = vcombine.low %v11010_v35, %v11112_v62  ;;  %v8712_v4 = vpack.i.b16 %v10748_v39, %v10729_v10 }
 0x262   : > { %4319 = vrot.lane.b32.xlu1 %v4238_v29, %s13636_s22  ;;  %v3868_v32 = vcombine.low %v3867_v11, %v11094_v30  ;;  %v2864_v36 = vrot.slane %v2850_v53, %v10009_v54  ;;  %v3908_v9 = vcombine.low %v10820_v14, %v10854_v3  ;;  %v3891_v49 = vrot.slane %v3884_v63, %v10009_v54 }
 0x263   : > { %v2305_v52 = vrot.slane %v2297_v41, %v10009_v54  ;;  %v11135_v35 = vrot.slane %v2849_v25, %v10009_v54  ;;  %v2840_v40 = vrot.slane %v2826_v7, %v10009_v54  ;;  %v11139_v10 = vpack.i.b16 %v10759_v1, %v1070_v38 }
 0x264   : > { %v2833_v41 = vrot.slane %v2825_v18, %v10009_v54  ;;  %v3535_v11 = vcombine.low %v10745_v15, %v8712_v4  ;;  %v1072_v53 = vunpack.i.h.s16 %v10759_v1  ;;  %v3915_v25 = vrot.slane %v3908_v9, %v10009_v54 }
 0x265   : > { %v2313_v29 = vcombine.low %v2305_v52, %v2312_v26  ;;  %v2865_v30 = vcombine.low %v11135_v35, %v2864_v36  ;;  %v1836_v63 = vcombine.low %v10766_v61, %v11139_v10  ;;  %v2346_v7 = vcombine.low %v10774_v58, %v10788_v34 }
 0x266   : > { %3988 = vrot.lane.b32.xlu1 %v3891_v49, %s9739_s19  ;;  %v8655_v52 = vpack.i.b16 %v10778_v12, %v1072_v53  ;;  %v11154_v15 = vrot.slane %v2119_v27, %v10009_v54  ;;  %v11157_v18 = vrot.slane %v2080_v19, %v10009_v54  ;;  %v3875_v36 = vrot.slane %v3868_v32, %v10009_v54 }
 0x267   : > { %v2320_v38 = vrot.slane %v2313_v29, %v10009_v54  ;;  %v2841_v26 = vcombine.low %v2833_v41, %v2840_v40  ;;  %v1850_v4 = vrot.slane %v1836_v63, %v10009_v54  ;;  %v2889_v9 = vcombine.low %v11139_v10, %v10762_v37 }
 0x268   : > { %v2872_v49 = vrot.slane %v2865_v30, %v10009_v54  ;;  %v1859_v29 = vcombine.low %v8655_v52, %v10781_v50  ;;  %v13443_v27 = vunpack.i.h.s16 %v10762_v37  ;;  %v11169_v19 = vpack.i.b16 %v10762_v37, %v10778_v12 }
 0x269   : > { %2447 = vrot.lane.b32.xlu0 %v2320_v38, %s9739_s19  ;;  %v1851_v32 = vcombine.low %v11059_v55, %v1850_v4  ;;  %v3542_v40 = vrot.slane %v3535_v11, %v10009_v54  ;;  %v3916_v41 = vcombine.low %v3915_v25, %v10921_v45  ;;  %v2360_v53 = vrot.slane %v2346_v7, %v10009_v54 }
 0x26a   : > { %13643 = vst [vmem:[#allocation80_spill] sm:$0xff] %v11169_v19  ;;  %2969 = vrot.lane.b32.xlu1 %v2872_v49, %s13636_s22  ;;  %v11177_v30 = vrot.slane %v1859_v29, %v10009_v54  ;;  %v2896_v63 = vrot.slane %v2889_v9, %v10009_v54  ;;  %v8632_v38 = vpack.i.b16 %v10781_v50, %v13443_v27  ;;  %v13445_v52 = vunpack.i.h.s16 %v10854_v3 }
 0x26b   : > { %v2848_v14 = vrot.slane %v2841_v26, %v10009_v54  ;;  %v3892_v11 = vcombine.low %v10748_v39, %v11169_v19  ;;  %v1084_v25 = vunpack.i.h.s16 %v10875_v33  ;;  %v8698_v7 = vpack.i.b16 %v10738_v8, %v10766_v61 }
 0x26c   : > { %v1858_v9 = vrot.slane %v1851_v32, %v10009_v54  ;;  %v3543_v49 = vcombine.low %v3542_v40, %v1850_v4  ;;  %v1209_v29 = vcombine.low %v10759_v1, %v8632_v38  ;;  %v8656_v50 = vpack.i.b16 %v10875_v33, %v13445_v52 }
 0x26d   : > { %3986 = vrot.lane.b32.xlu0 %v3875_v36, %s9739_s19  ;;  %v8657_v26 = vpack.i.b16 %v10893_v2, %v1084_v25  ;;  %v2873_v39 = vcombine.low %v10741_v16, %v8698_v7  ;;  %v1086_v27 = vunpack.i.h.s16 %v10893_v2  ;;  %v2386_v19 = vcombine.low %v10824_v59, %v10866_v47 }
 0x26e   : > { %1927 = vrot.lane.b32.xlu1 %v1858_v9, %s9737_s25  ;;  %v3923_v36 = vrot.slane %v3916_v41, %v10009_v54  ;;  %v2361_v4 = vcombine.low %v10810_v60, %v2360_v53  ;;  %v2897_v32 = vcombine.low %v2896_v63, %v11177_v30  ;;  %v2905_v40 = vcombine.low %v10785_v23, %v8656_v50  ;;  %v13644_v41 = vld [vmem:[#allocation70_spill] sm:$0xff] }
 0x26f   : > { %v3899_v38 = vrot.slane %v3892_v11, %v10009_v54  ;;  %v1883_v25 = vcombine.low %v10814_v0, %v8657_v26  ;;  %v2880_v7 = vrot.slane %v2873_v39, %v10009_v54  ;;  %v11210_v52 = vpack.i.b16 %v10909_v44, %v1086_v27 }
 0x270   : > { %v3550_v59 = vrot.slane %v3543_v49, %v10009_v54  ;;  %v8714_v60 = vpack.i.b16 %v10875_v33, %v10885_v6  ;;  %v11218_v47 = vrot.slane %v10917_v5, %v9996_v48  ;;  %v2811_v53 = vunpack.i.h.s16 %v13644_v41 }
 0x271   : > { %2967 = vrot.lane.b32.xlu0 %v2848_v14, %s13636_s22  ;;  %v11222_v63 = vrot.slane %v1209_v29, %v10009_v54  ;;  %v1891_v11 = vrot.slane %v1883_v25, %v10009_v54  ;;  %v11226_v27 = vrot.slane %v2905_v40, %v10009_v54  ;;  %v1884_v14 = vcombine.low %v8656_v50, %v11210_v52 }
 0x272   : > { %3992 = vrot.lane.b32.xlu1 %v3923_v36, %s9739_s19  ;;  %v2400_v6 = vrot.slane %v2386_v19, %v10009_v54  ;;  %v3567_v9 = vcombine.low %v8714_v60, %v11210_v52  ;;  %v11234_v5 = vcombine.high %v11218_v47, %v11218_v47  ;;  %v13448_v49 = vunpack.i.h.s16 %v11218_v47  ;;  %v13649_v60 = vld [vmem:[#allocation68_spill] sm:$0xff] }
 0x273   : > { %13645 = vst [vmem:[#allocation70_spill] sm:$0xff] %v11222_v63  ;;  %v2904_v29 = vrot.slane %v2897_v32, %v10009_v54  ;;  %v3900_v39 = vcombine.low %v3899_v38, %v11222_v63  ;;  %v4255_v40 = vcombine.low %v11226_v27, %v1891_v11  ;;  %v11241_v50 = vcombine.low %v2880_v7, %v11059_v55  ;;  %v13650_v63 = vld [vmem:[#allocation61_spill] sm:$0xff] }
 0x274   : > { %v1898_v19 = vrot.slane %v1884_v14, %v10009_v54  ;;  %v11248_v36 = vpack.i.b16 %v13644_v41, %v13448_v49  ;;  %v11251_v25 = vpack.i.b16 %v11234_v5, %v2811_v53  ;;  %v8723_v32 = vpack.i.b16 %v11218_v47, %v10909_v44 }
 0x275   : > { %3625 = vrot.lane.b32.xlu0 %v3550_v59, %s9737_s25  ;;  %v2368_v38 = vrot.slane %v2361_v4, %v10009_v54  ;;  %v3574_v55 = vrot.slane %v3567_v9, %v10009_v54  ;;  %v2813_v7 = vunpack.i.h.s16 %v11234_v5  ;;  %v13648_v59 = vld [vmem:[#allocation73_spill] sm:$0xff]  ;;  %v2401_v49 = vcombine.low %v13650_v63, %v2400_v6  ;;  %v9159_v4 = vld [vmem:[%s13346_s6 + $0x40] sm:$0xff]   ;;  %v13651_v6 = vld [vmem:[#allocation72_spill] sm:$0xff] }
 0x276   : > { %13646 = vst [vmem:[#allocation81_spill] sm:$0xff] %v11248_v36  ;;  %13647 = vst [vmem:[#allocation82_spill] sm:$0xff] %v11251_v25  ;;  %v3949_v14 = vcombine.low %v13649_v60, %v13648_v59  ;;  %2973 = vrot.lane.b32.xlu1 %v2904_v29, %s13636_s22  ;;  %v3924_v53 = vcombine.low %v10893_v2, %v11248_v36  ;;  %v3925_v45 = vcombine.low %v8723_v32, %v11251_v25  ;;  %v13653_v2 = vld [vmem:[#allocation69_spill] sm:$0xff] }
 0x277   : > { %v8699_v34 = vpack.i.b16 %v10854_v3, %v10814_v0  ;;  %v3907_v9 = vrot.slane %v3900_v39, %v10009_v54  ;;  %v4262_v8 = vrot.slane %v4255_v40, %v10009_v54  ;;  %v2888_v29 = vrot.slane %v11241_v50, %v10009_v54  ;;  %8868 = vmatprep.subr.bf16.mxu1 %v9159_v4 }
 0x278   : > { %v11275_v63 = vpack.i.b16 %v13651_v6, %v2813_v7  ;;  %v1899_v32 = vcombine.low %v1891_v11, %v1898_v19  ;;  %v3939_v36 = vrot.slane %v3925_v45, %v10009_v54  ;;  %v2929_v0 = vcombine.low %v11210_v52, %v13644_v41  ;;  %v9161_v7 = vld [vmem:[%s13346_s6 + $0x48] sm:$0xff]  }
 0x279   : > { %2451 = vrot.lane.b32.xlu0 %v2368_v38, %s9739_s19  ;;  %v2906_v25 = vcombine.low %v8699_v34, %v8657_v26  ;;  %v3575_v3 = vcombine.low %v1891_v11, %v3574_v55  ;;  %v3932_v39 = vrot.slane %v3924_v53, %v10009_v54  ;;  %v3963_v50 = vrot.slane %v3949_v14, %v10009_v54 }
 0x27a   : > { %13652 = vst [vmem:[#allocation68_spill] sm:$0xff] %v11275_v63  ;;  %v3948_v40 = vcombine.low %v11275_v63, %v13653_v2  ;;  %4323 = vrot.lane.b32.xlu1 %v4262_v8, %s13636_s22  ;;  %v2930_v19 = vcombine.low %v11218_v47, %v11234_v5  ;;  %v1040_v45 = vunpack.i.h.s16 %v11071_v24  ;;  %v1042_v34 = vunpack.i.h.s16 %v11082_v51  ;;  %v9160_v8 = vld [vmem:[%s13346_s6] sm:$0xff]  }
 0x27b   : > { %v1044_v52 = vunpack.i.h.s16 %v11090_v56  ;;  %v11291_v26 = vcombine.low %v3932_v39, %v3939_v36  ;;  %v1731_v55 = vunpack.i.h.s16 %v11100_v21  ;;  %v1906_v14 = vrot.slane %v1899_v32, %v10009_v54  ;;  %8869 = vmatpush3.bf16.msra.mxu1 %v9160_v8  ;;  %v9162_v32 = vld [vmem:[%s13346_s6 + $0x8] sm:$0xff]  }
 0x27c   : > { %v3956_v11 = vrot.slane %v3948_v40, %v10009_v54  ;;  %v2408_v36 = vrot.slane %v2401_v49, %v10009_v54  ;;  %v2920_v53 = vrot.slane %v2906_v25, %v10009_v54  ;;  %v11307_v4 = vrot.slane %v2929_v0, %v10009_v54  ;;  %8870 = vmatprep.subr.bf16.mxu1 %v9161_v7 }
 0x27d   : > { %3990 = vrot.lane.b32.xlu0 %v3907_v9, %s9739_s19  ;;  %v8648_v40 = vpack.i.b16 %v11090_v56, %v1042_v34  ;;  %v8649_v38 = vpack.i.b16 %v11100_v21, %v1044_v52  ;;  %v13654_v63 = vunpack.i.h.s16 %v10961_v42  ;;  %v3582_v9 = vrot.slane %v3575_v3, %v10009_v54  ;;  %v9163_v3 = vld [vmem:[%s13346_s6 + $0x50] sm:$0xff]  }
 0x27e   : > { %v3964_v39 = vcombine.low %v3956_v11, %v3963_v50  ;;  %1931 = vrot.lane.b32.xlu1 %v1906_v14, %s9737_s25  ;;  %v3849_v49 = vunpack.i.h.s16 %v13649_v60  ;;  %v3851_v25 = vunpack.i.h.s16 %v13653_v2  ;;  %v3853_v0 = vunpack.i.h.s16 %v13648_v59 }
 0x27f   : > { %v1741_v24 = vpack.i.b16 %v13654_v63, %v1731_v55  ;;  %v3947_v50 = vrot.slane %v11291_v26, %v10009_v54  ;;  %v2944_v63 = vrot.slane %v2930_v19, %v10009_v54  ;;  %v8647_v34 = vpack.i.b16 %v11082_v51, %v1040_v45  ;;  %v13655_v55 = vld [vmem:[#allocation71_spill] sm:$0xff]  ;;  %8871 = vmatpush3.bf16.msra.mxu1 %v9162_v32 }
 0x280   : > { %v8725_v60 = vpack.i.b16 %v13653_v2, %v3849_v49  ;;  %v8726_v11 = vpack.i.b16 %v13648_v59, %v3851_v25  ;;  %v8727_v8 = vpack.i.b16 %v13655_v55, %v3853_v0  ;;  %v1733_v7 = vunpack.i.h.s16 %v10774_v58  ;;  %v13657_v25 = vld [vmem:[#allocation48_spill] sm:$0xff]  ;;  %8872 = vmatprep.subr.bf16.mxu1 %v9163_v3  ;;  %v13692_v59 = vld [vmem:[#allocation57_spill] sm:$0xff] }
 0x281   : > { %v1764_v52 = vcombine.low %v8648_v40, %v1741_v24  ;;  %2971 = vrot.lane.b32.xlu0 %v2888_v29, %s13636_s22  ;;  %v3971_v26 = vrot.slane %v3964_v39, %v10009_v54  ;;  %v2921_v19 = vcombine.low %v11226_v27, %v2920_v53  ;;  %v2945_v24 = vcombine.low %v11307_v4, %v2944_v63 }
 0x282   : > { %v1763_v45 = vcombine.low %v8647_v34, %v8649_v38  ;;  %3629 = vrot.lane.b32.xlu1 %v3582_v9, %s9737_s25  ;;  %v4279_v29 = vcombine.low %v13651_v6, %v8726_v11  ;;  %v4280_v14 = vcombine.low %v8725_v60, %v8727_v8  ;;  %v13656_v40 = vunpack.i.h.s16 %v10726_v20  ;;  %v13658_v11 = vld [vmem:[#allocation53_spill] sm:$0xff] }
 0x283   : > { %v8711_v0 = vpack.i.b16 %v13657_v25, %v1733_v7  ;;  %v1778_v58 = vrot.slane %v1764_v52, %v10009_v54  ;;  %v1812_v39 = vcombine.low %v11112_v62, %v10741_v16  ;;  %v1049_v27 = vunpack.i.h.s16 %v10977_v57  ;;  %v9165_v52 = vld [vmem:[%s13346_s6 + $0x58] sm:$0xff]  }
 0x284   : > { %v1748_v49 = vpack.i.b16 %v13656_v40, %v1733_v7  ;;  %v1051_v38 = vunpack.i.h.s16 %v10999_v17  ;;  %v4287_v53 = vrot.slane %v4279_v29, %v10009_v54  ;;  %v4294_v9 = vrot.slane %v4280_v14, %v10009_v54  ;;  %v13659_v7 = vld [vmem:[#allocation75_spill] sm:$0xff]  ;;  %v13660_v29 = vld [vmem:[#allocation52_spill] sm:$0xff] }
 0x285   : > { %2455 = vrot.lane.b32.xlu0 %v2408_v36, %s9739_s19  ;;  %v3519_v32 = vcombine.low %v11104_v31, %v8711_v0  ;;  %v2952_v63 = vrot.slane %v2945_v24, %v10009_v54  ;;  %v13464_v16 = vunpack.i.h.s16 %v10988_v22  ;;  %v1735_v62 = vunpack.i.h.s16 %v10778_v12  ;;  %v9164_v36 = vld [vmem:[%s13346_s6 + $0x10] sm:$0xff]  }
 0x286   : > { %v1811_v20 = vcombine.low %v11104_v31, %v1748_v49  ;;  %v11353_v34 = vpack.i.b16 %v10988_v22, %v1051_v38  ;;  %3996 = vrot.lane.b32.xlu1 %v3971_v26, %s9739_s19  ;;  %v1771_v31 = vrot.slane %v1763_v45, %v10009_v54  ;;  %v2369_v8 = vcombine.low %v13658_v11, %v10759_v1  ;;  %v9166_v45 = vld [vmem:[%s13346_s6 + $0x18] sm:$0xff]  }
 0x287   : > { %v3526_v60 = vrot.slane %v3519_v32, %v10009_v54  ;;  %v11370_v12 = vpack.i.b16 %v10999_v17, %v1049_v27  ;;  %v8679_v24 = vpack.i.b16 %v13659_v7, %v13464_v16  ;;  %v8713_v14 = vpack.i.b16 %v13660_v29, %v1735_v62  ;;  %8873 = vmatpush3.bf16.msra.mxu1 %v9164_v36  ;;  %v13663_v32 = vld [vmem:[#allocation34_spill] sm:$0xff]  ;;  %v13664_v36 = vld [vmem:[#allocation65_spill] sm:$0xff]  ;;  %v9169_v7 = vld [vmem:[%s13346_s6 + $0x68] sm:$0xff]  }
 0x288   : > { %v1819_v3 = vrot.slane %v1811_v20, %v10009_v54  ;;  %v13661_v26 = vunpack.i.h.s16 %v10762_v37  ;;  %v1779_v1 = vcombine.low %v1771_v31, %v1778_v58  ;;  %v4295_v49 = vcombine.low %v4287_v53, %v4294_v9  ;;  %8874 = vmatprep.subr.bf16.mxu1 %v9165_v52  ;;  %v13665_v52 = vld [vmem:[#allocation67_spill] sm:$0xff] }
 0x289   : > { %3994 = vrot.lane.b32.xlu0 %v3947_v50, %s9739_s19  ;;  %v1826_v17 = vrot.slane %v1812_v39, %v10009_v54  ;;  %v2322_v25 = vcombine.low %v11353_v34, %v10751_v46  ;;  %v2321_v27 = vcombine.low %v11370_v12, %v8679_v24  ;;  %v3551_v37 = vcombine.low %v8713_v14, %v10785_v23  ;;  %v9167_v50 = vld [vmem:[%s13346_s6 + $0x60] sm:$0xff]   ;;  %v13666_v29 = vld [vmem:[#allocation59_spill] sm:$0xff] }
 0x28a   : > { %v1755_v40 = vpack.i.b16 %v13661_v26, %v1735_v62  ;;  %v4215_v0 = vcombine.low %v11135_v35, %v1819_v3  ;;  %v2928_v58 = vrot.slane %v2921_v19, %v10009_v54  ;;  %2977 = vrot.lane.b32.xlu1 %v2952_v63, %s13636_s22  ;;  %v2376_v46 = vrot.slane %v2369_v8, %v10009_v54  ;;  %v9168_v8 = vld [vmem:[%s13346_s6 + $0x20] sm:$0xff]   ;;  %v13689_v16 = vld [vmem:[#allocation19_spill] sm:$0xff] }
 0x28b   : > { %v3527_v39 = vcombine.low %v3526_v60, %v1826_v17  ;;  %v1827_v53 = vcombine.low %v1819_v3, %v1826_v17  ;;  %v13662_v35 = vunpack.i.h.s16 %v13651_v6  ;;  %v2095_v62 = vcombine.low %v13663_v32, %v11157_v18  ;;  %8875 = vmatpush3.bf16.msra.mxu1 %v9166_v45  ;;  %v9170_v17 = vld [vmem:[%s13346_s6 + $0x28] sm:$0xff]  }
 0x28c   : > { %v4239_v38 = vcombine.low %v11139_v10, %v1755_v40  ;;  %v2329_v10 = vrot.slane %v2321_v27, %v10009_v54  ;;  %v1860_v20 = vcombine.low %v1755_v40, %v10785_v23  ;;  %v1786_v19 = vrot.slane %v1779_v1, %v10009_v54  ;;  %8876 = vmatprep.subr.bf16.mxu1 %v9167_v50 }
 0x28d   : > { %v11398_v9 = vrot.slane %v13662_v35, %v10009_v54  ;;  %2975 = vrot.lane.b32.xlu0 %v2928_v58, %s13636_s22  ;;  %v4302_v63 = vrot.slane %v4295_v49, %v10009_v54  ;;  %v8715_v31 = vpack.i.b16 %v13665_v52, %v13664_v36  ;;  %v3584_v3 = vcombine.low %v13644_v41, %v13651_v6  ;;  %v13670_v58 = vld [vmem:[#allocation31_spill] sm:$0xff]  ;;  %v13672_v35 = vld [vmem:[#allocation25_spill] sm:$0xff] }
 0x28e   : > { %v4222_v60 = vrot.slane %v4215_v0, %v10009_v54  ;;  %v2336_v23 = vrot.slane %v2322_v25, %v10009_v54  ;;  %v3558_v11 = vrot.slane %v3551_v37, %v10009_v54  ;;  %v4246_v18 = vrot.slane %v4239_v38, %v10009_v54  ;;  %v13668_v38 = vld [vmem:[#allocation29_spill] sm:$0xff] }
 0x28f   : > { %4327 = vrot.lane.b32.xlu1 %v4302_v63, %s13636_s22  ;;  %v3534_v6 = vrot.slane %v3527_v39, %v10009_v54  ;;  %v1834_v24 = vrot.slane %v1827_v53, %v10009_v54  ;;  %v2377_v14 = vcombine.low %v13666_v29, %v2376_v46  ;;  %v3583_v26 = vcombine.low %v8715_v31, %v11234_v5  ;;  %v13675_v31 = vld [vmem:[#allocation36_spill] sm:$0xff] }
 0x290   : > { %v2337_v40 = vcombine.low %v2329_v10, %v2336_v23  ;;  %v1874_v45 = vrot.slane %v1860_v20, %v10009_v54  ;;  %v11428_v1 = vrot.slane %v2095_v62, %v10009_v54  ;;  %v2410_v49 = vcombine.low %v10875_v33, %v10909_v44  ;;  %8877 = vmatpush3.bf16.msra.mxu1 %v9168_v8  ;;  %v13673_v20 = vld [vmem:[#allocation32_spill] sm:$0xff]  ;;  %v13674_v62 = vld [vmem:[#allocation39_spill] sm:$0xff] }
 0x291   : > { %1921 = vrot.lane.b32.xlu0 %v1786_v19, %s9737_s25  ;;  %v3591_v25 = vrot.slane %v3583_v26, %v10009_v54  ;;  %v3598_v0 = vrot.slane %v3584_v3, %v10009_v54  ;;  %v13667_v27 = vunpack.i.h.s16 %v11218_v47  ;;  %v13669_v50 = vunpack.i.h.s16 %v13668_v38  ;;  %8878 = vmatprep.subr.bf16.mxu1 %v9169_v7  ;;  %v9171_v47 = vld [vmem:[%s13346_s6 + $0x70] sm:$0xff]   ;;  %v13676_v23 = vld [vmem:[#allocation27_spill] sm:$0xff]  ;;  %v13677_v26 = vld [vmem:[#allocation18_spill] sm:$0xff] }
 0x292   : > { %v13671_v39 = vunpack.i.h.s16 %v13670_v58  ;;  %v3559_v53 = vcombine.low %v11177_v30, %v3558_v11  ;;  %v4247_v46 = vcombine.low %v4246_v18, %v11177_v30  ;;  %v11449_v10 = vrot.slane %v13672_v35, %v9996_v48 }
 0x293   : > { %v4210_v37 = vpack.i.b16 %v13667_v27, %v13664_v36  ;;  %v2689_v19 = vcombine.low %v13674_v62, %v13673_v20  ;;  %3623 = vrot.lane.b32.xlu1 %v3534_v6, %s9737_s25  ;;  %v11457_v63 = vcombine.low %v3591_v25, %v3598_v0  ;;  %v3025_v11 = vunpack.i.h.s16 %v13676_v23  ;;  %v13678_v27 = vld [vmem:[#allocation17_spill] sm:$0xff] }
 0x294   : > { %v3334_v33 = vpack.i.b16 %v13671_v39, %v13669_v50  ;;  %v2424_v18 = vrot.slane %v2410_v49, %v10009_v54  ;;  %v11465_v8 = vcombine.high %v11449_v10, %v11449_v10  ;;  %v13463_v7 = vunpack.i.h.s16 %v11449_v10  ;;  %8879 = vmatpush3.bf16.msra.mxu1 %v9170_v17  ;;  %v13679_v39 = vld [vmem:[#allocation66_spill] sm:$0xff] }
 0x295   : > { %v4263_v36 = vcombine.low %v4210_v37, %v11234_v5  ;;  %v2713_v50 = vcombine.low %v13678_v27, %v13677_v26  ;;  %v9172_v5 = vld [vmem:[%s13346_s6 + $0x30] sm:$0xff]   ;;  %4317 = vrot.lane.b32.xlu0 %v4222_v60, %s13636_s22  ;;  %v2344_v6 = vrot.slane %v2337_v40, %v10009_v54  ;;  %v1875_v49 = vcombine.low %v11177_v30, %v1874_v45  ;;  %v9173_v60 = vld [vmem:[%s13346_s6 + $0x78] sm:$0xff]  }
 0x296   : > { %v3395_v3 = vcombine.low %v3334_v33, %v13675_v31  ;;  %v2703_v0 = vrot.slane %v2689_v19, %v10009_v54  ;;  %v2384_v37 = vrot.slane %v2377_v14, %v10009_v54  ;;  %v2425_v33 = vcombine.low %v13679_v39, %v2424_v18  ;;  %8880 = vmatprep.subr.bf16.mxu1 %v9171_v47  ;;  %v13680_v45 = vld [vmem:[#allocation40_spill] sm:$0xff]  ;;  %v13681_v47 = vld [vmem:[#allocation30_spill] sm:$0xff] }
 0x297   : > { %v4270_v25 = vrot.slane %v4263_v36, %v10009_v54  ;;  %v3027_v35 = vunpack.i.h.s16 %v11465_v8  ;;  %2449 = vrot.lane.b32.xlu1 %v2344_v6, %s9739_s19  ;;  %v11489_v30 = vpack.i.b16 %v13676_v23, %v13463_v7  ;;  %v8707_v14 = vpack.i.b16 %v11465_v8, %v3025_v11  ;;  %v13688_v7 = vld [vmem:[#allocation20_spill] sm:$0xff] }
 0x298   : > { %v3402_v17 = vrot.slane %v3395_v3, %v10009_v54  ;;  %v2727_v40 = vrot.slane %v2713_v50, %v10009_v54  ;;  %v8721_v20 = vpack.i.b16 %v13678_v27, %v13680_v45  ;;  %v3566_v62 = vrot.slane %v3559_v53, %v10009_v54  ;;  %v9601_v3 = vld [vmem:[#allocation2 + $0x68] sm:$0x1]  ;;  %8881 = vmatpush3.bf16.msra.mxu1 %v9172_v5  ;;  %v13682_v50 = vld [vmem:[#allocation26_spill] sm:$0xff] }
 0x299   : > { %v4254_v19 = vrot.slane %v4247_v46, %v10009_v54  ;;  %v11498_v36 = vpack.i.b16 %v13681_v47, %v3027_v35  ;;  %v8690_v18 = vpack.c.bf16 %v9601_v3, %v9601_v3  ;;  %1925 = vrot.lane.b32.xlu0 %v1834_v24, %s9737_s25  ;;  %v11502_v6 = vrot.slane %v1875_v49, %v10009_v54  ;;  %v13683_v27 = vld [vmem:[#allocation46_spill] sm:$0xff]  ;;  %v13684_v35 = vld [vmem:[#allocation35_spill] sm:$0xff]  ;;  %v9174_v24 = vld [vmem:[%s13346_s6 + $0x38] sm:$0xff]  }
 0x29a   : > { %v4271_v11 = vcombine.low %v11307_v4, %v4270_v25  ;;  %v2704_v39 = vcombine.low %v13682_v50, %v2703_v0  ;;  %v3739_v45 = vcombine.low %v8721_v20, %v13683_v27  ;;  %v11510_v46 = vrot.slane %v2425_v33, %v10009_v54  ;;  %8882 = vmatprep.subr.bf16.mxu1 %v9173_v60  ;;  %v11520_v4 = vld [vmem:[%s13346_s6 + $0x100] sm:$0xff]   ;;  %v13685_v0 = vld [vmem:[#allocation41_spill] sm:$0xff] }
 0x29b   : > { %v3403_v3 = vcombine.low %v13684_v35, %v3402_v17  ;;  %v2574_v5 = vrot.slane %v8690_v18, %v9996_v48  ;;  %3627 = vrot.lane.b32.xlu1 %v3566_v62, %s9737_s25  ;;  %v3411_v49 = vcombine.low %v13677_v26, %v8707_v14  ;;  %v3412_v25 = vcombine.low %v11489_v30, %v11498_v36  ;;  %v13686_v17 = vld [vmem:[#allocation22_spill] sm:$0xff] }
 0x29c   : > { %v2728_v33 = vcombine.low %v13685_v0, %v2727_v40  ;;  %v13687_v60 = vld [vmem:[#allocation38_spill] sm:$0xff]  ;;  %v3746_v18 = vrot.slane %v3739_v45, %v10009_v54  ;;  %v3756_v35 = vcombine.low %v13676_v23, %v13681_v47  ;;  %v4361_v62 = vcombine.low %v13689_v16, %v13688_v7  ;;  %8883 = vmatpush3.bf16.msra.mxu1 %v9174_v24  ;;  %v13691_v7 = vld [vmem:[#allocation28_spill] sm:$0xff] }
 0x29d   : > { %v4353_v20 = vcombine.low %v13687_v60, %v13686_v17  ;;  %v2581_v50 = vrot.slane %v2574_v5, %v9996_v48  ;;  %2151 = vrot.lane.b32.xlu0 %v11154_v15, %s9739_s19  ;;  %v11538_v53 = vrot.slane %v4271_v11, %v10009_v54  ;;  %v11541_v40 = vrot.slane %v2704_v39, %v10009_v54  ;;  %v13690_v17 = vld [vmem:[#allocation24_spill] sm:$0xff]  ;;  %v853_v60 = vld [vmem:[#allocation2 + $0x80] sm:$0xff]  ;;  %v854_v11 = vld [vmem:[#allocation2 + $0x88] sm:$0x1] }
 0x29e   : > { %v8724_v5 = vpack.i.b16 %v11449_v10, %v13677_v26  ;;  %v11547_v0 = vrot.slane %v3403_v3, %v10009_v54  ;;  %v3666_v24 = vunpack.i.l.s16 %v13691_v7  ;;  %v4368_v15 = vrot.slane %v4361_v62, %v10009_v54  ;;  %8994 = vmatprep.subr.bf16.mxu1 %v11520_v4 }
 0x29f   : > { %v4360_v45 = vrot.slane %v4353_v20, %v10009_v54  ;;  %v8722_v16 = vpack.i.b16 %v2581_v50, %v13690_v17  ;;  %2453 = vrot.lane.b32.xlu1 %v2384_v37, %s9739_s19  ;;  %v11555_v39 = vrot.slane %v3411_v49, %v10009_v54  ;;  %v11558_v26 = vrot.slane %v2728_v33, %v10009_v54  ;;  %v13693_v49 = vld [vmem:[#allocation23_spill] sm:$0xff] }
 0x2a0   : > { %v4117_v3 = vcombine.low %v13675_v31, %v11489_v30  ;;  %v4118_v20 = vcombine.low %v8724_v5, %v8707_v14  ;;  %v11564_v62 = vrot.slane %v3412_v25, %v10009_v54  ;;  %v11567_v7 = vcombine.low %v10836_v43, %v3746_v18 }
 0x2a1   : > { %4462 = vst.msk [vmem:[#allocation4 + $0x10] sm:$0xf] %vm1278_vm13, %v4360_v45  ;;  %v3770_v37 = vrot.slane %v3756_v35, %v10009_v54  ;;  %v4369_v33 = vcombine.low %v4368_v15, %v13693_v49  ;;  %4321 = vrot.lane.b32.xlu0 %v4254_v19, %s13636_s22  ;;  %v3755_v45 = vcombine.low %v8722_v16, %v11465_v8  ;;  %v2588_v2 = vunpack.i.l.s16 %v2581_v50  ;;  %v13694_v35 = vld [vmem:[#allocation21_spill] sm:$0xff] }
 0x2a2   : > { %4752 = vst.msk [vmem:[#allocation4 + $0x10] sm:$0xf] %vm1719_vm9, %v13692_v59  ;;  %v863_v31 = vpack.c.bf16 %v854_v11, %v853_v60  ;;  %v8735_v30 = vpack.i.b16 %v13676_v23, %v2581_v50  ;;  %v11577_v14 = vrot.slane %v3666_v24, %v10009_v54  ;;  %v4125_v18 = vrot.slane %v4117_v3, %v10009_v54  ;;  %v13695_v50 = vld [vmem:[#allocation45_spill] sm:$0xff]  ;;  %v3328_v3 = vld [vmem:[#allocation4 + $0x7c] sm:$0x1] }
 0x2a3   : > { %v4376_v25 = vrot.slane %v4369_v33, %v10009_v54  ;;  %v4377_v59 = vcombine.low %v13694_v35, %v11054_v28  ;;  %2149 = vrot.lane.b32.xlu1 %v11428_v1, %s9739_s19  ;;  %v4132_v19 = vrot.slane %v4118_v20, %v10009_v54  ;;  %v3119_v24 = vcombine.low %v10306_v13, %v13695_v50  ;;  %v13696_v13 = vld [vmem:[#allocation58_spill] sm:$0xff] }
 0x2a4   : > { %v4023_v5 = vrot.slane %v863_v31, %v9996_v48  ;;  %v4677_v16 = vcombine.low %v8735_v30, %v11498_v36  ;;  %v3427_v15 = vcombine.low %v11555_v39, %v11564_v62  ;;  %v8734_v28 = vpack.c.bf16 %v854_v11, %v854_v11 }
 0x2a5   : > { %4463 = vst.msk [vmem:[#allocation4 + $0x24] sm:$0xf] %vm1278_vm13, %v4376_v25  ;;  %v4384_v60 = vrot.slane %v4377_v59, %v10009_v54  ;;  %v3314_v1 = vrot.slane %v11398_v9, %v10009_v54  ;;  %1929 = vrot.lane.b32.xlu0 %v11502_v6, %s9737_s25  ;;  %v3763_v20 = vrot.slane %v3755_v45, %v10009_v54  ;;  %v4736_v59 = vpop.permute.xlu1 %4735 }
 0x2a6   : > { %v11600_v49 = vrot.slane %v2588_v2, %v10009_v54  ;;  %4753 = vst.msk [vmem:[#allocation4 + $0x24] sm:$0xf] %vm1719_vm9, %v13696_v13  ;;  %v4024_v62 = vcombine.high %v4023_v5, %v4023_v5  ;;  %v11605_v33 = vrot.slane %v4023_v5, %v9996_v48  ;;  %v4684_v11 = vrot.slane %v4677_v16, %v10009_v54  ;;  %v1288_v13 = vld [vmem:[#allocation4 + $0x78] sm:$0x1] }
 0x2a7   : > { %v4385_v31 = vcombine.low %v4384_v60, %v13663_v32  ;;  %v11610_v9 = vrot.slane %v3119_v24, %v10009_v54  ;;  %v4616_v6 = vrot.slane %v8734_v28, %v9996_v48  ;;  %2457 = vrot.lane.b32.xlu1 %v11510_v46, %s9739_s19  ;;  %v11615_v2 = vcombine.low %v4125_v18, %v4132_v19 }
 0x2a8   : > { %v11618_v45 = vrot.slane %v4024_v62, %v9996_v48  ;;  %v11622_v30 = vcombine.high %v11605_v33, %v11605_v33  ;;  %v3329_v32 = vsel %vm10646_vm1, %v3314_v1, %v3328_v3  ;;  %v1087_v18 = vunpack.i.l.s16 %v10909_v44 }
 0x2a9   : > { %v4392_v35 = vrot.slane %v4385_v31, %v10009_v54  ;;  %v4393_v5 = vcombine.low %v11610_v9, %v10836_v43  ;;  %v4623_v46 = vrot.slane %v4616_v6, %v9996_v48  ;;  %3330 = vst [vmem:[#allocation4 + $0x7c] sm:$0x1] %v3329_v32  ;;  %v13698_v19 = vrot.slane %v11457_v63, %v10009_v54 }
 0x2aa   : > { %v11635_v16 = vcombine.low %v3763_v20, %v3770_v37  ;;  %v4141_v50 = vcombine.low %v11498_v36, %v11618_v45  ;;  %v4142_v24 = vcombine.low %v11605_v33, %v11622_v30  ;;  %v11643_v43 = vcombine.high %v11618_v45, %v11618_v45  ;;  %v4738_v37 = vpop.permute.xlu0 %4737 }
 0x2ab   : > { %3631 = vrot.lane.b32.xlu0 %v13698_v19, %s9737_s25  ;;  %v3754_v60 = vrot.slane %v11567_v7, %v10009_v54  ;;  %v11648_v28 = vcombine.low %v11555_v39, %v4684_v11  ;;  %4464 = vst.msk [vmem:[#allocation4 + $0x38] sm:$0xf] %vm1278_vm13, %v4392_v35  ;;  %v4400_v63 = vrot.slane %v4393_v5, %v10009_v54  ;;  %v13699_v7 = vld [vmem:[#allocation33_spill] sm:$0xff]  ;;  %v11664_v20 = vunpack.i.l.s16 %v4623_v46  ;;  %v13702_v46 = vld [vmem:[#allocation47_spill] sm:$0xff] }
 0x2ac   : > { %v1263_v36 = vrot.slane %v1087_v18, %v10009_v54  ;;  %3457 = vrot.lane.b32.xlu1 %v11547_v0, %s9737_s25  ;;  %v11656_v3 = vrot.slane %v4141_v50, %v10009_v54  ;;  %v11659_v1 = vrot.slane %v4142_v24, %v10009_v54  ;;  %v4693_v39 = vcombine.low %v13699_v7, %v11622_v30 }
 0x2ad   : > { %4754 = vst.msk [vmem:[#allocation4 + $0x38] sm:$0xf] %vm1719_vm9, %v4736_v59  ;;  %v3434_v62 = vrot.slane %v3427_v15, %v10009_v54  ;;  %v2749_v11 = vrot.slane %v11600_v49, %v10009_v54  ;;  %v3792_v0 = vrot.slane %v11577_v14, %v10009_v54  ;;  %v3778_v6 = vrot.slane %v11635_v16, %v10009_v54 }
 0x2ae   : > { %4465 = vst.msk [vmem:[#allocation4 + $0x4c] sm:$0xf] %vm1278_vm13, %v4400_v63  ;;  %v1270_v31 = vrot.slane %v1263_v36, %v10009_v54  ;;  %v4140_v32 = vrot.slane %v11615_v2, %v10009_v54  ;;  %v4694_v15 = vcombine.low %v11618_v45, %v11643_v43  ;;  %v13700_v49 = vunpack.i.h.s16 %v10961_v42  ;;  %v13704_v36 = vld [vmem:[#allocation77_spill] sm:$0xff] }
 0x2af   : > { %4325 = vrot.lane.b32.xlu0 %v11538_v53, %s13636_s22  ;;  %4755 = vst.msk [vmem:[#allocation4 + $0x4c] sm:$0xf] %vm1719_vm9, %v4738_v37  ;;  %v4692_v59 = vrot.slane %v11648_v28, %v10009_v54  ;;  %v13701_v5 = vunpack.i.h.s16 %v10988_v22  ;;  %v13703_v18 = vunpack.i.h.s16 %v13702_v46  ;;  %v1138_v16 = vcombine.low %v11370_v12, %v13702_v46 }
 0x2b0   : > { %v8624_v35 = vpack.i.b16 %v10977_v57, %v13700_v49  ;;  %v1289_v53 = vsel %vm10646_vm1, %v1270_v31, %v1288_v13  ;;  %2758 = vrot.lane.b32.xlu1 %v11541_v40, %s13636_s22  ;;  %v4157_v57 = vcombine.low %v11656_v3, %v11659_v1  ;;  %v11700_v50 = vrot.slane %v4693_v39, %v10009_v54  ;;  %v13706_v13 = vld [vmem:[#allocation49_spill] sm:$0xff] }
 0x2b1   : > { %v3198_v19 = vpack.i.b16 %v13703_v18, %v13701_v5  ;;  %v4723_v24 = vrot.slane %v11664_v20, %v10009_v54  ;;  %1290 = vst [vmem:[#allocation4 + $0x78] sm:$0x1] %v1289_v53  ;;  %v1152_v37 = vrot.slane %v1138_v16, %v10009_v54  ;;  %v1201_v7 = vcombine.low %v13704_v36, %v13666_v29  ;;  %v13710_v5 = vld [vmem:[#allocation54_spill] sm:$0xff]  ;;  %v13713_v36 = vld [vmem:[#allocation51_spill] sm:$0xff] }
 0x2b2   : > { %v1137_v22 = vcombine.low %v8624_v35, %v11353_v34  ;;  %v13705_v40 = vunpack.i.h.s16 %v10766_v61  ;;  %v13707_v31 = vunpack.i.h.s16 %v13706_v13  ;;  %v11715_v39 = vrot.slane %v4694_v15, %v10009_v54  ;;  %v13708_v34 = vld [vmem:[#allocation63_spill] sm:$0xff]  ;;  %v13709_v35 = vld [vmem:[#allocation60_spill] sm:$0xff]  ;;  %v3648_v20 = vld [vmem:[#allocation4 + $0x7c] sm:$0x1] }
 0x2b3   : > { %v3205_v63 = vcombine.low %v11370_v12, %v3198_v19  ;;  %3459 = vrot.lane.b32.xlu0 %v3434_v62, %s9737_s25  ;;  %v1234_v12 = vcombine.low %v13709_v35, %v13708_v34  ;;  %v13711_v46 = vunpack.i.h.s16 %v13710_v5  ;;  %v13712_v18 = vunpack.i.h.s16 %v13709_v35  ;;  %v13714_v62 = vld [vmem:[#allocation78_spill] sm:$0xff] }
 0x2b4   : > { %v3199_v49 = vpack.i.b16 %v13707_v31, %v13705_v40  ;;  %v1145_v53 = vrot.slane %v1137_v22, %v10009_v54  ;;  %v1208_v16 = vrot.slane %v1201_v7, %v10009_v54  ;;  %v1113_v15 = vcombine.low %v13714_v62, %v11090_v56  ;;  %3801 = vrot.lane.b32.xlu1 %v3754_v60, %s9739_s19  ;;  %v13721_v62 = vld [vmem:[#allocation80_spill] sm:$0xff] }
 0x2b5   : > { %v3200_v19 = vpack.i.b16 %v13712_v18, %v13711_v46  ;;  %v3212_v61 = vrot.slane %v3205_v63, %v10009_v54  ;;  %v1248_v13 = vrot.slane %v1234_v12, %v10009_v54  ;;  %v8623_v35 = vpack.i.b16 %v10961_v42, %v11100_v21  ;;  %v13716_v46 = vld [vmem:[#allocation50_spill] sm:$0xff] }
 0x2b6   : > { %v3237_v40 = vcombine.low %v13713_v36, %v3199_v49  ;;  %v1153_v22 = vcombine.low %v1145_v53, %v1152_v37  ;;  %1282 = vst.msk [vmem:[#allocation4 + $0x3c] sm:$0xf] %vm1278_vm13, %v1208_v16  ;;  %v1121_v7 = vrot.slane %v1113_v15, %v10009_v54  ;;  %v13715_v49 = vld [vmem:[#allocation76_spill] sm:$0xff]  ;;  %v4730_v3 = vrot.slane %v4723_v24, %v10009_v54 }
 0x2b7   : > { %v3261_v31 = vcombine.low %v3200_v19, %v13708_v34  ;;  %v3213_v5 = vcombine.low %v1145_v53, %v3212_v61  ;;  %v1162_v56 = vcombine.low %v13716_v46, %v13715_v49  ;;  %2760 = vrot.lane.b32.xlu0 %v11558_v26, %s13636_s22  ;;  %v13717_v37 = vld [vmem:[#allocation64_spill] sm:$0xff]  ;;  %v1114_v42 = vcombine.low %v11082_v51, %v8623_v35  ;;  %v13718_v19 = vld [vmem:[#allocation61_spill] sm:$0xff]  ;;  %v13719_v61 = vld [vmem:[#allocation70_spill] sm:$0xff] }
 0x2b8   : > { %v3244_v63 = vrot.slane %v3237_v40, %v10009_v54  ;;  %v1160_v60 = vrot.slane %v1153_v22, %v10009_v54  ;;  %v1249_v34 = vcombine.low %v13717_v37, %v1248_v13  ;;  %v3253_v16 = vcombine.low %v13719_v61, %v13718_v19  ;;  %2762 = vrot.lane.b32.xlu1 %v2749_v11, %s13636_s22  ;;  %v13720_v51 = vld [vmem:[#allocation56_spill] sm:$0xff]  ;;  %v13722_v22 = vld [vmem:[#allocation55_spill] sm:$0xff]  ;;  %v13724_v46 = vld [vmem:[#allocation82_spill] sm:$0xff] }
 0x2b9   : > { %v3268_v12 = vrot.slane %v3261_v31, %v10009_v54  ;;  %v3220_v21 = vrot.slane %v3213_v5, %v10009_v54  ;;  %v1176_v18 = vrot.slane %v1162_v56, %v10009_v54  ;;  %v1128_v40 = vrot.slane %v1114_v42, %v10009_v54  ;;  %v13723_v31 = vld [vmem:[#allocation79_spill] sm:$0xff] }
 0x2ba   : > { %v3245_v53 = vcombine.low %v3244_v63, %v13666_v29  ;;  %1280 = vst.msk [vmem:[#allocation4 + $0x14] sm:$0xf] %vm1278_vm13, %v1160_v60  ;;  %v1256_v26 = vrot.slane %v1249_v34, %v10009_v54  ;;  %v1210_v15 = vcombine.low %v13721_v62, %v13720_v51  ;;  %v3260_v11 = vrot.slane %v3253_v16, %v10009_v54  ;;  %v13725_v34 = vld [vmem:[#allocation68_spill] sm:$0xff] }
 0x2bb   : > { %v3269_v36 = vcombine.low %v13717_v37, %v3268_v12  ;;  %3322 = vst.msk [vmem:[#allocation4 + $0x4] sm:$0xf] %vm1278_vm13, %v3220_v21  ;;  %v3229_v13 = vcombine.low %v13722_v22, %v1176_v18  ;;  %v1177_v35 = vcombine.low %v13723_v31, %v1176_v18  ;;  %3803 = vrot.lane.b32.xlu0 %v3778_v6, %s9739_s19  ;;  %v13726_v6 = vld [vmem:[#allocation81_spill] sm:$0xff]  ;;  %v4047_v18 = vunpack.i.l.s16 %v11643_v43 }
 0x2bc   : > { %v3252_v29 = vrot.slane %v3245_v53, %v10009_v54  ;;  %1284 = vst.msk [vmem:[#allocation4 + $0x64] sm:$0xf] %vm1278_vm13, %v1256_v26  ;;  %v1129_v63 = vcombine.low %v1121_v7, %v1128_v40  ;;  %v1224_v49 = vrot.slane %v1210_v15, %v10009_v54  ;;  %v3277_v56 = vcombine.low %v10909_v44, %v13724_v46  ;;  %v1948_v46 = vld [vmem:[#allocation4 + $0x78] sm:$0x1] }
 0x2bd   : > { %v3276_v5 = vrot.slane %v3269_v36, %v10009_v54  ;;  %v3236_v60 = vrot.slane %v3229_v13, %v10009_v54  ;;  %v1184_v37 = vrot.slane %v1177_v35, %v10009_v54  ;;  %3325 = vst.msk [vmem:[#allocation4 + $0x40] sm:$0xf] %vm1278_vm13, %v3260_v11  ;;  %v3278_v12 = vcombine.low %v13726_v6, %v13725_v34 }
 0x2be   : > { %3324 = vst.msk [vmem:[#allocation4 + $0x2c] sm:$0xf] %vm1278_vm13, %v3252_v29  ;;  %v8702_v42 = vpack.i.b16 %v13670_v58, %v13668_v38  ;;  %4187 = vrot.lane.b32.xlu1 %v4140_v32, %s13636_s22  ;;  %v1136_v44 = vrot.slane %v1129_v63, %v10009_v54  ;;  %v1225_v7 = vcombine.low %v13719_v61, %v1224_v49  ;;  %v13727_v58 = vld [vmem:[#allocation44_spill] sm:$0xff]  ;;  %v13728_v1 = vunpack.i.h.s16 %v11449_v10 }
 0x2bf   : > { %3326 = vst.msk [vmem:[#allocation4 + $0x54] sm:$0xf] %vm1278_vm13, %v3276_v5  ;;  %v11784_v21 = vrot.slane %v3277_v56, %v10009_v54  ;;  %v3143_v53 = vcombine.low %v13683_v27, %v13676_v23  ;;  %3323 = vst.msk [vmem:[#allocation4 + $0x18] sm:$0xf] %vm1278_vm13, %v3236_v60  ;;  %v3292_v38 = vrot.slane %v3278_v12, %v10009_v54  ;;  %3805 = vrot.lane.b32.xlu0 %v3792_v0, %s9739_s19  ;;  %v3634_v36 = vpop.permute.xlu1 %3633  ;;  %v4468_v60 = vld [vmem:[#allocation4 + $0x88] sm:$0x1] }
 0x2c0   : > { %1281 = vst.msk [vmem:[#allocation4 + $0x28] sm:$0xf] %vm1278_vm13, %v1184_v37  ;;  %v3120_v2 = vcombine.low %v8702_v42, %v13727_v58  ;;  %v3144_v32 = vcombine.low %v11449_v10, %v11465_v8  ;;  %v4164_v23 = vrot.slane %v4157_v57, %v10009_v54  ;;  %v4709_v27 = vcombine.low %v11700_v50, %v11715_v39 }
 0x2c1   : > { %1279 = vst.msk [vmem:[#allocation4] sm:$0xf] %vm1278_vm13, %v1136_v44  ;;  %v1232_v19 = vrot.slane %v1225_v7, %v10009_v54  ;;  %v3151_v61 = vrot.slane %v3143_v53, %v10009_v54  ;;  %v3293_v16 = vcombine.low %v11784_v21, %v3292_v38  ;;  %v4348_v0 = vpack.i.b16 %v13728_v1, %v13690_v17 }
 0x2c2   : > { %v3134_v26 = vrot.slane %v3120_v2, %v10009_v54  ;;  %v3158_v14 = vrot.slane %v3144_v32, %v10009_v54  ;;  %4739 = vrot.lane.b32.xlu1 %v4692_v59, %s9737_s25  ;;  %v4716_v28 = vrot.slane %v4709_v27, %v10009_v54  ;;  %v4171_v59 = vrot.slane %v4047_v18, %v10009_v54  ;;  %v2460_v62 = vpop.permute.xlu0 %2459 }
 0x2c3   : > { %1283 = vst.msk [vmem:[#allocation4 + $0x50] sm:$0xf] %vm1278_vm13, %v1232_v19  ;;  %v3300_v57 = vrot.slane %v3293_v16, %v10009_v54  ;;  %4189 = vrot.lane.b32.xlu0 %v4164_v23, %s13636_s22  ;;  %v4401_v24 = vcombine.low %v4348_v0, %v11465_v8  ;;  %v4042_v40 = vunpack.i.h.s16 %v11605_v33  ;;  %v3649_v10 = vsel %vm10494_vm11, %v3634_v36, %v3648_v20 }
 0x2c4   : > { %v3135_v50 = vcombine.low %v11610_v9, %v3134_v26  ;;  %v3159_v39 = vcombine.low %v3151_v61, %v3158_v14  ;;  %3650 = vst [vmem:[#allocation4 + $0x7c] sm:$0x1] %v3649_v10  ;;  %v4044_v29 = vunpack.i.h.s16 %v11618_v45  ;;  %v4046_v8 = vunpack.i.h.s16 %v11622_v30  ;;  %v3999_v11 = vpop.permute.xlu1 %3998 }
 0x2c5   : > { %3327 = vst.msk [vmem:[#allocation4 + $0x68] sm:$0xf] %vm1278_vm13, %v3300_v57  ;;  %v4408_v15 = vrot.slane %v4401_v24, %v10009_v54  ;;  %v8728_v33 = vpack.i.b16 %v11618_v45, %v4042_v40  ;;  %v4347_v22 = vunpack.i.h.s16 %v11643_v43  ;;  %v4178_v13 = vrot.slane %v4171_v59, %v10009_v54 }
 0x2c6   : > { %v3142_v17 = vrot.slane %v3135_v50, %v10009_v54  ;;  %v3166_v9 = vrot.slane %v3159_v39, %v10009_v54  ;;  %4743 = vrot.lane.b32.xlu1 %v4730_v3, %s9737_s25  ;;  %v8729_v35 = vpack.i.b16 %v11622_v30, %v4044_v29  ;;  %v8730_v5 = vpack.i.b16 %v11643_v43, %v4046_v8  ;;  %v1934_v49 = vpop.permute.xlu0 %1933 }
 0x2c7   : > { %4741 = vrot.lane.b32.xlu0 %v4716_v28, %s9737_s25  ;;  %v4409_v31 = vcombine.low %v3151_v61, %v4408_v15  ;;  %v4447_v63 = vrot.slane %v4347_v22, %v10009_v54  ;;  %v1949_v37 = vsel %vm10494_vm11, %v1934_v49, %v1948_v46 }
 0x2c8   : > { %3192 = vst.msk [vmem:[#allocation4 + $0x5c] sm:$0xf] %vm1278_vm13, %v3142_v17  ;;  %3193 = vst.msk [vmem:[#allocation4 + $0x70] sm:$0xf] %vm1278_vm13, %v3166_v9  ;;  %v4417_v45 = vcombine.low %v13681_v47, %v8729_v35  ;;  %v4418_v6 = vcombine.low %v8728_v33, %v8730_v5  ;;  %v2980_v53 = vpop.permute.xlu1 %2979 }
 0x2c9   : > { %v4416_v56 = vrot.slane %v4409_v31, %v10009_v54  ;;  %v4454_v12 = vrot.slane %v4447_v63, %v10009_v54  ;;  %1950 = vst [vmem:[#allocation4 + $0x78] sm:$0x1] %v1949_v37 }
 0x2ca   : > { %v4425_v30 = vrot.slane %v4417_v45, %v10009_v54  ;;  %v4432_v42 = vrot.slane %v4418_v6, %v10009_v54  ;;  %v4330_v18 = vpop.permute.xlu0 %4329  ;;  %v9181_v6 = vld [vmem:[%s13346_s6 + $0x108] sm:$0xff]  }
 0x2cb   : > { %4191 = vrot.lane.b32.xlu0 %v4178_v13, %s13636_s22  ;;  %4466 = vst.msk [vmem:[#allocation4 + $0x60] sm:$0xf] %vm1278_vm13, %v4416_v56  ;;  %v4013_v43 = vld [vmem:[#allocation4 + $0x7c] sm:$0x1]  ;;  %v4469_v47 = vsel %vm10646_vm1, %v4454_v12, %v4468_v60  ;;  %v8732_v12 = vpack.i.b16 %v13644_v41, %v13665_v52 }
 0x2cc   : > { %v4014_v7 = vsel %vm10618_vm15, %v3999_v11, %v4013_v43  ;;  %4470 = vst [vmem:[#allocation4 + $0x88] sm:$0x1] %v4469_v47  ;;  %v4433_v38 = vcombine.low %v4425_v30, %v4432_v42  ;;  %v9185_v47 = vld [vmem:[%s13346_s6 + $0x110] sm:$0xff]  }
 0x2cd   : > { %4015 = vst [vmem:[#allocation4 + $0x7c] sm:$0x1] %v4014_v7  ;;  %v4539_v43 = vcombine.low %v8732_v12, %v13725_v34  ;;  %v9189_v12 = vld [vmem:[#allocation4 + $0x10] ss:$20 sps:$4 sm:$0xff]  }
 0x2ce   : > { %v4440_v58 = vrot.slane %v4433_v38, %v10009_v54 }
 0x2cf   : > { %v1924_v2 = vpop.permute.xlu0 %1923  ;;  %v4546_v52 = vrot.slane %v4539_v43, %v10009_v54 }
 0x2d0   : > { %v2474_v32 = vld [vmem:[#allocation4 + $0x78] sm:$0x1]  ;;  %1943 = vst.msk [vmem:[#allocation4 + $0x14] sm:$0xf] %vm1719_vm9, %v1924_v2  ;;  %v3622_v19 = vpop.permute.xlu1 %3621 }
 0x2d1   : > { %4467 = vst.msk [vmem:[#allocation4 + $0x74] sm:$0xf] %vm1278_vm13, %v4440_v58  ;;  %v2475_v23 = vsel %vm10618_vm15, %v2460_v62, %v2474_v32  ;;  %v4547_v2 = vcombine.low %v11784_v21, %v4546_v52  ;;  %v13734_v32 = vld [vmem:[#allocation69_spill] sm:$0xff] }
 0x2d2   : > { %2476 = vst [vmem:[#allocation4 + $0x78] sm:$0x1] %v2475_v23  ;;  %3642 = vst.msk [vmem:[#allocation4 + $0x4] sm:$0xf] %vm1719_vm9, %v3622_v19  ;;  %v4556_v23 = vcombine.low %v13734_v32, %v13655_v55 }
 0x2d3   : > { %v4554_v21 = vrot.slane %v4547_v2, %v10009_v54  ;;  %v4758_v52 = vld [vmem:[#allocation4 + $0x88] sm:$0x1] }
 0x2d4   : > { %v4344_v61 = vld [vmem:[#allocation4 + $0x7c] sm:$0x1]  ;;  %v4320_v26 = vpop.permute.xlu1 %4319  ;;  %v4570_v55 = vrot.slane %v4556_v23, %v10009_v54 }
 0x2d5   : > { %v4345_v16 = vsel %vm11867_vm3, %v4330_v18, %v4344_v61  ;;  %v13733_v18 = vld [vmem:[#allocation62_spill] sm:$0xff] }
 0x2d6   : > { %4346 = vst [vmem:[#allocation4 + $0x7c] sm:$0x1] %v4345_v16  ;;  %v8731_v38 = vpack.c.bf16 %v13733_v18, %v13733_v18  ;;  %v13735_v61 = vld [vmem:[#allocation74_spill] sm:$0xff]  ;;  %v13736_v16 = vld [vmem:[#allocation73_spill] sm:$0xff] }
 0x2d8   : > { %v3989_v3 = vpop.permute.xlu1 %3988 }
 0x2d9   : > { %v2994_v14 = vld [vmem:[#allocation4 + $0x78] sm:$0x1] }
 0x2da   : > { %v2995_v1 = vsel %vm11867_vm3, %v2980_v53, %v2994_v14  ;;  %v9188_v53 = vld [vmem:[%s13346_s6 + $0x118] sm:$0xff]  }
 0x2db   : > { %2996 = vst [vmem:[#allocation4 + $0x78] sm:$0x1] %v2995_v1  ;;  %v2448_v0 = vpop.permute.xlu0 %2447  ;;  %v4478_v1 = vrot.slane %v8731_v38, %v9996_v48 }
 0x2dc   : > { %v2970_v57 = vpop.permute.xlu1 %2969 }
 0x2df   : > { %v3987_v50 = vpop.permute.xlu0 %3986 }
 0x2e0   : > { %4007 = vst.msk [vmem:[#allocation4 + $0x4] sm:$0xf] %vm2162_vm10, %v3987_v50  ;;  %v1928_v39 = vpop.permute.xlu1 %1927 }
 0x2e1   : > { %1945 = vst.msk [vmem:[#allocation4 + $0x3c] sm:$0xf] %vm1719_vm9, %v1928_v39 }
 0x2e3   : > { %v2968_v28 = vpop.permute.xlu0 %2967 }
 0x2e4   : > { %v3993_v59 = vpop.permute.xlu1 %3992 }
 0x2e7   : > { %v3626_v36 = vpop.permute.xlu0 %3625 }
 0x2e8   : > { %3644 = vst.msk [vmem:[#allocation4 + $0x2c] sm:$0xf] %vm1719_vm9, %v3626_v36  ;;  %v2974_v20 = vpop.permute.xlu1 %2973 }
 0x2eb   : > { %v2452_v24 = vpop.permute.xlu0 %2451 }
 0x2ec   : > { %v4324_v40 = vpop.permute.xlu1 %4323 }
 0x2ef   : > { %v3991_v10 = vpop.permute.xlu0 %3990 }
 0x2f0   : > { %4009 = vst.msk [vmem:[#allocation4 + $0x2c] sm:$0xf] %vm2162_vm10, %v3991_v10  ;;  %v1932_v17 = vpop.permute.xlu1 %1931 }
 0x2f1   : > { %1947 = vst.msk [vmem:[#allocation4 + $0x64] sm:$0xf] %vm1719_vm9, %v1932_v17 }
 0x2f3   : > { %v2972_v9 = vpop.permute.xlu0 %2971 }
 0x2f4   : > { %v3630_v62 = vpop.permute.xlu1 %3629 }
 0x2f5   : > { %3646 = vst.msk [vmem:[#allocation4 + $0x54] sm:$0xf] %vm1719_vm9, %v3630_v62 }
 0x2f7   : > { %v2456_v15 = vpop.permute.xlu0 %2455 }
 0x2f8   : > { %v3997_v29 = vpop.permute.xlu1 %3996 }
 0x2fb   : > { %v3995_v8 = vpop.permute.xlu0 %3994 }
 0x2fc   : > { %4011 = vst.msk [vmem:[#allocation4 + $0x54] sm:$0xf] %vm2162_vm10, %v3995_v8  ;;  %v2978_v33 = vpop.permute.xlu1 %2977  ;;  %v2780_v8 = vld [vmem:[#allocation4 + $0x80] sm:$0x1] }
 0x2ff   : > { %v2976_v22 = vpop.permute.xlu0 %2975 }
 0x301   : > { %v4328_v13 = vpop.permute.xlu1 %4327 }
 0x303   : > { %v1922_v31 = vpop.permute.xlu0 %1921 }
 0x304   : > { %1942 = vst.msk [vmem:[#allocation4] sm:$0xf] %vm1719_vm9, %v1922_v31 }
 0x305   : > { %2468 = vst.msk [vmem:[#allocation4] sm:$0xf] %vm2162_vm10, %v2448_v0  ;;  %v3624_v35 = vpop.permute.xlu1 %3623 }
 0x306   : > { %2988 = vst.msk [vmem:[#allocation4] sm:$0xf] %vm2771_vm12, %v2968_v28 }
 0x307   : > { %3643 = vst.msk [vmem:[#allocation4 + $0x18] sm:$0xf] %vm1719_vm9, %v3624_v35  ;;  %v4318_v11 = vpop.permute.xlu0 %4317 }
 0x308   : > { %4008 = vst.msk [vmem:[#allocation4 + $0x18] sm:$0xf] %vm2162_vm10, %v3989_v3 }
 0x309   : > { %4338 = vst.msk [vmem:[#allocation4 + $0x4] sm:$0xf] %vm2771_vm12, %v4318_v11  ;;  %4339 = vst.msk [vmem:[#allocation4 + $0x18] sm:$0xf] %vm2771_vm12, %v4320_v26  ;;  %v2450_v5 = vpop.permute.xlu1 %2449  ;;  %v13737_v26 = vcombine.low %v13735_v61, %v13736_v16 }
 0x30a   : > { %2469 = vst.msk [vmem:[#allocation4 + $0x14] sm:$0xf] %vm2162_vm10, %v2450_v5 }
 0x30b   : > { %v1926_v63 = vpop.permute.xlu0 %1925  ;;  %2989 = vst.msk [vmem:[#allocation4 + $0x14] sm:$0xf] %vm2771_vm12, %v2970_v57  ;;  %v4563_v14 = vrot.slane %v13737_v26, %v10009_v54 }
 0x30c   : > { %1944 = vst.msk [vmem:[#allocation4 + $0x28] sm:$0xf] %vm1719_vm9, %v1926_v63  ;;  %v3820_v63 = vld [vmem:[#allocation4 + $0x84] sm:$0x1] }
 0x30d   : > { %2470 = vst.msk [vmem:[#allocation4 + $0x28] sm:$0xf] %vm2162_vm10, %v2452_v24  ;;  %v3628_v49 = vpop.permute.xlu1 %3627  ;;  %v4571_v50 = vcombine.low %v4563_v14, %v4570_v55 }
 0x30e   : > { %2990 = vst.msk [vmem:[#allocation4 + $0x28] sm:$0xf] %vm2771_vm12, %v2972_v9 }
 0x30f   : > { %3645 = vst.msk [vmem:[#allocation4 + $0x40] sm:$0xf] %vm1719_vm9, %v3628_v49  ;;  %v2152_v46 = vpop.permute.xlu0 %2151  ;;  %v4578_v17 = vrot.slane %v4571_v50, %v10009_v54 }
 0x310   : > { %4010 = vst.msk [vmem:[#allocation4 + $0x40] sm:$0xf] %vm2162_vm10, %v3993_v59  ;;  %2168 = vst.msk [vmem:[#allocation4 + $0x6c] sm:$0xf] %vm2162_vm10, %v2152_v46  ;;  %v9178_v60 = vld [vmem:[#allocation4 + $0x4] ss:$20 sps:$4 sm:$0xff]  }
 0x311   : > { %4341 = vst.msk [vmem:[#allocation4 + $0x40] sm:$0xf] %vm2771_vm12, %v4324_v40  ;;  %v2454_v56 = vpop.permute.xlu1 %2453  ;;  %5207 = vmatprep.mubr.bf16.mxu1 %v9178_v60  ;;  %v4779_v40 = vld [vmem:[#allocation4 + $0x78] sm:$0xff] }
 0x312   : > { %2471 = vst.msk [vmem:[#allocation4 + $0x3c] sm:$0xf] %vm2162_vm10, %v2454_v56  ;;  %v9176_v45 = vld [vmem:[#allocation4] ss:$20 sps:$4 sm:$0xff]  }
 0x313   : > { %v4322_v37 = vpop.permute.xlu0 %4321  ;;  %2991 = vst.msk [vmem:[#allocation4 + $0x3c] sm:$0xf] %vm2771_vm12, %v2974_v20  ;;  %5208 = vmatmul.mubr.bf16.vlgmr.msra.gmra.mrb[4].mxu1 %v9176_v45  ;;  %v4485_v20 = vrot.slane %v4478_v1, %v9996_v48  ;;  %v8752_v45 = vcombine.low %v4779_v40, %v4779_v40 }
 0x314   : > { %4340 = vst.msk [vmem:[#allocation4 + $0x2c] sm:$0xf] %vm2771_vm12, %v4322_v37  ;;  %8995 = vmatpush3.bf16.msra.mxu1 %v11520_v4 }
 0x315   : > { %v2150_v30 = vpop.permute.xlu1 %2149  ;;  %8996 = vmatprep.subr.bf16.mxu1 %v9181_v6 }
 0x316   : > { %2167 = vst.msk [vmem:[#allocation4 + $0x58] sm:$0xf] %vm2162_vm10, %v2150_v30 }
 0x317   : > { %v1930_v42 = vpop.permute.xlu0 %1929 }
 0x318   : > { %1946 = vst.msk [vmem:[#allocation4 + $0x50] sm:$0xf] %vm1719_vm9, %v1930_v42  ;;  %8997 = vmatpush3.bf16.msra.mxu1 %v9181_v6 }
 0x319   : > { %2472 = vst.msk [vmem:[#allocation4 + $0x50] sm:$0xf] %vm2162_vm10, %v2456_v15  ;;  %v2458_v41 = vpop.permute.xlu1 %2457  ;;  %8998 = vmatprep.subr.bf16.mxu1 %v9185_v47 }
 0x31a   : > { %2992 = vst.msk [vmem:[#allocation4 + $0x50] sm:$0xf] %vm2771_vm12, %v2976_v22  ;;  %v9182_v7 = vld [vmem:[#allocation4 + $0x28] ss:$20 sps:$4 sm:$0xff]  }
 0x31b   : > { %2473 = vst.msk [vmem:[#allocation4 + $0x64] sm:$0xf] %vm2162_vm10, %v2458_v41  ;;  %v9179_v4 = vld [vmem:[#allocation4 + $0x2c] ss:$20 sps:$4 sm:$0xff]  }
 0x31c   : > { %2993 = vst.msk [vmem:[#allocation4 + $0x64] sm:$0xf] %vm2771_vm12, %v2978_v33  ;;  %5215 = vmatprep.mubr.bf16.mxu1 %v9179_v4  ;;  %8999 = vmatpush3.bf16.msra.mxu1 %v9185_v47  ;;  %v4486_v33 = vunpack.i.l.s16 %v4485_v20 }
 0x31d   : > { %v3632_v34 = vpop.permute.xlu0 %3631  ;;  %5216 = vmatmul.mubr.bf16.gmra.mrb[8].mxu1 %v9182_v7  ;;  %9000 = vmatprep.subr.bf16.mxu1 %v9188_v53  ;;  %v9190_v7 = vld [vmem:[#allocation4 + $0x38] ss:$20 sps:$4 sm:$0xff]  }
 0x31e   : > { %3647 = vst.msk [vmem:[#allocation4 + $0x68] sm:$0xf] %vm1719_vm9, %v3632_v34  ;;  %v3458_v58 = vpop.permute.xlu1 %3457  ;;  %v4585_v35 = vrot.slane %v4486_v33, %v10009_v54 }
 0x31f   : > { %4012 = vst.msk [vmem:[#allocation4 + $0x68] sm:$0xf] %vm2162_vm10, %v3997_v29  ;;  %v8753_v29 = vcombine.high %v4779_v40, %v4779_v40 }
 0x320   : > { %4343 = vst.msk [vmem:[#allocation4 + $0x68] sm:$0xf] %vm2771_vm12, %v4328_v13  ;;  %v8924_v0 = vpop.f32.mrb[4].mxu0  ;;  %9001 = vmatpush3.bf16.msra.mxu1 %v9188_v53  ;;  %v4592_v6 = vrot.slane %v4585_v35, %v10009_v54 }
 0x321   : > { %3474 = vst.msk [vmem:[#allocation4 + $0x5c] sm:$0xf] %vm1719_vm9, %v3458_v58  ;;  %v4326_v19 = vpop.permute.xlu0 %4325  ;;  %v8925_v39 = vpop.f32.mrb[5].mxu0 }
 0x322   : > { %4342 = vst.msk [vmem:[#allocation4 + $0x54] sm:$0xf] %vm2771_vm12, %v4326_v19  ;;  %v2759_v3 = vpop.permute.xlu1 %2758  ;;  %v11942_v28 = vadd.f32 %v8925_v39, %v8924_v0  ;;  %v8927_v59 = vpop.f32.mrb[6].mxu0 }
 0x323   : > { %2776 = vst.msk [vmem:[#allocation4 + $0x58] sm:$0xf] %vm2771_vm12, %v2759_v3  ;;  %v8928_v24 = vpop.f32.mrb[7].mxu0  ;;  %v9186_v15 = vld [vmem:[#allocation4 + $0x50] ss:$20 sps:$4 sm:$0xff]  }
 0x324   : > { %4604 = vst.msk [vmem:[#allocation4 + $0x58] sm:$0xf] %vm1278_vm13, %v4554_v21  ;;  %v11946_v10 = vadd.f32 %v8928_v24, %v8927_v59 }
 0x325   : > { %v3460_v57 = vpop.permute.xlu0 %3459 }
 0x326   : > { %3475 = vst.msk [vmem:[#allocation4 + $0x70] sm:$0xf] %vm1719_vm9, %v3460_v57  ;;  %v3802_v36 = vpop.permute.xlu1 %3801 }
 0x327   : > { %3818 = vst.msk [vmem:[#allocation4 + $0x5c] sm:$0xf] %vm2162_vm10, %v3802_v36 }
 0x329   : > { %v2761_v9 = vpop.permute.xlu0 %2760  ;;  %v9183_v62 = vld [vmem:[#allocation4 + $0x54] ss:$20 sps:$4 sm:$0xff]  }
 0x32a   : > { %2777 = vst.msk [vmem:[#allocation4 + $0x6c] sm:$0xf] %vm2771_vm12, %v2761_v9  ;;  %5223 = vmatprep.mubr.bf16.mxu1 %v9183_v62  ;;  %v2763_v22 = vpop.permute.xlu1 %2762 }
 0x32b   : > { %4605 = vst.msk [vmem:[#allocation4 + $0x6c] sm:$0xf] %vm1278_vm13, %v4578_v17  ;;  %5224 = vmatmul.mubr.bf16.gmra.mrb[12].mxu1 %v9186_v15  ;;  %v2781_v13 = vsel %vm11867_vm3, %v2763_v22, %v2780_v8 }
 0x32c   : > { %5231 = vmatprep.mubr.bf16.mxu1 %v8753_v29  ;;  %2782 = vst [vmem:[#allocation4 + $0x80] sm:$0x1] %v2781_v13  ;;  %v11983_v13 = vld [vmem:[%s13347_s7] ss:$0 sm:$0xff] }
 0x32d   : > { %v3804_v31 = vpop.permute.xlu0 %3803  ;;  %v8930_v5 = vpop.f32.mrb[8].mxu0 }
 0x32e   : > { %3819 = vst.msk [vmem:[#allocation4 + $0x70] sm:$0xf] %vm2162_vm10, %v3804_v31  ;;  %v8931_v46 = vpop.f32.mrb[9].mxu0 }
 0x32f   : > { %v8932_v60 = vadd.f32 %v8931_v46, %v8930_v5  ;;  %v8933_v37 = vpop.f32.mrb[10].mxu0 }
 0x330   : > { %v4188_v11 = vpop.permute.xlu1 %4187  ;;  %v8934_v43 = vpop.f32.mrb[11].mxu0 }
 0x331   : > { %4204 = vst.msk [vmem:[#allocation4 + $0x5c] sm:$0xf] %vm2771_vm12, %v4188_v11  ;;  %v3806_v49 = vpop.permute.xlu0 %3805  ;;  %v8935_v47 = vadd.f32 %v8934_v43, %v8933_v37 }
 0x332   : > { %v3821_v56 = vsel %vm10618_vm15, %v3806_v49, %v3820_v63  ;;  %v9193_v38 = vld [vmem:[#allocation4 + $0x58] ss:$20 sps:$4 sm:$0xff]  }
 0x333   : > { %3822 = vst [vmem:[#allocation4 + $0x84] sm:$0x1] %v3821_v56  ;;  %v4606_v42 = vld [vmem:[#allocation4 + $0x80] sm:$0x1]  ;;  %5232 = vmatmul.mubr.bf16.gmra.mrb[16].mxu1 %v8752_v45 }
 0x334   : > { %v4740_v30 = vpop.permute.xlu1 %4739  ;;  %v4607_v41 = vsel %vm10646_vm1, %v4592_v6, %v4606_v42  ;;  %9002 = vmatprep.mubr.msk.bf16.mxu1 %vm5162_vm4, %v9189_v12 }
 0x335   : > { %4756 = vst.msk [vmem:[#allocation4 + $0x60] sm:$0xf] %vm1719_vm9, %v4740_v30  ;;  %v4190_v44 = vpop.permute.xlu0 %4189  ;;  %4608 = vst [vmem:[#allocation4 + $0x80] sm:$0x1] %v4607_v41 }
 0x336   : > { %4205 = vst.msk [vmem:[#allocation4 + $0x70] sm:$0xf] %vm2771_vm12, %v4190_v44 }
 0x338   : > { %v4744_v54 = vpop.permute.xlu1 %4743 }
 0x339   : > { %v4759_v34 = vsel %vm10494_vm11, %v4744_v54, %v4758_v52  ;;  %v4742_v4 = vpop.permute.xlu0 %4741 }
 0x33a   : > { %4760 = vst [vmem:[#allocation4 + $0x88] sm:$0x1] %v4759_v34  ;;  %4757 = vst.msk [vmem:[#allocation4 + $0x74] sm:$0xf] %vm1719_vm9, %v4742_v4  ;;  %v4206_v53 = vld [vmem:[#allocation4 + $0x84] sm:$0x1] }
 0x33b   : > { %9003 = vmatmul.mubr.msk.bf16.vlgmr.msra.gmra.mrb[20].mxu1 %vm5162_vm4, %v9190_v7 }
 0x33d   : > { %v4192_v25 = vpop.permute.xlu0 %4191  ;;  %v9191_v18 = vld [vmem:[#allocation4 + $0x5c] ss:$20 sps:$4 sm:$0xff]  }
 0x33e   : > { %v4207_v58 = vsel %vm11867_vm3, %v4192_v25, %v4206_v53  ;;  %5287 = vmatprep.mubr.bf16.mxu0 %v9191_v18 }
 0x33f   : > { %4208 = vst [vmem:[#allocation4 + $0x84] sm:$0x1] %v4207_v58  ;;  %5288 = vmatmul.mubr.bf16.gmra.mrb[12].mxu0 %v9193_v38 }
 0x341   : > { %v9196_v2 = vld [vmem:[#allocation4 + $0x88] ss:$0 sps:$4 sm:$0xff]   ;;  %v9194_v51 = vld [vmem:[#allocation4 + $0x60] ss:$20 sps:$4 sm:$0xff]  }
 0x342   : > { %9006 = vmatprep.mubr.msk.bf16.mxu1 %vm5162_vm4, %v9194_v51 }
 0x343   : > { %9007 = vmatmul.mubr.msk.bf16.gmra.mrb[24].mxu1 %vm5162_vm4, %v9196_v2 }
 0x346   : > { %v4780_v32 = vld [vmem:[#allocation4 + $0x80] sm:$0xff] }
 0x347   : > { %v8755_v23 = vcombine.high %v4780_v32, %v4780_v32  ;;  %v8754_v19 = vcombine.low %v4780_v32, %v4780_v32 }
 0x349   : > { %5295 = vmatprep.mubr.bf16.mxu0 %v8755_v23 }
 0x34a   : > { %5296 = vmatmul.mubr.bf16.gmra.mrb[16].mxu0 %v8754_v19 }
 0x3e6   : > { %v8884_v61 = vpop.f32.mrb[4].mxu1 }
 0x3e7   : > { %v8885_v16 = vpop.f32.mrb[5].mxu1 }
 0x3e8   : > { %v8886_v26 = vadd.f32 %v8885_v16, %v8884_v61  ;;  %v8887_v14 = vpop.f32.mrb[6].mxu1 }
 0x3e9   : > { %v8888_v27 = vpop.f32.mrb[7].mxu1 }
 0x3ea   : > { %v8889_v21 = vadd.f32 %v8888_v27, %v8887_v14  ;;  %v5274_v3 = vadd.f32 %v11942_v28, %v8886_v26 }
 0x3ec   : > { %v5277_v55 = vadd.f32 %v11946_v10, %v8889_v21 }
 0x3f0   : > { %v8890_v1 = vpop.f32.mrb[8].mxu1 }
 0x3f1   : > { %v8891_v0 = vpop.f32.mrb[9].mxu1 }
 0x3f2   : > { %v8892_v57 = vadd.f32 %v8891_v0, %v8890_v1  ;;  %v8893_v50 = vpop.f32.mrb[10].mxu1 }
 0x3f3   : > { %v8894_v39 = vpop.f32.mrb[11].mxu1 }
 0x3f4   : > { %v8895_v59 = vadd.f32 %v8894_v39, %v8893_v50  ;;  %v5282_v36 = vadd.f32 %v8932_v60, %v8892_v57 }
 0x3f6   : > { %v5285_v20 = vadd.f32 %v8935_v47, %v8895_v59 }
 0x3fe   : > { %v8896_v24 = vpop.f32.mrb[12].mxu1 }
 0x3ff   : > { %v8897_v40 = vpop.f32.mrb[13].mxu1 }
 0x400   : > { %v11974_v17 = vadd.f32 %v8897_v40, %v8896_v24  ;;  %v8899_v9 = vpop.f32.mrb[14].mxu1 }
 0x401   : > { %v8900_v62 = vpop.f32.mrb[15].mxu1 }
 0x402   : > { %v11976_v15 = vadd.f32 %v8900_v62, %v8899_v9 }
 0x406   : > { %v8902_v29 = vpop.f32.mrb[16].mxu1 }
 0x407   : > { %v8903_v28 = vpop.f32.mrb[17].mxu1 }
 0x408   : > { %v11978_v8 = vadd.f32 %v8903_v28, %v8902_v29  ;;  %v8905_v10 = vpop.f32.mrb[18].mxu1 }
 0x409   : > { %v8906_v33 = vpop.f32.mrb[19].mxu1 }
 0x40e   : > { %v9004_v22 = vpop.f32.mrb[20].mxu1 }
 0x40f   : > { %v5346_v31 = vadd.f32 %v9004_v22, %v5282_v36  ;;  %v5337_v35 = vpop.f32.mrb[21].mxu1 }
 0x410   : > { %v5338_v11 = vadd.f32 %v5337_v35, %v5274_v3  ;;  %v9005_v5 = vpop.f32.mrb[22].mxu1 }
 0x411   : > { %v5376_v63 = vadd.f32 %v11983_v13, %v5346_v31  ;;  %v5349_v49 = vadd.f32 %v9005_v5, %v5285_v20  ;;  %v5340_v46 = vpop.f32.mrb[23].mxu1 }
 0x412   : > { %v5374_v56 = vadd.f32 %v11983_v13, %v5338_v11  ;;  %v8936_v45 = vpop.f32.mrb[12].mxu0  ;;  %v11987_v60 = vadd.f32 %v5340_v46, %v5277_v55 }
 0x413   : > { %v5493_v37 = vrot.slane %v5376_v63, %v9996_v48  ;;  %v8937_v6 = vpop.f32.mrb[13].mxu0  ;;  %v5486_v42 = vcombine.high %v5376_v63, %v5376_v63  ;;  %v12035_v24 = vadd.f32 %v11983_v13, %v5349_v49 }
 0x414   : > { %v5395_v12 = vrot.slane %v5374_v56, %v9996_v48  ;;  %v11991_v30 = vadd.f32 %v8937_v6, %v8936_v45  ;;  %v8939_v43 = vpop.f32.mrb[14].mxu0  ;;  %v5388_v39 = vcombine.high %v5374_v56, %v5374_v56 }
 0x415   : > { %v5501_v47 = vcombine.high %v5493_v37, %v5493_v37  ;;  %v11994_v41 = vrot.slane %v5493_v37, %v9996_v48  ;;  %v8940_v44 = vpop.f32.mrb[15].mxu0  ;;  %v5500_v25 = vrot.slane %v5486_v42, %v9996_v48  ;;  %v5542_v28 = vrot.slane %v12035_v24, %v9996_v48 }
 0x416   : > { %v11996_v52 = vpop.f32.mrb[24].mxu1  ;;  %v5403_v34 = vcombine.high %v5395_v12, %v5395_v12  ;;  %v12009_v58 = vrot.slane %v5395_v12, %v9996_v48  ;;  %v8941_v57 = vadd.f32 %v8940_v44, %v8939_v43  ;;  %v5402_v9 = vrot.slane %v5388_v39, %v9996_v48 }
 0x417   : > { %v11999_v54 = vrot.slane %v5501_v47, %v9996_v48  ;;  %v12001_v4 = vpop.f32.mrb[25].mxu1  ;;  %v8814_v7 = vmul.f32 -1.442695, %v11994_v41  ;;  %v12016_v51 = vcombine.high %v11994_v41, %v11994_v41  ;;  %v5502_v23 = vcombine.high %v5500_v25, %v5500_v25 }
 0x418   : > { %v9009_v53 = vpop.f32.mrb[26].mxu1  ;;  %v12012_v2 = vrot.slane %v5403_v34, %v9996_v48  ;;  %v12023_v16 = vrot.slane %v5500_v25, %v9996_v48  ;;  %v8798_v26 = vmul.f32 -1.442695, %v12009_v58  ;;  %v12040_v62 = vcombine.high %v12009_v58, %v12009_v58 }
 0x419   : > { %13738 = vst [vmem:[#allocation72_spill] sm:$0xff] %v11999_v54  ;;  %v8815_v18 = vmul.f32 -1.442695, %v11999_v54  ;;  %v12006_v38 = vpop.f32.mrb[27].mxu1  ;;  %9202 = vpow2.f32 %v8814_v7  ;;  %13739 = vst [vmem:[#allocation71_spill] sm:$0xff] %v12016_v51  ;;  %v12020_v19 = vcombine.high %v11999_v54, %v11999_v54  ;;  %v12029_v3 = vrot.slane %v5502_v23, %v9996_v48 }
 0x41a   : > { %13741 = vst [vmem:[#allocation53_spill] sm:$0xff] %v12023_v16  ;;  %v8799_v27 = vmul.f32 -1.442695, %v12012_v2  ;;  %v8816_v21 = vmul.f32 -1.442695, %v12016_v51  ;;  %v12044_v29 = vcombine.high %v12012_v2, %v12012_v2  ;;  %v12049_v33 = vrot.slane %v5402_v9, %v9996_v48 }
 0x41b   : > { %9204 = vpow2.f32 %v8815_v18  ;;  %13740 = vst [vmem:[#allocation48_spill] sm:$0xff] %v12020_v19  ;;  %v8817_v55 = vmul.f32 -1.442695, %v12020_v19  ;;  %v8818_v0 = vmul.f32 -1.442695, %v12023_v16  ;;  %v5550_v11 = vcombine.high %v5542_v28, %v5542_v28 }
 0x41c   : > { %9206 = vpow2.f32 %v8798_v26  ;;  %v8819_v36 = vmul.f32 -1.442695, %v12029_v3  ;;  %13742 = vst [vmem:[#allocation75_spill] sm:$0xff] %v12044_v29  ;;  %v8800_v22 = vmul.f32 -1.442695, %v12040_v62  ;;  %v5404_v45 = vcombine.high %v5402_v9, %v5402_v9 }
 0x41d   : > { %v8942_v32 = vpop.f32.mrb[16].mxu0  ;;  %9208 = vpow2.f32 %v8799_v27  ;;  %v8801_v35 = vmul.f32 -1.442695, %v12044_v29  ;;  %v8802_v37 = vmul.f32 -1.442695, %v12049_v33  ;;  %v12055_v6 = vrot.slane %v5542_v28, %v9996_v48 }
 0x41e   : > { %v8943_v61 = vpop.f32.mrb[17].mxu0  ;;  %9210 = vpow2.f32 %v8816_v21  ;;  %v12060_v43 = vrot.slane %v5550_v11, %v9996_v48  ;;  %v5290_v7 = vadd.f32 %v11991_v30, %v11974_v17  ;;  %v5293_v25 = vadd.f32 %v8941_v57, %v11976_v15 }
 0x41f   : > { %v8945_v14 = vpop.f32.mrb[18].mxu0  ;;  %9212 = vpow2.f32 %v8817_v55  ;;  %v8944_v53 = vadd.f32 %v8943_v61, %v8942_v32  ;;  %v12072_v18 = vrot.slane %v5404_v45, %v9996_v48  ;;  %v8822_v23 = vmul.f32 -1.442695, %v12055_v6 }
 0x420   : > { %v8946_v1 = vpop.f32.mrb[19].mxu0  ;;  %9214 = vpow2.f32 %v8818_v0  ;;  %13744 = vst [vmem:[#allocation34_spill] sm:$0xff] %v12060_v43  ;;  %v12077_v26 = vadd.f32 %v11983_v13, %v11987_v60  ;;  %v8823_v14 = vmul.f32 -1.442695, %v12060_v43  ;;  %v5354_v17 = vadd.f32 %v12001_v4, %v5290_v7 }
 0x421   : > { %13746 = vst [vmem:[#allocation67_spill] sm:$0xff] %v12072_v18  ;;  %v5298_v30 = vadd.f32 %v8944_v53, %v11978_v8  ;;  %v5357_v15 = vadd.f32 %v12006_v38, %v5293_v25  ;;  %v8803_v55 = vmul.f32 -1.442695, %v12072_v18  ;;  %v12095_v4 = vcombine.high %v12023_v16, %v12023_v16 }
 0x422   : > { %v12084_v27 = vadd.f32 %v11983_v13, %v5354_v17  ;;  %v5444_v8 = vrot.slane %v12077_v26, %v9996_v48  ;;  %v5535_v0 = vcombine.high %v12035_v24, %v12035_v24 }
 0x423   : > { %v9203_v50 = vpop.eup %9202  ;;  %v5362_v21 = vadd.f32 %v11996_v52, %v5298_v30  ;;  %v12088_v60 = vadd.f32 %v11983_v13, %v5357_v15  ;;  %v12102_v52 = vcombine.high %v12029_v3, %v12029_v3  ;;  %v12164_v15 = vcombine.high %v12072_v18, %v12072_v18 }
 0x424   : > { %v5908_v20 = vadd.f32 1.0, %v9203_v50  ;;  %v12108_v50 = vcombine.high %v12049_v33, %v12049_v33  ;;  %v5549_v9 = vrot.slane %v5535_v0, %v9996_v48 }
 0x425   : > { %v9205_v59 = vpop.eup %9204  ;;  %v12098_v38 = vadd.f32 %v11983_v13, %v5362_v21  ;;  %13747 = vst [vmem:[#allocation59_spill] sm:$0xff] %v12102_v52  ;;  %v12113_v13 = vrot.slane %v5444_v8, %v9996_v48 }
 0x426   : > { %v5909_v40 = vadd.f32 1.0, %v9205_v59  ;;  %9216 = vrcp.f32 %v5908_v20  ;;  %v9207_v10 = vpop.eup %9206  ;;  %13748 = vst [vmem:[#allocation29_spill] sm:$0xff] %v12108_v50  ;;  %v5452_v20 = vcombine.high %v5444_v8, %v5444_v8  ;;  %v8804_v28 = vmul.f32 -1.442695, %v12108_v50 }
 0x427   : > { %v9209_v31 = vpop.eup %9208  ;;  %v5892_v63 = vadd.f32 1.0, %v9207_v10 }
 0x428   : > { %9218 = vrcp.f32 %v5909_v40  ;;  %v9211_v5 = vpop.eup %9210  ;;  %v5893_v46 = vadd.f32 1.0, %v9209_v31  ;;  %v8821_v40 = vmul.f32 -1.442695, %v12102_v52 }
 0x429   : > { %9220 = vpow2.f32 %v8819_v36  ;;  %v9213_v49 = vpop.eup %9212  ;;  %v5910_v47 = vadd.f32 1.0, %v9211_v5  ;;  %v8820_v36 = vmul.f32 -1.442695, %v12095_v4  ;;  %v5551_v5 = vcombine.high %v5549_v9, %v5549_v9 }
 0x42a   : > { %v9215_v56 = vpop.eup %9214  ;;  %9222 = vpow2.f32 %v8800_v22  ;;  %v5911_v44 = vadd.f32 1.0, %v9213_v49  ;;  %v8806_v22 = vmul.f32 -1.442695, %v12113_v13 }
 0x42b   : > { %9224 = vpow2.f32 %v8801_v35  ;;  %v5912_v32 = vadd.f32 1.0, %v9215_v56  ;;  %v12131_v35 = vrot.slane %v5452_v20, %v9996_v48 }
 0x42c   : > { %9226 = vrcp.f32 %v5892_v63 }
 0x42d   : > { %9228 = vrcp.f32 %v5893_v46  ;;  %13753 = vst [vmem:[#allocation36_spill] sm:$0xff] %v12131_v35  ;;  %v12139_v46 = vcombine.high %v12055_v6, %v12055_v6  ;;  %v8807_v7 = vmul.f32 -1.442695, %v12131_v35  ;;  %v12176_v0 = vcombine.high %v12131_v35, %v12131_v35 }
 0x42e   : > { %9230 = vpow2.f32 %v8802_v37 }
 0x42f   : > { %9232 = vrcp.f32 %v5910_v47  ;;  %13754 = vst [vmem:[#allocation27_spill] sm:$0xff] %v12139_v46  ;;  %v12145_v47 = vcombine.high %v12060_v43, %v12060_v43  ;;  %v8824_v17 = vmul.f32 -1.442695, %v12139_v46  ;;  %13761 = vst [vmem:[#allocation46_spill] sm:$0xff] %v12176_v0 }
 0x430   : > { %v12057_v12 = vpop.eup %9216  ;;  %9234 = vrcp.f32 %v5911_v44 }
 0x431   : > { %13743 = vst [vmem:[#allocation52_spill] sm:$0xff] %v12057_v12  ;;  %6169 = vrot.lane.b32.xlu1 %v12057_v12, %s9739_s19  ;;  %9236 = vpow2.f32 %v8822_v23  ;;  %13756 = vst [vmem:[#allocation17_spill] sm:$0xff] %v12145_v47  ;;  %v12153_v23 = vrot.slane %v5549_v9, %v9996_v48  ;;  %v8825_v30 = vmul.f32 -1.442695, %v12145_v47 }
 0x432   : > { %v12062_v42 = vpop.eup %9218  ;;  %9238 = vpow2.f32 %v8823_v14  ;;  %v12158_v14 = vrot.slane %v5551_v5, %v9996_v48 }
 0x433   : > { %13745 = vst [vmem:[#allocation65_spill] sm:$0xff] %v12062_v42  ;;  %v9221_v34 = vpop.eup %9220  ;;  %6171 = vrot.lane.b32.xlu0 %v12062_v42, %s9739_s19  ;;  %9240 = vrcp.f32 %v5912_v32  ;;  %13758 = vst [vmem:[#allocation40_spill] sm:$0xff] %v12153_v23  ;;  %v8826_v21 = vmul.f32 -1.442695, %v12153_v23 }
 0x434   : > { %v5913_v61 = vadd.f32 1.0, %v9221_v34  ;;  %v9223_v1 = vpop.eup %9222  ;;  %13759 = vst [vmem:[#allocation30_spill] sm:$0xff] %v12158_v14 }
 0x435   : > { %v9225_v57 = vpop.eup %9224  ;;  %v5894_v49 = vadd.f32 1.0, %v9223_v1  ;;  %v8827_v1 = vmul.f32 -1.442695, %v12158_v14 }
 0x436   : > { %9242 = vrcp.f32 %v5913_v61  ;;  %v12110_v39 = vpop.eup %9226  ;;  %v5895_v37 = vadd.f32 1.0, %v9225_v57  ;;  %v5437_v61 = vcombine.high %v12077_v26, %v12077_v26  ;;  %v8805_v26 = vmul.f32 -1.442695, %v12164_v15 }
 0x437   : > { %13749 = vst [vmem:[#allocation31_spill] sm:$0xff] %v12110_v39  ;;  %9244 = vpow2.f32 %v8803_v55  ;;  %v12115_v59 = vpop.eup %9228  ;;  %6137 = vrot.lane.b32.xlu1 %v12110_v39, %s9739_s19  ;;  %v12171_v55 = vcombine.high %v12113_v13, %v12113_v13 }
 0x438   : > { %13750 = vst [vmem:[#allocation25_spill] sm:$0xff] %v12115_v59  ;;  %v9231_v24 = vpop.eup %9230  ;;  %6139 = vrot.lane.b32.xlu0 %v12115_v59, %s9739_s19  ;;  %9246 = vpow2.f32 %v8820_v36  ;;  %v5451_v20 = vrot.slane %v5437_v61, %v9996_v48 }
 0x439   : > { %v12125_v10 = vpop.eup %9232  ;;  %9248 = vpow2.f32 %v8821_v40  ;;  %v5896_v25 = vadd.f32 1.0, %v9231_v24  ;;  %13760 = vst [vmem:[#allocation26_spill] sm:$0xff] %v12171_v55  ;;  %v8808_v40 = vmul.f32 -1.442695, %v12171_v55 }
 0x43a   : > { %13751 = vst [vmem:[#allocation32_spill] sm:$0xff] %v12125_v10  ;;  %v12128_v31 = vpop.eup %9234  ;;  %9250 = vpow2.f32 %v8804_v28  ;;  %v8809_v28 = vmul.f32 -1.442695, %v12176_v0 }
 0x43b   : > { %13752 = vst [vmem:[#allocation39_spill] sm:$0xff] %v12128_v31  ;;  %6173 = vrot.lane.b32.xlu1 %v12125_v10, %s9739_s19  ;;  %v9237_v11 = vpop.eup %9236  ;;  %9252 = vpow2.f32 %v8806_v22 }
 0x43c   : > { %6175 = vrot.lane.b32.xlu0 %v12128_v31, %s9739_s19  ;;  %v9239_v63 = vpop.eup %9238  ;;  %v5916_v56 = vadd.f32 1.0, %v9237_v11 }
 0x43d   : > { %v12141_v45 = vpop.eup %9240  ;;  %v5917_v44 = vadd.f32 1.0, %v9239_v63 }
 0x43e   : > { %13755 = vst [vmem:[#allocation18_spill] sm:$0xff] %v12141_v45  ;;  %9254 = vrcp.f32 %v5916_v56  ;;  %v5453_v56 = vcombine.high %v5451_v20, %v5451_v20 }
 0x43f   : > { %6177 = vrot.lane.b32.xlu1 %v12141_v45, %s9739_s19  ;;  %9256 = vrcp.f32 %v5917_v44  ;;  %v12199_v44 = vrot.slane %v5451_v20, %v9996_v48 }
 0x440   : > { %v12147_v34 = vpop.eup %9242  ;;  %9258 = vrcp.f32 %v5894_v49  ;;  %v12192_v49 = vcombine.high %v12153_v23, %v12153_v23 }
 0x441   : > { %13757 = vst [vmem:[#allocation66_spill] sm:$0xff] %v12147_v34  ;;  %v9245_v53 = vpop.eup %9244  ;;  %6179 = vrot.lane.b32.xlu0 %v12147_v34, %s9739_s19  ;;  %9260 = vrcp.f32 %v5895_v37  ;;  %13767 = vst [vmem:[#allocation19_spill] sm:$0xff] %v12199_v44 }
 0x442   : > { %v5897_v32 = vadd.f32 1.0, %v9245_v53  ;;  %9262 = vpow2.f32 %v8807_v7  ;;  %v9247_v8 = vpop.eup %9246  ;;  %13765 = vst [vmem:[#allocation38_spill] sm:$0xff] %v12192_v49 }
 0x443   : > { %9264 = vrcp.f32 %v5896_v25  ;;  %v9249_v57 = vpop.eup %9248  ;;  %v5914_v63 = vadd.f32 1.0, %v9247_v8  ;;  %v12203_v25 = vcombine.high %v12158_v14, %v12158_v14  ;;  %v12211_v8 = vrot.slane %v5453_v56, %v9996_v48 }
 0x444   : > { %9266 = vpow2.f32 %v8824_v17  ;;  %v9251_v36 = vpop.eup %9250  ;;  %v5915_v53 = vadd.f32 1.0, %v9249_v57 }
 0x445   : > { %9268 = vpow2.f32 %v8825_v30  ;;  %v9253_v24 = vpop.eup %9252  ;;  %13768 = vst [vmem:[#allocation24_spill] sm:$0xff] %v12203_v25  ;;  %v5898_v30 = vadd.f32 1.0, %v9251_v36  ;;  %13770 = vst [vmem:[#allocation57_spill] sm:$0xff] %v12211_v8  ;;  %v8810_v36 = vmul.f32 -1.442695, %v12199_v44 }
 0x446   : > { %9270 = vrcp.f32 %v5897_v32  ;;  %v5900_v11 = vadd.f32 1.0, %v9253_v24  ;;  %v8829_v20 = vmul.f32 -1.442695, %v12203_v25 }
 0x447   : > { %9272 = vpow2.f32 %v8826_v21  ;;  %v8828_v21 = vmul.f32 -1.442695, %v12192_v49 }
 0x448   : > { %v12181_v9 = vpop.eup %9254  ;;  %9274 = vpow2.f32 %v8827_v1  ;;  %v5591_v1 = vrot.slane %v12084_v27, %v9996_v48 }
 0x449   : > { %13762 = vst [vmem:[#allocation35_spill] sm:$0xff] %v12181_v9  ;;  %v12184_v22 = vpop.eup %9256  ;;  %6185 = vrot.lane.b32.xlu1 %v12181_v9, %s9739_s19  ;;  %9276 = vpow2.f32 %v8805_v26 }
 0x44a   : > { %13763 = vst [vmem:[#allocation41_spill] sm:$0xff] %v12184_v22  ;;  %v12188_v5 = vpop.eup %9258  ;;  %6187 = vrot.lane.b32.xlu0 %v12184_v22, %s9739_s19  ;;  %9278 = vpow2.f32 %v8808_v40  ;;  %v5599_v56 = vcombine.high %v5591_v1, %v5591_v1  ;;  %v12237_v49 = vrot.slane %v5591_v1, %v9996_v48 }
 0x44b   : > { %13764 = vst [vmem:[#allocation22_spill] sm:$0xff] %v12188_v5  ;;  %v12196_v37 = vpop.eup %9260  ;;  %9280 = vpow2.f32 %v8809_v28 }
 0x44c   : > { %13766 = vst [vmem:[#allocation20_spill] sm:$0xff] %v12196_v37  ;;  %v9263_v7 = vpop.eup %9262  ;;  %9282 = vrcp.f32 %v5900_v11  ;;  %v12225_v11 = vcombine.high %v12199_v44, %v12199_v44  ;;  %13774 = vst [vmem:[#allocation58_spill] sm:$0xff] %v12237_v49 }
 0x44d   : > { %v12205_v17 = vpop.eup %9264  ;;  %v5901_v32 = vadd.f32 1.0, %v9263_v7  ;;  %6141 = vrot.lane.b32.xlu1 %v12188_v5, %s9739_s19  ;;  %9284 = vrcp.f32 %v5914_v63  ;;  %v8811_v63 = vmul.f32 -1.442695, %v12211_v8 }
 0x44e   : > { %13769 = vst [vmem:[#allocation28_spill] sm:$0xff] %v12205_v17  ;;  %v9267_v61 = vpop.eup %9266  ;;  %6143 = vrot.lane.b32.xlu0 %v12196_v37, %s9739_s19  ;;  %13772 = vst [vmem:[#allocation21_spill] sm:$0xff] %v12225_v11 }
 0x44f   : > { %v9269_v57 = vpop.eup %9268  ;;  %9286 = vrcp.f32 %v5901_v32  ;;  %v5918_v40 = vadd.f32 1.0, %v9267_v61  ;;  %v5584_v61 = vcombine.high %v12084_v27, %v12084_v27  ;;  %v5688_v27 = vrot.slane %v12098_v38, %v9996_v48 }
 0x450   : > { %v12218_v26 = vpop.eup %9270  ;;  %9288 = vrcp.f32 %v5915_v53  ;;  %v5919_v7 = vadd.f32 1.0, %v9269_v57  ;;  %v12232_v53 = vcombine.high %v12211_v8, %v12211_v8  ;;  %v8812_v57 = vmul.f32 -1.442695, %v12225_v11 }
 0x451   : > { %13771 = vst [vmem:[#allocation23_spill] sm:$0xff] %v12218_v26  ;;  %v9273_v24 = vpop.eup %9272  ;;  %9290 = vrcp.f32 %v5898_v30  ;;  %6145 = vrot.lane.b32.xlu1 %v12205_v17, %s9739_s19  ;;  %v12241_v8 = vrot.slane %v5599_v56, %v9996_v48  ;;  %v5598_v1 = vrot.slane %v5584_v61, %v9996_v48  ;;  %v12257_v56 = vcombine.high %v12237_v49, %v12237_v49 }
 0x452   : > { %v9275_v28 = vpop.eup %9274  ;;  %9292 = vpow2.f32 %v8828_v21  ;;  %6147 = vrot.lane.b32.xlu0 %v12218_v26, %s9739_s19  ;;  %13773 = vst [vmem:[#allocation45_spill] sm:$0xff] %v12232_v53  ;;  %v5920_v32 = vadd.f32 1.0, %v9273_v24  ;;  %v12271_v61 = vrot.slane %v5688_v27, %v9996_v48 }
 0x453   : > { %9294 = vpow2.f32 %v8810_v36  ;;  %v9277_v30 = vpop.eup %9276  ;;  %v5921_v25 = vadd.f32 1.0, %v9275_v28  ;;  %13775 = vst [vmem:[#allocation43_spill] sm:$0xff] %v12241_v8  ;;  %13779 = vst [vmem:[#allocation49_spill] sm:$0xff] %v12257_v56  ;;  %v5600_v23 = vcombine.high %v5598_v1, %v5598_v1  ;;  %v12277_v44 = vrot.slane %v5598_v1, %v9996_v48 }
 0x454   : > { %9296 = vpow2.f32 %v8829_v20  ;;  %v9279_v21 = vpop.eup %9278  ;;  %v8813_v20 = vmul.f32 -1.442695, %v12232_v53  ;;  %13783 = vst [vmem:[#allocation51_spill] sm:$0xff] %v12271_v61 }
 0x455   : > { %9298 = vrcp.f32 %v5918_v40  ;;  %v9281_v14 = vpop.eup %9280  ;;  %v5899_v40 = vadd.f32 1.0, %v9277_v30  ;;  %v12263_v30 = vcombine.high %v12241_v8, %v12241_v8  ;;  %13784 = vst [vmem:[#allocation78_spill] sm:$0xff] %v12277_v44  ;;  %v12289_v53 = vrot.slane %v5600_v23, %v9996_v48 }
 0x456   : > { %9300 = vpow2.f32 %v8811_v63  ;;  %v12243_v36 = vpop.eup %9282  ;;  %v5902_v63 = vadd.f32 1.0, %v9279_v21  ;;  %v5903_v38 = vadd.f32 1.0, %v9281_v14  ;;  %v8831_v14 = vmul.f32 -1.442695, %v12241_v8 }
 0x457   : > { %13776 = vst [vmem:[#allocation33_spill] sm:$0xff] %v12243_v36  ;;  %9302 = vrcp.f32 %v5919_v7  ;;  %v12248_v24 = vpop.eup %9284  ;;  %6153 = vrot.lane.b32.xlu1 %v12243_v36, %s9739_s19  ;;  %13781 = vst [vmem:[#allocation60_spill] sm:$0xff] %v12263_v30  ;;  %v8833_v27 = vmul.f32 -1.442695, %v12263_v30  ;;  %v8846_v8 = vmul.f32 -1.442695, %v12271_v61  ;;  %v5633_v23 = vcombine.high %v12088_v60, %v12088_v60 }
 0x458   : > { %13777 = vst [vmem:[#allocation47_spill] sm:$0xff] %v12248_v24  ;;  %9304 = vrcp.f32 %v5920_v32  ;;  %13786 = vst [vmem:[#allocation50_spill] sm:$0xff] %v12289_v53  ;;  %v8834_v30 = vmul.f32 -1.442695, %v12277_v44  ;;  %v12309_v11 = vcombine.high %v12277_v44, %v12277_v44 }
 0x459   : > { %v12253_v28 = vpop.eup %9286  ;;  %9306 = vrcp.f32 %v5921_v25  ;;  %v8830_v25 = vmul.f32 -1.442695, %v12237_v49 }
 0x45a   : > { %13778 = vst [vmem:[#allocation77_spill] sm:$0xff] %v12253_v28  ;;  %v12259_v7 = vpop.eup %9288  ;;  %9308 = vpow2.f32 %v8812_v57  ;;  %6155 = vrot.lane.b32.xlu0 %v12253_v28, %s9739_s19  ;;  %13790 = vst [vmem:[#allocation56_spill] sm:$0xff] %v12309_v11 }
 0x45b   : > { %13780 = vst [vmem:[#allocation63_spill] sm:$0xff] %v12259_v7  ;;  %v12267_v32 = vpop.eup %9290  ;;  %9310 = vpow2.f32 %v8813_v20  ;;  %6181 = vrot.lane.b32.xlu1 %v12248_v24, %s9739_s19  ;;  %v8832_v20 = vmul.f32 -1.442695, %v12257_v56  ;;  %v6485_v49 = vcombine.low %v12259_v7, %v12181_v9 }
 0x45c   : > { %13782 = vst [vmem:[#allocation54_spill] sm:$0xff] %v12267_v32  ;;  %v9293_v21 = vpop.eup %9292  ;;  %9312 = vrcp.f32 %v5899_v40 }
 0x45d   : > { %v9295_v57 = vpop.eup %9294  ;;  %9314 = vrcp.f32 %v5902_v63  ;;  %v5640_v63 = vrot.slane %v12088_v60, %v9996_v48 }
 0x45e   : > { %v9297_v16 = vpop.eup %9296  ;;  %9316 = vrcp.f32 %v5903_v38  ;;  %6183 = vrot.lane.b32.xlu0 %v12259_v7, %s9739_s19  ;;  %v5904_v1 = vadd.f32 1.0, %v9295_v57  ;;  %v6333_v7 = vld [vmem:[#allocation3] sm:$0x7f] }
 0x45f   : > { %v12283_v40 = vpop.eup %9298  ;;  %9318 = vpow2.f32 %v8830_v25  ;;  %v12314_v60 = vrot.slane %v5640_v63, %v9996_v48 }
 0x460   : > { %13785 = vst [vmem:[#allocation76_spill] sm:$0xff] %v12283_v40  ;;  %v9301_v19 = vpop.eup %9300  ;;  %9320 = vpow2.f32 %v8831_v14  ;;  %6189 = vrot.lane.b32.xlu1 %v12283_v40, %s9739_s19  ;;  %v5648_v14 = vcombine.high %v5640_v63, %v5640_v63  ;;  %v8836_v63 = vmul.f32 -1.442695, %v12309_v11 }
 0x461   : > { %v12293_v38 = vpop.eup %9302  ;;  %9322 = vpow2.f32 %v8832_v20  ;;  %v5905_v57 = vadd.f32 1.0, %v9301_v19  ;;  %v8835_v20 = vmul.f32 -1.442695, %v12289_v53  ;;  %13792 = vst [vmem:[#allocation55_spill] sm:$0xff] %v12314_v60 }
 0x462   : > { %13787 = vst [vmem:[#allocation64_spill] sm:$0xff] %v12293_v38  ;;  %v12296_v25 = vpop.eup %9304  ;;  %9324 = vpow2.f32 %v8833_v27  ;;  %6191 = vrot.lane.b32.xlu0 %v12293_v38, %s9739_s19  ;;  %v5922_v27 = vadd.f32 1.0, %v9293_v21  ;;  %v5647_v21 = vrot.slane %v5633_v23, %v9996_v48  ;;  %v12322_v0 = vrot.slane %v5648_v14, %v9996_v48 }
 0x463   : > { %13788 = vst [vmem:[#allocation61_spill] sm:$0xff] %v12296_v25  ;;  %v12300_v61 = vpop.eup %9306  ;;  %9326 = vpow2.f32 %v8846_v8  ;;  %v5923_v8 = vadd.f32 1.0, %v9297_v16 }
 0x464   : > { %13789 = vst [vmem:[#allocation70_spill] sm:$0xff] %v12300_v61  ;;  %v9309_v56 = vpop.eup %9308  ;;  %9328 = vrcp.f32 %v5904_v1  ;;  %6193 = vrot.lane.b32.xlu1 %v12296_v25, %s9739_s19  ;;  %13794 = vst [vmem:[#allocation82_spill] sm:$0xff] %v12322_v0  ;;  %v5649_v23 = vcombine.high %v5647_v21, %v5647_v21  ;;  %v8839_v14 = vmul.f32 -1.442695, %v12322_v0 }
 0x465   : > { %v9311_v47 = vpop.eup %9310  ;;  %9330 = vpow2.f32 %v8834_v30  ;;  %v5906_v51 = vadd.f32 1.0, %v9309_v56  ;;  %v12331_v56 = vcombine.high %v12289_v53, %v12289_v53 }
 0x466   : > { %v12311_v19 = vpop.eup %9312  ;;  %6195 = vrot.lane.b32.xlu0 %v12300_v61, %s9739_s19  ;;  %9332 = vrcp.f32 %v5905_v57  ;;  %v5907_v30 = vadd.f32 1.0, %v9311_v47  ;;  %v8838_v57 = vmul.f32 -1.442695, %v12314_v60  ;;  %v12345_v46 = vrot.slane %v5649_v23, %v9996_v48 }
 0x467   : > { %13791 = vst [vmem:[#allocation80_spill] sm:$0xff] %v12311_v19  ;;  %v12318_v1 = vpop.eup %9314  ;;  %9334 = vpow2.f32 %v8835_v20  ;;  %13796 = vst [vmem:[#allocation81_spill] sm:$0xff] %v12331_v56  ;;  %v8837_v53 = vmul.f32 -1.442695, %v12331_v56  ;;  %v12360_v23 = vrot.slane %v5647_v21, %v9996_v48 }
 0x468   : > { %13793 = vst [vmem:[#allocation79_spill] sm:$0xff] %v12318_v1  ;;  %v12324_v44 = vpop.eup %9316  ;;  %6149 = vrot.lane.b32.xlu1 %v12267_v32, %s9739_s19  ;;  %9336 = vrcp.f32 %v5922_v27  ;;  %13798 = vst [vmem:[#allocation37_spill] sm:$0xff] %v12345_v46 }
 0x469   : > { %13795 = vst [vmem:[#allocation68_spill] sm:$0xff] %v12324_v44  ;;  %v9319_v16 = vpop.eup %9318  ;;  %9338 = vrcp.f32 %v5923_v8  ;;  %13802 = vst [vmem:[#allocation74_spill] sm:$0xff] %v12360_v23 }
 0x46a   : > { %v9321_v55 = vpop.eup %9320  ;;  %6151 = vrot.lane.b32.xlu0 %v12311_v19, %s9739_s19  ;;  %9340 = vrcp.f32 %v5906_v51  ;;  %v5924_v8 = vadd.f32 1.0, %v9319_v16 }
 0x46b   : > { %v9323_v47 = vpop.eup %9322  ;;  %9342 = vrcp.f32 %v5907_v30  ;;  %v5925_v35 = vadd.f32 1.0, %v9321_v55  ;;  %v12349_v30 = vcombine.high %v12314_v60, %v12314_v60 }
 0x46c   : > { %v9325_v20 = vpop.eup %9324  ;;  %6157 = vrot.lane.b32.xlu1 %v12318_v1, %s9739_s19  ;;  %9344 = vpow2.f32 %v8836_v63  ;;  %v5926_v16 = vadd.f32 1.0, %v9323_v47  ;;  %v12353_v63 = vcombine.high %v12322_v0, %v12322_v0  ;;  %v12368_v47 = vcombine.high %v12345_v46, %v12345_v46 }
 0x46d   : > { %v9327_v27 = vpop.eup %9326  ;;  %9346 = vpow2.f32 %v8838_v57  ;;  %13799 = vst [vmem:[#allocation42_spill] sm:$0xff] %v12349_v30  ;;  %v5927_v55 = vadd.f32 1.0, %v9325_v20  ;;  %v8842_v0 = vmul.f32 -1.442695, %v12360_v23 }
 0x46e   : > { %v12339_v11 = vpop.eup %9328  ;;  %v5940_v54 = vadd.f32 1.0, %v9327_v27  ;;  %6159 = vrot.lane.b32.xlu0 %v12324_v44, %s9739_s19  ;;  %9348 = vpow2.f32 %v8839_v14  ;;  %13800 = vst [vmem:[#allocation62_spill] sm:$0xff] %v12353_v63  ;;  %13804 = vst [vmem:[#allocation83_spill] sm:$0xff] %v12368_v47  ;;  %v8840_v14 = vmul.f32 -1.442695, %v12349_v30 }
 0x46f   : > { %13797 = vst [vmem:[#allocation44_spill] sm:$0xff] %v12339_v11  ;;  %v9331_v51 = vpop.eup %9330  ;;  %v8841_v21 = vmul.f32 -1.442695, %v12353_v63  ;;  %v8845_v63 = vmul.f32 -1.442695, %v12368_v47 }
 0x470   : > { %9350 = vrcp.f32 %v5940_v54  ;;  %6161 = vrot.lane.b32.xlu1 %v12339_v11, %s9739_s19  ;;  %v12357_v57 = vpop.eup %9332  ;;  %v5928_v60 = vadd.f32 1.0, %v9331_v51 }
 0x471   : > { %13801 = vst [vmem:[#allocation69_spill] sm:$0xff] %v12357_v57  ;;  %9352 = vrcp.f32 %v5924_v8  ;;  %v9335_v27 = vpop.eup %9334 }
 0x472   : > { %9354 = vpow2.f32 %v8837_v53  ;;  %6163 = vrot.lane.b32.xlu0 %v12357_v57, %s9739_s19  ;;  %v12364_v54 = vpop.eup %9336  ;;  %v5929_v8 = vadd.f32 1.0, %v9335_v27 }
 0x473   : > { %13803 = vst [vmem:[#allocation73_spill] sm:$0xff] %v12364_v54  ;;  %9356 = vrcp.f32 %v5925_v35  ;;  %v12371_v20 = vpop.eup %9338  ;;  %v12380_v35 = vcombine.high %v12360_v23, %v12360_v23 }
 0x474   : > { %13805 = vst [vmem:[#allocation84_spill] sm:$0xff] %v12371_v20  ;;  %9358 = vrcp.f32 %v5926_v16  ;;  %6197 = vrot.lane.b32.xlu1 %v12364_v54, %s9739_s19  ;;  %v12376_v53 = vpop.eup %9340 }
 0x475   : > { %13806 = vst [vmem:[#allocation85_spill] sm:$0xff] %v12376_v53  ;;  %9360 = vrcp.f32 %v5927_v55  ;;  %13807 = vst [vmem:[#allocation86_spill] sm:$0xff] %v12380_v35  ;;  %v12382_v51 = vpop.eup %9342  ;;  %v8843_v55 = vmul.f32 -1.442695, %v12345_v46 }
 0x476   : > { %13808 = vst [vmem:[#allocation87_spill] sm:$0xff] %v12382_v51  ;;  %9362 = vrcp.f32 %v5928_v60  ;;  %6199 = vrot.lane.b32.xlu0 %v12371_v20, %s9739_s19  ;;  %v9345_v16 = vpop.eup %9344  ;;  %v8844_v60 = vmul.f32 -1.442695, %v12380_v35 }
 0x477   : > { %9364 = vpow2.f32 %v8840_v14  ;;  %v9347_v30 = vpop.eup %9346 }
 0x478   : > { %9366 = vpow2.f32 %v8841_v21  ;;  %6165 = vrot.lane.b32.xlu1 %v12376_v53, %s9739_s19  ;;  %v9349_v27 = vpop.eup %9348  ;;  %v5932_v21 = vadd.f32 1.0, %v9347_v30 }
 0x479   : > { %9368 = vrcp.f32 %v5929_v8  ;;  %v5933_v8 = vadd.f32 1.0, %v9349_v27 }
 0x47a   : > { %v12392_v56 = vpop.eup %9350  ;;  %9370 = vpow2.f32 %v8842_v0 }
 0x47b   : > { %13809 = vst [vmem:[#allocation88_spill] sm:$0xff] %v12392_v56  ;;  %v12394_v23 = vpop.eup %9352  ;;  %9372 = vpow2.f32 %v8845_v63  ;;  %6233 = vrot.lane.b32.xlu0 %v12392_v56, %s9739_s19  ;;  %v5930_v63 = vadd.f32 1.0, %v9345_v16 }
 0x47c   : > { %13810 = vst [vmem:[#allocation89_spill] sm:$0xff] %v12394_v23  ;;  %v9355_v14 = vpop.eup %9354  ;;  %9374 = vpow2.f32 %v8843_v55  ;;  %6201 = vrot.lane.b32.xlu1 %v12394_v23, %s9739_s19 }
 0x47d   : > { %v12400_v47 = vpop.eup %9356  ;;  %9376 = vpow2.f32 %v8844_v60  ;;  %v5931_v55 = vadd.f32 1.0, %v9355_v14  ;;  %v6341_v14 = vcombine.low %v12188_v5, %v12196_v37 }
 0x47e   : > { %13811 = vst [vmem:[#allocation90_spill] sm:$0xff] %v12400_v47  ;;  %v12402_v35 = vpop.eup %9358  ;;  %9378 = vrcp.f32 %v5932_v21 }
 0x47f   : > { %13812 = vst [vmem:[#allocation91_spill] sm:$0xff] %v12402_v35  ;;  %v12404_v46 = vpop.eup %9360  ;;  %6167 = vrot.lane.b32.xlu0 %v12382_v51, %s9739_s19  ;;  %9380 = vrcp.f32 %v5933_v8 }
 0x480   : > { %13813 = vst [vmem:[#allocation92_spill] sm:$0xff] %v12404_v46  ;;  %v12408_v0 = vpop.eup %9362  ;;  %6205 = vrot.lane.b32.xlu1 %v12402_v35, %s9739_s19  ;;  %9382 = vrcp.f32 %v5930_v63  ;;  %v6342_v63 = vcombine.low %v12205_v17, %v12218_v26 }
 0x481   : > { %13814 = vst [vmem:[#allocation93_spill] sm:$0xff] %v12408_v0  ;;  %v9365_v30 = vpop.eup %9364  ;;  %9384 = vrcp.f32 %v5931_v55 }
 0x482   : > { %v9367_v50 = vpop.eup %9366  ;;  %v5934_v18 = vadd.f32 1.0, %v9365_v30 }
 0x483   : > { %v12412_v60 = vpop.eup %9368  ;;  %6203 = vrot.lane.b32.xlu0 %v12400_v47, %s9739_s19  ;;  %v5935_v21 = vadd.f32 1.0, %v9367_v50  ;;  %v6340_v50 = vcombine.low %v12110_v39, %v12115_v59 }
 0x484   : > { %13815 = vst [vmem:[#allocation94_spill] sm:$0xff] %v12412_v60  ;;  %v9371_v27 = vpop.eup %9370  ;;  %6207 = vrot.lane.b32.xlu1 %v12404_v46, %s9739_s19  ;;  %9386 = vrcp.f32 %v5934_v18  ;;  %v6356_v18 = vrot.slane %v6341_v14, %v9996_v48  ;;  %v6500_v14 = vrot.slane %v6485_v49, %v9996_v48 }
 0x485   : > { %v9373_v16 = vpop.eup %9372  ;;  %v5936_v52 = vadd.f32 1.0, %v9371_v27  ;;  %9388 = vrcp.f32 %v5935_v21  ;;  %v6370_v21 = vrot.slane %v12267_v32, %v9996_v48  ;;  %v6438_v32 = vcombine.low %v12125_v10, %v12128_v31 }
 0x486   : > { %v9375_v43 = vpop.eup %9374  ;;  %v5939_v8 = vadd.f32 1.0, %v9373_v16  ;;  %v6486_v16 = vcombine.low %v12184_v22, %v12283_v40 }
 0x487   : > { %v9377_v29 = vpop.eup %9376  ;;  %6209 = vrot.lane.b32.xlu0 %v12408_v0, %s9739_s19  ;;  %v5937_v30 = vadd.f32 1.0, %v9375_v43  ;;  %9390 = vrcp.f32 %v5936_v52  ;;  %v6484_v43 = vcombine.low %v12147_v34, %v12248_v24  ;;  %v6349_v52 = vrot.slane %v6340_v50, %v9996_v48  ;;  %v6336_v24 = vld [vmem:[#allocation3 + $0x18] sm:$0x7f] }
 0x488   : > { %6211 = vrot.lane.b32.xlu1 %v12412_v60, %s9739_s19  ;;  %v12428_v55 = vpop.eup %9378  ;;  %v5938_v27 = vadd.f32 1.0, %v9377_v29  ;;  %9392 = vrcp.f32 %v5939_v8  ;;  %v6363_v29 = vrot.slane %v6342_v63, %v9996_v48  ;;  %v6388_v8 = vcombine.low %v12311_v19, %v12243_v36 }
 0x489   : > { %13816 = vst [vmem:[#allocation95_spill] sm:$0xff] %v12428_v55  ;;  %v12432_v5 = vpop.eup %9380  ;;  %9394 = vrcp.f32 %v5937_v30  ;;  %v6390_v63 = vcombine.low %v12324_v44, %v12339_v11  ;;  %v6371_v30 = vcombine.low %v6349_v52, %v6356_v18  ;;  %v6493_v50 = vrot.slane %v6484_v43, %v9996_v48 }
 0x48a   : > { %13817 = vst [vmem:[#allocation96_spill] sm:$0xff] %v12432_v5  ;;  %v12447_v17 = vpop.eup %9382  ;;  %9396 = vrcp.f32 %v5938_v27  ;;  %v6372_v49 = vcombine.low %v6363_v29, %v6370_v21  ;;  %v6507_v27 = vrot.slane %v6486_v16, %v9996_v48  ;;  %v6514_v44 = vrot.slane %v12293_v38, %v9996_v48 }
 0x48b   : > { %6217 = vrot.lane.b32.xlu0 %v12428_v55, %s9739_s19  ;;  %13818 = vst [vmem:[#allocation97_spill] sm:$0xff] %v12447_v17  ;;  %v12454_v34 = vpop.eup %9384  ;;  %v6389_v11 = vcombine.low %v12253_v28, %v12318_v1  ;;  %v6436_v18 = vcombine.low %v12376_v53, %v12382_v51  ;;  %v6515_v43 = vcombine.low %v6493_v50, %v6500_v14  ;;  %9398 = vtanh.f32 %v12009_v58 }
 0x48c   : > { %6219 = vrot.lane.b32.xlu1 %v12432_v5, %s9739_s19  ;;  %13819 = vst [vmem:[#allocation98_spill] sm:$0xff] %v12454_v34  ;;  %v6397_v31 = vrot.slane %v6388_v8, %v9996_v48  ;;  %v6411_v10 = vrot.slane %v6390_v63, %v9996_v48  ;;  %v6379_v29 = vrot.slane %v6371_v30, %v9996_v48  ;;  %9400 = vtanh.f32 %v12029_v3 }
 0x48d   : > { %v6437_v16 = vcombine.low %v12057_v12, %v12062_v42  ;;  %v6459_v21 = vrot.slane %v6438_v32, %v9996_v48  ;;  %v6386_v14 = vrot.slane %v6372_v49, %v9996_v48  ;;  %v6516_v8 = vcombine.low %v6507_v27, %v6514_v44 }
 0x48e   : > { %v12470_v52 = vpop.eup %9386  ;;  %v6404_v63 = vrot.slane %v6389_v11, %v9996_v48  ;;  %v6418_v50 = vrot.slane %v12357_v57, %v9996_v48  ;;  %v6445_v30 = vrot.slane %v6436_v18, %v9996_v48  ;;  %v6466_v42 = vrot.slane %v12141_v45, %v9996_v48 }
 0x48f   : > { %6213 = vrot.lane.b32.xlu0 %v12447_v17, %s9739_s19  ;;  %13820 = vst [vmem:[#allocation99_spill] sm:$0xff] %v12470_v52  ;;  %v12474_v19 = vpop.eup %9388  ;;  %v6534_v32 = vcombine.low %v12394_v23, %v12400_v47  ;;  %v6523_v49 = vrot.slane %v6515_v43, %v9996_v48  ;;  %v6582_v11 = vcombine.low %v12454_v34, %v12428_v55  ;;  %9402 = vtanh.f32 %v12012_v2 }
 0x490   : > { %6215 = vrot.lane.b32.xlu1 %v12454_v34, %s9739_s19  ;;  %13821 = vst [vmem:[#allocation100_spill] sm:$0xff] %v12474_v19  ;;  %v6419_v44 = vcombine.low %v6397_v31, %v6404_v63  ;;  %v6420_v27 = vcombine.low %v6411_v10, %v6418_v50  ;;  %v6452_v18 = vrot.slane %v6437_v16, %v9996_v48  ;;  %9404 = vtanh.f32 %v12040_v62 }
 0x491   : > { %v12488_v53 = vpop.eup %9390  ;;  %v6468_v45 = vcombine.low %v6459_v21, %v6466_v42  ;;  %v6533_v47 = vcombine.low %v12364_v54, %v12371_v20  ;;  %v6387_v10 = vcombine.low %v6379_v29, %v6386_v14  ;;  %v6530_v31 = vrot.slane %v6516_v8, %v9996_v48 }
 0x492   : > { %13822 = vst [vmem:[#allocation101_spill] sm:$0xff] %v12488_v53  ;;  %v12495_v51 = vpop.eup %9392  ;;  %v6580_v43 = vcombine.low %v12404_v46, %v12408_v0  ;;  %v6581_v63 = vcombine.low %v12412_v60, %v12447_v17  ;;  %v6467_v50 = vcombine.low %v6445_v30, %v6452_v18  ;;  %v6532_v42 = vcombine.low %v12296_v25, %v12300_v61 }
 0x493   : > { %6221 = vrot.lane.b32.xlu0 %v12470_v52, %s9739_s19  ;;  %13823 = vst [vmem:[#allocation102_spill] sm:$0xff] %v12495_v51  ;;  %v12500_v12 = vpop.eup %9394  ;;  %v6555_v16 = vrot.slane %v6534_v32, %v9996_v48  ;;  %v6531_v34 = vcombine.low %v6523_v49, %v6530_v31  ;;  %v6427_v29 = vrot.slane %v6419_v44, %v9996_v48  ;;  %9406 = vtanh.f32 %v12049_v33 }
 0x494   : > { %6223 = vrot.lane.b32.xlu1 %v12474_v19, %s9739_s19  ;;  %13824 = vst [vmem:[#allocation103_spill] sm:$0xff] %v12500_v12  ;;  %v12507_v23 = vpop.eup %9396  ;;  %v6434_v14 = vrot.slane %v6420_v27, %v9996_v48  ;;  %v6603_v8 = vrot.slane %v6582_v11, %v9996_v48  ;;  %v6548_v55 = vrot.slane %v6533_v47, %v9996_v48  ;;  %9408 = vtanh.f32 %v11994_v41 }
 0x495   : > { %13825 = vst [vmem:[#allocation104_spill] sm:$0xff] %v12507_v23  ;;  %v6630_v21 = vcombine.low %v12507_v23, %v12495_v51  ;;  %v6562_v30 = vrot.slane %v12402_v35, %v9996_v48  ;;  %v6628_v32 = vcombine.low %v12470_v52, %v12474_v19  ;;  %v6629_v18 = vcombine.low %v12488_v53, %v12500_v12 }
 0x496   : > { %v6589_v49 = vrot.slane %v6580_v43, %v9996_v48  ;;  %v6596_v44 = vrot.slane %v6581_v63, %v9996_v48  ;;  %v6610_v27 = vrot.slane %v12432_v5, %v9996_v48  ;;  %v6475_v47 = vrot.slane %v6467_v50, %v9996_v48 }
 0x497   : > { %6225 = vrot.lane.b32.xlu0 %v12488_v53, %s9739_s19  ;;  %v6541_v11 = vrot.slane %v6532_v42, %v9996_v48  ;;  %v6651_v31 = vrot.slane %v6630_v21, %v9996_v48  ;;  %v6435_v46 = vcombine.low %v6427_v29, %v6434_v14  ;;  %v6482_v52 = vrot.slane %v6468_v45, %v9996_v48 }
 0x498   : > { %6227 = vrot.lane.b32.xlu1 %v12500_v12, %s9739_s19  ;;  %v6612_v12 = vcombine.low %v6603_v8, %v6610_v27  ;;  %v6637_v43 = vrot.slane %v6628_v32, %v9996_v48  ;;  %v6644_v63 = vrot.slane %v6629_v18, %v9996_v48  ;;  %v6658_v50 = vrot.slane %v12392_v56, %v9996_v48 }
 0x499   : > { %v6611_v42 = vcombine.low %v6589_v49, %v6596_v44  ;;  %9410 = vtanh.f32 %v12095_v4 }
 0x49a   : > { %v6660_v29 = vcombine.low %v6651_v31, %v6658_v50  ;;  %v6626_v45 = vrot.slane %v6612_v12, %v9996_v48  ;;  %v6659_v14 = vcombine.low %v6637_v43, %v6644_v63  ;;  %9412 = vtanh.f32 %v12055_v6 }
 0x49b   : > { %6676 = vrot.lane.b32.xlu0 %v6387_v10, %s13636_s22  ;;  %v6564_v10 = vcombine.low %v6555_v16, %v6562_v30  ;;  %v6483_v16 = vcombine.low %v6475_v47, %v6482_v52  ;;  %v6619_v30 = vrot.slane %v6611_v42, %v9996_v48  ;;  %9414 = vtanh.f32 %v12164_v15 }
 0x49c   : > { %6682 = vrot.lane.b32.xlu1 %v6531_v34, %s13636_s22  ;;  %v6563_v34 = vcombine.low %v6541_v11, %v6548_v55  ;;  %v6674_v32 = vrot.slane %v6660_v29, %v9996_v48  ;;  %v6667_v12 = vrot.slane %v6659_v14, %v9996_v48 }
 0x49d   : > { %v6578_v21 = vrot.slane %v6564_v10, %v9996_v48  ;;  %v6627_v18 = vcombine.low %v6619_v30, %v6626_v45 }
 0x49e   : > { %v6571_v55 = vrot.slane %v6563_v34, %v9996_v48  ;;  %v6675_v49 = vcombine.low %v6667_v12, %v6674_v32 }
 0x49f   : > { %6229 = vrot.lane.b32.xlu0 %v12507_v23, %s9739_s19 }
 0x4a0   : > { %6678 = vrot.lane.b32.xlu1 %v6435_v46, %s13636_s22  ;;  %v6579_v52 = vcombine.low %v6571_v55, %v6578_v21 }
 0x4a3   : > { %6680 = vrot.lane.b32.xlu0 %v6483_v16, %s13636_s22  ;;  %v12552_v8 = vpop.permute.xlu1 %6169 }
 0x4a4   : > { %6231 = vrot.lane.b32.xlu1 %v12495_v51, %s9739_s19 }
 0x4a5   : > { %v12557_v46 = vpop.permute.xlu0 %6171 }
 0x4a7   : > { %6684 = vrot.lane.b32.xlu0 %v6579_v52, %s13636_s22 }
 0x4a8   : > { %6686 = vrot.lane.b32.xlu1 %v6627_v18, %s13636_s22 }
 0x4a9   : > { %v12563_v44 = vpop.permute.xlu1 %6137 }
 0x4aa   : > { %v12565_v27 = vpop.permute.xlu0 %6139 }
 0x4ab   : > { %6688 = vrot.lane.b32.xlu0 %v6675_v49, %s13636_s22 }
 0x4ad   : > { %v12568_v47 = vpop.permute.xlu1 %6173 }
 0x4ae   : > { %v12570_v11 = vpop.permute.xlu0 %6175 }
 0x4b1   : > { %v12572_v10 = vpop.permute.xlu1 %6177 }
 0x4b3   : > { %v12574_v31 = vpop.permute.xlu0 %6179 }
 0x4bb   : > { %v12576_v34 = vpop.permute.xlu1 %6185 }
 0x4bc   : > { %v12578_v43 = vpop.permute.xlu0 %6187 }
 0x4bf   : > { %v12580_v63 = vpop.permute.xlu1 %6141 }
 0x4c0   : > { %v12582_v50 = vpop.permute.xlu0 %6143 }
 0x4c3   : > { %v12584_v42 = vpop.permute.xlu1 %6145 }
 0x4c4   : > { %v12586_v16 = vpop.permute.xlu0 %6147 }
 0x4c9   : > { %v12588_v21 = vpop.permute.xlu1 %6153 }
 0x4cc   : > { %v12590_v29 = vpop.permute.xlu0 %6155 }
 0x4cd   : > { %v12592_v45 = vpop.permute.xlu1 %6181 }
 0x4d0   : > { %v12594_v55 = vpop.permute.xlu0 %6183 }
 0x4d2   : > { %v12596_v14 = vpop.permute.xlu1 %6189 }
 0x4d4   : > { %v12598_v30 = vpop.permute.xlu0 %6191 }
 0x4d6   : > { %v12600_v52 = vpop.permute.xlu1 %6193 }
 0x4d8   : > { %v12602_v32 = vpop.permute.xlu0 %6195 }
 0x4da   : > { %v12604_v18 = vpop.permute.xlu1 %6149 }
 0x4dc   : > { %v12606_v12 = vpop.permute.xlu0 %6151 }
 0x4de   : > { %v12608_v49 = vpop.permute.xlu1 %6157 }
 0x4e0   : > { %v12610_v5 = vpop.permute.xlu0 %6159 }
 0x4e2   : > { %v12612_v51 = vpop.permute.xlu1 %6161 }
 0x4e4   : > { %v12614_v56 = vpop.permute.xlu0 %6163 }
 0x4e6   : > { %v12616_v23 = vpop.permute.xlu1 %6197 }
 0x4e8   : > { %v12618_v53 = vpop.permute.xlu0 %6199 }
 0x4ea   : > { %v12620_v60 = vpop.permute.xlu1 %6165 }
 0x4ed   : > { %v12622_v0 = vpop.permute.xlu0 %6233 }
 0x4ee   : > { %13826 = vst [vmem:[#allocation105_spill] sm:$0xff] %v12622_v0  ;;  %v12624_v19 = vpop.permute.xlu1 %6201  ;;  %v6334_v0 = vld [vmem:[#allocation3 + $0x8] sm:$0x7f] }
 0x4f1   : > { %v12626_v17 = vpop.permute.xlu0 %6167 }
 0x4f2   : > { %v12628_v35 = vpop.permute.xlu1 %6205 }
 0x4f3   : > { %13827 = vst [vmem:[#allocation106_spill] sm:$0xff] %v12628_v35 }
 0x4f5   : > { %v12630_v20 = vpop.permute.xlu0 %6203 }
 0x4f6   : > { %v12632_v54 = vpop.permute.xlu1 %6207 }
 0x4f7   : > { %13828 = vst [vmem:[#allocation107_spill] sm:$0xff] %v12632_v54 }
 0x4f9   : > { %v12634_v25 = vpop.permute.xlu0 %6209 }
 0x4fa   : > { %13829 = vst [vmem:[#allocation108_spill] sm:$0xff] %v12634_v25  ;;  %v12636_v61 = vpop.permute.xlu1 %6211 }
 0x4fb   : > { %13830 = vst [vmem:[#allocation109_spill] sm:$0xff] %v12636_v61 }
 0x4fd   : > { %v12638_v57 = vpop.permute.xlu0 %6217 }
 0x4fe   : > { %13831 = vst [vmem:[#allocation110_spill] sm:$0xff] %v12638_v57  ;;  %v12640_v36 = vpop.permute.xlu1 %6219 }
 0x4ff   : > { %13832 = vst [vmem:[#allocation111_spill] sm:$0xff] %v12640_v36 }
 0x501   : > { %v12642_v28 = vpop.permute.xlu0 %6213 }
 0x502   : > { %13833 = vst [vmem:[#allocation112_spill] sm:$0xff] %v12642_v28  ;;  %v12644_v1 = vpop.permute.xlu1 %6215 }
 0x503   : > { %13834 = vst [vmem:[#allocation113_spill] sm:$0xff] %v12644_v1 }
 0x505   : > { %v12646_v38 = vpop.permute.xlu0 %6221 }
 0x506   : > { %13835 = vst [vmem:[#allocation114_spill] sm:$0xff] %v12646_v38  ;;  %v12648_v40 = vpop.permute.xlu1 %6223 }
 0x507   : > { %13836 = vst [vmem:[#allocation115_spill] sm:$0xff] %v12648_v40 }
 0x509   : > { %v12650_v22 = vpop.permute.xlu0 %6225 }
 0x50a   : > { %13837 = vst [vmem:[#allocation116_spill] sm:$0xff] %v12650_v22  ;;  %v12652_v26 = vpop.permute.xlu1 %6227 }
 0x50b   : > { %13838 = vst [vmem:[#allocation117_spill] sm:$0xff] %v12652_v26 }
 0x50d   : > { %v6677_v39 = vpop.permute.xlu0 %6676 }
 0x50e   : > { %v6697_v9 = vmul.f32 %v6677_v39, %v6333_v7  ;;  %v6683_v59 = vpop.permute.xlu1 %6682 }
 0x50f   : > { %v6700_v37 = vmul.f32 %v6683_v59, %v6336_v24 }
 0x510   : > { %v6718_v36 = vrot.slane %v6697_v9, %v9996_v48  ;;  %v6711_v1 = vcombine.high %v6697_v9, %v6697_v9 }
 0x511   : > { %v6862_v57 = vrot.slane %v6700_v37, %v9996_v48  ;;  %v6855_v26 = vcombine.high %v6700_v37, %v6700_v37  ;;  %v12675_v37 = vpop.permute.xlu0 %6229 }
 0x512   : > { %v6734_v38 = vrot.slane %v6718_v36, %v9996_v48  ;;  %v6679_v28 = vpop.permute.xlu1 %6678  ;;  %v6726_v40 = vcombine.high %v6718_v36, %v6718_v36  ;;  %v6725_v39 = vrot.slane %v6711_v1, %v9996_v48 }
 0x513   : > { %v6878_v22 = vrot.slane %v6862_v57, %v9996_v48  ;;  %v6698_v61 = vmul.f32 %v6679_v28, %v6334_v0  ;;  %v6870_v9 = vcombine.high %v6862_v57, %v6862_v57  ;;  %v6869_v1 = vrot.slane %v6855_v26, %v9996_v48 }
 0x514   : > { %7047 = vrot.lane.b32.xlu1 %v6734_v38, %s9739_s19  ;;  %v6756_v59 = vcombine.high %v6734_v38, %v6734_v38  ;;  %v6748_v7 = vrot.slane %v6726_v40, %v9996_v48  ;;  %v6741_v36 = vrot.slane %v6725_v39, %v9996_v48 }
 0x515   : > { %7089 = vrot.lane.b32.xlu0 %v6878_v22, %s9739_s19  ;;  %v6766_v24 = vrot.slane %v6698_v61, %v9996_v48  ;;  %v6892_v38 = vrot.slane %v6870_v9, %v9996_v48  ;;  %v6900_v0 = vcombine.high %v6878_v22, %v6878_v22  ;;  %v6727_v9 = vcombine.high %v6725_v39, %v6725_v39 }
 0x516   : > { %v6757_v57 = vcombine.high %v6741_v36, %v6741_v36  ;;  %v6758_v54 = vcombine.high %v6748_v7, %v6748_v7  ;;  %v6871_v22 = vcombine.high %v6869_v1, %v6869_v1  ;;  %v6759_v26 = vcombine.high %v6698_v61, %v6698_v61 }
 0x517   : > { %v6782_v28 = vrot.slane %v6766_v24, %v9996_v48  ;;  %v6774_v40 = vcombine.high %v6766_v24, %v6766_v24  ;;  %v6902_v24 = vcombine.high %v6892_v38, %v6892_v38  ;;  %v6755_v35 = vrot.slane %v6727_v9, %v9996_v48 }
 0x518   : > { %7051 = vrot.lane.b32.xlu1 %v6756_v59, %s9739_s19  ;;  %v6885_v59 = vrot.slane %v6869_v1, %v9996_v48  ;;  %v6899_v39 = vrot.slane %v6871_v22, %v9996_v48  ;;  %v6337_v22 = vld [vmem:[#allocation3 + $0x20] sm:$0x7f] }
 0x519   : > { %7049 = vrot.lane.b32.xlu0 %v6748_v7, %s9739_s19  ;;  %v6796_v25 = vrot.slane %v6774_v40, %v9996_v48  ;;  %v6804_v7 = vcombine.high %v6782_v28, %v6782_v28 }
 0x51c   : > { %7055 = vrot.lane.b32.xlu1 %v6741_v36, %s9739_s19  ;;  %v6335_v36 = vld [vmem:[#allocation3 + $0x10] sm:$0x7f] }
 0x51d   : > { %7061 = vrot.lane.b32.xlu0 %v6782_v28, %s9739_s19 }
 0x520   : > { %7091 = vrot.lane.b32.xlu1 %v6892_v38, %s9739_s19  ;;  %v6806_v38 = vcombine.high %v6796_v25, %v6796_v25 }
 0x521   : > { %7093 = vrot.lane.b32.xlu0 %v6900_v0, %s9739_s19  ;;  %v6681_v0 = vpop.permute.xlu0 %6680 }
 0x522   : > { %v6699_v40 = vmul.f32 %v6681_v0, %v6335_v36 }
 0x524   : > { %7059 = vrot.lane.b32.xlu1 %v6757_v57, %s9739_s19  ;;  %v6773_v57 = vrot.slane %v6759_v26, %v9996_v48 }
 0x525   : > { %7097 = vrot.lane.b32.xlu0 %v6885_v59, %s9739_s19 }
 0x526   : > { %v6775_v61 = vcombine.high %v6773_v57, %v6773_v57  ;;  %v6789_v1 = vrot.slane %v6773_v57, %v9996_v48  ;;  %v6901_v57 = vcombine.high %v6885_v59, %v6885_v59  ;;  %v12706_v59 = vpop.permute.xlu1 %6231 }
 0x528   : > { %7063 = vrot.lane.b32.xlu1 %v6796_v25, %s9739_s19  ;;  %v6803_v26 = vrot.slane %v6775_v61, %v9996_v48 }
 0x529   : > { %7053 = vrot.lane.b32.xlu0 %v6758_v54, %s9739_s19  ;;  %v6814_v54 = vrot.slane %v6699_v40, %v9996_v48 }
 0x52b   : > { %v6822_v9 = vcombine.high %v6814_v54, %v6814_v54  ;;  %v6830_v28 = vrot.slane %v6814_v54, %v9996_v48 }
 0x52c   : > { %7095 = vrot.lane.b32.xlu1 %v6902_v24, %s9739_s19  ;;  %v6685_v24 = vpop.permute.xlu0 %6684 }
 0x52d   : > { %7057 = vrot.lane.b32.xlu0 %v6755_v35, %s9739_s19  ;;  %v6807_v35 = vcombine.high %v6699_v40, %v6699_v40  ;;  %v6701_v36 = vmul.f32 %v6685_v24, %v6337_v22  ;;  %v6844_v0 = vrot.slane %v6822_v9, %v9996_v48  ;;  %v6852_v61 = vcombine.high %v6830_v28, %v6830_v28 }
 0x52f   : > { %v6821_v25 = vrot.slane %v6807_v35, %v9996_v48  ;;  %v6903_v9 = vcombine.high %v6701_v36, %v6701_v36 }
 0x530   : > { %7099 = vrot.lane.b32.xlu1 %v6899_v39, %s9739_s19  ;;  %v6910_v39 = vrot.slane %v6701_v36, %v9996_v48 }
 0x531   : > { %7065 = vrot.lane.b32.xlu0 %v6804_v7, %s9739_s19  ;;  %v6823_v40 = vcombine.high %v6821_v25, %v6821_v25  ;;  %v6854_v7 = vcombine.high %v6844_v0, %v6844_v0  ;;  %v6837_v35 = vrot.slane %v6821_v25, %v9996_v48  ;;  %v6917_v22 = vrot.slane %v6903_v9, %v9996_v48  ;;  %v6687_v25 = vpop.permute.xlu1 %6686 }
 0x532   : > { %v6918_v54 = vcombine.high %v6910_v39, %v6910_v39 }
 0x533   : > { %v6853_v24 = vcombine.high %v6837_v35, %v6837_v35 }
 0x534   : > { %7067 = vrot.lane.b32.xlu1 %v6806_v38, %s9739_s19  ;;  %v6851_v38 = vrot.slane %v6823_v40, %v9996_v48  ;;  %v6919_v40 = vcombine.high %v6917_v22, %v6917_v22 }
 0x535   : > { %7069 = vrot.lane.b32.xlu0 %v6789_v1, %s9739_s19 }
 0x538   : > { %7071 = vrot.lane.b32.xlu1 %v6803_v26, %s9739_s19  ;;  %v6940_v26 = vrot.slane %v6918_v54, %v9996_v48  ;;  %v6947_v54 = vrot.slane %v6919_v40, %v9996_v48 }
 0x539   : > { %7075 = vrot.lane.b32.xlu0 %v6830_v28, %s9739_s19  ;;  %v6926_v28 = vrot.slane %v6910_v39, %v9996_v48 }
 0x53c   : > { %7077 = vrot.lane.b32.xlu1 %v6844_v0, %s9739_s19  ;;  %v6338_v0 = vld [vmem:[#allocation3 + $0x28] sm:$0x7f] }
 0x53d   : > { %7101 = vrot.lane.b32.xlu0 %v6901_v57, %s9739_s19  ;;  %v6805_v57 = vcombine.high %v6789_v1, %v6789_v1  ;;  %v6702_v36 = vmul.f32 %v6687_v25, %v6338_v0 }
 0x53f   : > { %v6958_v39 = vrot.slane %v6702_v36, %v9996_v48  ;;  %v6951_v1 = vcombine.high %v6702_v36, %v6702_v36 }
 0x540   : > { %7081 = vrot.lane.b32.xlu1 %v6854_v7, %s9739_s19  ;;  %v6950_v7 = vcombine.high %v6940_v26, %v6940_v26 }
 0x541   : > { %7079 = vrot.lane.b32.xlu0 %v6852_v61, %s9739_s19  ;;  %v6948_v61 = vcombine.high %v6926_v28, %v6926_v28  ;;  %v6965_v0 = vrot.slane %v6951_v1, %v9996_v48 }
 0x543   : > { %v6967_v40 = vcombine.high %v6965_v0, %v6965_v0 }
 0x544   : > { %7085 = vrot.lane.b32.xlu1 %v6851_v38, %s9739_s19  ;;  %v6933_v38 = vrot.slane %v6917_v22, %v9996_v48 }
 0x545   : > { %7083 = vrot.lane.b32.xlu0 %v6837_v35, %s9739_s19  ;;  %v6966_v35 = vcombine.high %v6958_v39, %v6958_v39 }
 0x546   : > { %v6949_v9 = vcombine.high %v6933_v38, %v6933_v38 }
 0x547   : > { %v6988_v22 = vrot.slane %v6966_v35, %v9996_v48 }
 0x548   : > { %7105 = vrot.lane.b32.xlu1 %v6940_v26, %s9739_s19  ;;  %v6974_v26 = vrot.slane %v6958_v39, %v9996_v48 }
 0x549   : > { %7103 = vrot.lane.b32.xlu0 %v6926_v28, %s9739_s19  ;;  %v6339_v28 = vld [vmem:[#allocation3 + $0x30] sm:$0x7f] }
 0x54c   : > { %7087 = vrot.lane.b32.xlu1 %v6853_v24, %s9739_s19  ;;  %v6689_v24 = vpop.permute.xlu0 %6688 }
 0x54d   : > { %7073 = vrot.lane.b32.xlu0 %v6805_v57, %s9739_s19  ;;  %v6703_v25 = vmul.f32 %v6689_v24, %v6339_v28  ;;  %v6996_v57 = vcombine.high %v6974_v26, %v6974_v26 }
 0x54f   : > { %v7006_v36 = vrot.slane %v6703_v25, %v9996_v48  ;;  %v6999_v39 = vcombine.high %v6703_v25, %v6703_v25 }
 0x550   : > { %7109 = vrot.lane.b32.xlu1 %v6950_v7, %s9739_s19  ;;  %v6998_v7 = vcombine.high %v6988_v22, %v6988_v22 }
 0x551   : > { %7107 = vrot.lane.b32.xlu0 %v6948_v61, %s9739_s19  ;;  %v6981_v61 = vrot.slane %v6965_v0, %v9996_v48  ;;  %v7022_v1 = vrot.slane %v7006_v36, %v9996_v48  ;;  %v7013_v35 = vrot.slane %v6999_v39, %v9996_v48  ;;  %v13839_v39 = vld [vmem:[#allocation58_spill] sm:$0xff] }
 0x553   : > { %v7015_v28 = vcombine.high %v7013_v35, %v7013_v35  ;;  %v7029_v0 = vrot.slane %v7013_v35, %v9996_v48 }
 0x554   : > { %7113 = vrot.lane.b32.xlu1 %v6947_v54, %s9739_s19  ;;  %v7014_v54 = vcombine.high %v7006_v36, %v7006_v36 }
 0x555   : > { %7111 = vrot.lane.b32.xlu0 %v6933_v38, %s9739_s19  ;;  %v6995_v38 = vrot.slane %v6967_v40, %v9996_v48  ;;  %v7043_v25 = vrot.slane %v7015_v28, %v9996_v48  ;;  %v9399_v40 = vpop.eup %9398 }
 0x556   : > { %v6284_v36 = vmul.f32 %v9399_v40, %v12563_v44 }
 0x558   : > { %7115 = vrot.lane.b32.xlu1 %v6949_v9, %s9739_s19  ;;  %v7036_v9 = vrot.slane %v7014_v54, %v9996_v48  ;;  %v13840_v54 = vld [vmem:[#allocation59_spill] sm:$0xff] }
 0x559   : > { %7117 = vrot.lane.b32.xlu0 %v6974_v26, %s9739_s19  ;;  %v7044_v26 = vcombine.high %v7022_v1, %v7022_v1 }
 0x55a   : > { %v7046_v24 = vcombine.high %v7036_v9, %v7036_v9 }
 0x55c   : > { %7119 = vrot.lane.b32.xlu1 %v6988_v22, %s9739_s19  ;;  %v6997_v22 = vcombine.high %v6981_v61, %v6981_v61 }
 0x55d   : > { %7121 = vrot.lane.b32.xlu0 %v6996_v57, %s9739_s19  ;;  %v7045_v57 = vcombine.high %v7029_v0, %v7029_v0 }
 0x560   : > { %7123 = vrot.lane.b32.xlu1 %v6998_v7, %s9739_s19  ;;  %v9401_v7 = vpop.eup %9400 }
 0x561   : > { %7125 = vrot.lane.b32.xlu0 %v6981_v61, %s9739_s19  ;;  %v6305_v58 = vmul.f32 %v9401_v7, %v12574_v31  ;;  %v9403_v62 = vpop.eup %9402  ;;  %v13844_v7 = vld [vmem:[#allocation29_spill] sm:$0xff] }
 0x562   : > { %v9405_v41 = vpop.eup %9404  ;;  %v6285_v4 = vmul.f32 %v9403_v62, %v12565_v27 }
 0x563   : > { %v6286_v6 = vmul.f32 %v9405_v41, %v12580_v63  ;;  %v9407_v15 = vpop.eup %9406  ;;  %v13841_v63 = vld [vmem:[#allocation75_spill] sm:$0xff] }
 0x564   : > { %7127 = vrot.lane.b32.xlu1 %v6995_v38, %s9739_s19  ;;  %v6288_v35 = vmul.f32 %v9407_v15, %v12584_v42 }
 0x565   : > { %7131 = vrot.lane.b32.xlu0 %v7022_v1, %s9739_s19 }
 0x568   : > { %7133 = vrot.lane.b32.xlu1 %v7036_v9, %s9739_s19  ;;  %v12779_v9 = vpop.eup %9408 }
 0x569   : > { %7135 = vrot.lane.b32.xlu0 %v7044_v26, %s9739_s19  ;;  %v9411_v28 = vpop.eup %9410 }
 0x56c   : > { %7137 = vrot.lane.b32.xlu1 %v7046_v24, %s9739_s19  ;;  %v13842_v24 = vld [vmem:[#allocation34_spill] sm:$0xff] }
 0x56d   : > { %7139 = vrot.lane.b32.xlu0 %v7029_v0, %s9739_s19 }
 0x570   : > { %7141 = vrot.lane.b32.xlu1 %v7043_v25, %s9739_s19  ;;  %v9413_v25 = vpop.eup %9412 }
 0x571   : > { %7129 = vrot.lane.b32.xlu0 %v6997_v22, %s9739_s19  ;;  %v6306_v22 = vmul.f32 %v9411_v28, %v12592_v45  ;;  %v9415_v42 = vpop.eup %9414 }
 0x574   : > { %7143 = vrot.lane.b32.xlu1 %v7045_v57, %s9739_s19  ;;  %v13843_v57 = vld [vmem:[#allocation67_spill] sm:$0xff] }
 0x586   : > { %v7048_v61 = vpop.permute.xlu1 %7047 }
 0x587   : > { %v12759_v3 = vadd.f32 %v7048_v61, %v6284_v36  ;;  %v7090_v2 = vpop.permute.xlu0 %7089  ;;  %v6291_v61 = vmul.f32 %v9415_v42, %v12606_v12  ;;  %v13848_v42 = vld [vmem:[#allocation26_spill] sm:$0xff] }
 0x588   : > { %v12763_v33 = vadd.f32 %v7090_v2, %v6305_v58 }
 0x589   : > { %9416 = vtanh.f32 %v12759_v3 }
 0x58a   : > { %9418 = vtanh.f32 %v12113_v13  ;;  %v7052_v44 = vpop.permute.xlu1 %7051 }
 0x58b   : > { %9420 = vtanh.f32 %v13839_v39  ;;  %v7050_v31 = vpop.permute.xlu0 %7049  ;;  %v12773_v1 = vadd.f32 %v7052_v44, %v6286_v6  ;;  %v13845_v39 = vld [vmem:[#allocation27_spill] sm:$0xff] }
 0x58c   : > { %9422 = vtanh.f32 %v13840_v54  ;;  %v12770_v38 = vadd.f32 %v7050_v31, %v6285_v4  ;;  %v13846_v31 = vld [vmem:[#allocation36_spill] sm:$0xff] }
 0x58d   : > { %9424 = vtanh.f32 %v12763_v33 }
 0x58e   : > { %9426 = vtanh.f32 %v12770_v38  ;;  %v7586_v13 = vcombine.low %v12759_v3, %v12770_v38  ;;  %v7056_v27 = vpop.permute.xlu1 %7055 }
 0x58f   : > { %9428 = vtanh.f32 %v13841_v63  ;;  %v7062_v26 = vpop.permute.xlu0 %7061  ;;  %v12783_v0 = vadd.f32 %v7056_v27, %v6288_v35  ;;  %v13847_v27 = vld [vmem:[#allocation72_spill] sm:$0xff] }
 0x590   : > { %9430 = vtanh.f32 %v13842_v24  ;;  %v12796_v41 = vadd.f32 %v7062_v26, %v6291_v61 }
 0x591   : > { %9432 = vtanh.f32 %v12773_v1 }
 0x592   : > { %9434 = vtanh.f32 %v13843_v57  ;;  %v7092_v40 = vpop.permute.xlu1 %7091 }
 0x593   : > { %v9417_v36 = vpop.eup %9416  ;;  %9436 = vtanh.f32 %v13844_v7  ;;  %v12790_v58 = vadd.f32 %v7092_v40, %v6306_v22  ;;  %v7094_v2 = vpop.permute.xlu0 %7093 }
 0x594   : > { %v9419_v62 = vpop.eup %9418  ;;  %9438 = vtanh.f32 %v12783_v0  ;;  %7341 = vrot.lane.b32.xlu0 %v9417_v36, %s9737_s25  ;;  %v13849_v36 = vld [vmem:[#allocation46_spill] sm:$0xff] }
 0x595   : > { %v12794_v45 = vpop.eup %9420  ;;  %9440 = vtanh.f32 %v12790_v58  ;;  %v7730_v4 = vcombine.low %v12763_v33, %v12790_v58  ;;  %v6292_v26 = vmul.f32 %v9419_v62, %v12588_v21  ;;  %v13850_v62 = vld [vmem:[#allocation71_spill] sm:$0xff] }
 0x596   : > { %v9423_v44 = vpop.eup %9422  ;;  %9442 = vtanh.f32 %v13845_v39  ;;  %v7060_v12 = vpop.permute.xlu1 %7059 }
 0x597   : > { %v9425_v6 = vpop.eup %9424  ;;  %9444 = vtanh.f32 %v13846_v31  ;;  %v6307_v54 = vmul.f32 %v9423_v44, %v12594_v55  ;;  %v7098_v15 = vpop.permute.xlu0 %7097 }
 0x598   : > { %v9427_v35 = vpop.eup %9426  ;;  %9446 = vtanh.f32 %v13847_v27  ;;  %7383 = vrot.lane.b32.xlu0 %v9425_v6, %s9737_s25 }
 0x599   : > { %v9429_v63 = vpop.eup %9428  ;;  %9448 = vtanh.f32 %v12796_v41  ;;  %v7217_v28 = vadd.f32 %v7094_v2, %v6307_v54  ;;  %7343 = vrot.lane.b32.xlu1 %v9427_v35, %s9737_s25 }
 0x59a   : > { %v9431_v24 = vpop.eup %9430  ;;  %v6287_v22 = vmul.f32 %v9429_v63, %v12582_v50  ;;  %9450 = vtanh.f32 %v13848_v42  ;;  %v7064_v55 = vpop.permute.xlu1 %7063  ;;  %v6308_v50 = vmul.f32 %v9413_v25, %v12576_v34  ;;  %v7595_v34 = vrot.slane %v7586_v13, %v9996_v48 }
 0x59b   : > { %v9433_v57 = vpop.eup %9432  ;;  %v6309_v40 = vmul.f32 %v9431_v24, %v12578_v43  ;;  %9452 = vtanh.f32 %v13849_v36  ;;  %v12813_v7 = vadd.f32 %v7064_v55, %v6292_v26  ;;  %v7054_v61 = vpop.permute.xlu0 %7053  ;;  %v13851_v26 = vld [vmem:[#allocation21_spill] sm:$0xff] }
 0x59c   : > { %v9435_v21 = vpop.eup %9434  ;;  %9454 = vtanh.f32 %v13850_v62  ;;  %v7197_v2 = vadd.f32 %v7054_v61, %v6287_v22  ;;  %7345 = vrot.lane.b32.xlu0 %v9433_v57, %s9737_s25  ;;  %v13852_v22 = vld [vmem:[#allocation17_spill] sm:$0xff] }
 0x59d   : > { %v9437_v44 = vpop.eup %9436  ;;  %9456 = vtanh.f32 %v7217_v28  ;;  %v12818_v39 = vadd.f32 %v7098_v15, %v6309_v40  ;;  %v7634_v43 = vcombine.low %v12796_v41, %v12813_v7  ;;  %v6289_v31 = vmul.f32 %v9435_v21, %v12586_v16  ;;  %v13853_v61 = vld [vmem:[#allocation45_spill] sm:$0xff] }
 0x59e   : > { %v9439_v6 = vpop.eup %9438  ;;  %v6290_v54 = vmul.f32 %v9437_v44, %v12604_v18  ;;  %9458 = vtanh.f32 %v7197_v2  ;;  %v7587_v35 = vcombine.low %v12773_v1, %v7197_v2  ;;  %v7096_v27 = vpop.permute.xlu1 %7095  ;;  %v13854_v2 = vld [vmem:[#allocation48_spill] sm:$0xff] }
 0x59f   : > { %v9441_v63 = vpop.eup %9440  ;;  %9460 = vtanh.f32 %v13851_v26  ;;  %v7218_v25 = vadd.f32 %v7096_v27, %v6308_v50  ;;  %v7058_v15 = vpop.permute.xlu0 %7057  ;;  %v13855_v26 = vld [vmem:[#allocation53_spill] sm:$0xff] }
 0x5a0   : > { %v9443_v24 = vpop.eup %9442  ;;  %9462 = vtanh.f32 %v13852_v22  ;;  %v12831_v16 = vadd.f32 %v7060_v12, %v6290_v54  ;;  %v7602_v18 = vrot.slane %v7587_v35, %v9996_v48  ;;  %v7199_v42 = vadd.f32 %v7058_v15, %v6289_v31  ;;  %7349 = vrot.lane.b32.xlu0 %v9439_v6, %s9737_s25  ;;  %7385 = vrot.lane.b32.xlu1 %v9441_v63, %s9737_s25 }
 0x5a1   : > { %v9445_v1 = vpop.eup %9444  ;;  %v6310_v55 = vmul.f32 %v9443_v24, %v12596_v14  ;;  %9464 = vtanh.f32 %v12818_v39  ;;  %v7731_v3 = vcombine.low %v7217_v28, %v7218_v25  ;;  %v12847_v14 = vrot.slane %v7730_v4, %v9996_v48  ;;  %v13856_v24 = vld [vmem:[#allocation19_spill] sm:$0xff] }
 0x5a2   : > { %v12838_v38 = vpop.eup %9446  ;;  %v6293_v13 = vmul.f32 %v9445_v1, %v12590_v29  ;;  %v7617_v57 = vcombine.low %v7595_v34, %v7602_v18  ;;  %9466 = vtanh.f32 %v7199_v42  ;;  %v7588_v12 = vcombine.low %v12783_v0, %v7199_v42  ;;  %v7100_v40 = vpop.permute.xlu1 %7099 }
 0x5a3   : > { %v9449_v36 = vpop.eup %9448  ;;  %9468 = vtanh.f32 %v13853_v61  ;;  %v12850_v28 = vrot.slane %v7731_v3, %v9996_v48  ;;  %v12852_v21 = vadd.f32 %v7100_v40, %v6310_v55  ;;  %v7066_v29 = vpop.permute.xlu0 %7065  ;;  %v7616_v0 = vrot.slane %v12831_v16, %v9996_v48  ;;  %v13857_v40 = vld [vmem:[#allocation40_spill] sm:$0xff] }
 0x5a4   : > { %v9451_v62 = vpop.eup %9450  ;;  %9470 = vtanh.f32 %v13854_v2  ;;  %v7609_v44 = vrot.slane %v7588_v12, %v9996_v48  ;;  %v7203_v50 = vadd.f32 %v7066_v29, %v6293_v13  ;;  %7355 = vrot.lane.b32.xlu0 %v9449_v36, %s9737_s25 }
 0x5a5   : > { %v9453_v33 = vpop.eup %9452  ;;  %v6294_v58 = vmul.f32 %v9451_v62, %v12608_v49  ;;  %9472 = vtanh.f32 %v12813_v7  ;;  %v7761_v4 = vcombine.low %v12847_v14, %v12850_v28  ;;  %v7732_v6 = vcombine.low %v12818_v39, %v12852_v21 }
 0x5a6   : > { %v12865_v31 = vpop.eup %9454  ;;  %v6295_v54 = vmul.f32 %v9453_v33, %v12610_v5  ;;  %v7618_v35 = vcombine.low %v7609_v44, %v7616_v0  ;;  %9474 = vtanh.f32 %v7203_v50  ;;  %v7068_v27 = vpop.permute.xlu1 %7067  ;;  %v7625_v39 = vrot.slane %v7617_v57, %v9996_v48 }
 0x5a7   : > { %v9457_v63 = vpop.eup %9456  ;;  %9476 = vtanh.f32 %v13855_v26  ;;  %v12869_v34 = vadd.f32 %v7068_v27, %v6294_v58  ;;  %v7070_v49 = vpop.permute.xlu0 %7069  ;;  %v7753_v26 = vrot.slane %v7732_v6, %v9996_v48 }
 0x5a8   : > { %v9459_v15 = vpop.eup %9458  ;;  %9478 = vtanh.f32 %v13856_v24  ;;  %v12872_v22 = vadd.f32 %v7070_v49, %v6295_v54  ;;  %7387 = vrot.lane.b32.xlu0 %v9457_v63, %s9737_s25  ;;  %v7632_v5 = vrot.slane %v7618_v35, %v9996_v48  ;;  %v13860_v54 = vld [vmem:[#allocation38_spill] sm:$0xff]  ;;  %v6300_v63 = vmul.f32 %v12779_v9, %v12552_v8  ;;  %v13861_v8 = vld [vmem:[#allocation24_spill] sm:$0xff] }
 0x5a9   : > { %v9461_v18 = vpop.eup %9460  ;;  %9480 = vtanh.f32 %v7218_v25  ;;  %v7635_v42 = vcombine.low %v7203_v50, %v12869_v34  ;;  %7347 = vrot.lane.b32.xlu1 %v9459_v15, %s9737_s25  ;;  %v12888_v25 = vrot.slane %v7634_v43, %v9996_v48  ;;  %v13859_v50 = vld [vmem:[#allocation57_spill] sm:$0xff] }
 0x5aa   : > { %v9463_v1 = vpop.eup %9462  ;;  %v6298_v55 = vmul.f32 %v9461_v18, %v12620_v60  ;;  %9482 = vtanh.f32 %v12872_v22  ;;  %v7072_v3 = vpop.permute.xlu1 %7071  ;;  %v12881_v13 = vcombine.low %v7625_v39, %v7632_v5  ;;  %v13858_v60 = vld [vmem:[#allocation30_spill] sm:$0xff] }
 0x5ab   : > { %v9465_v12 = vpop.eup %9464  ;;  %9484 = vtanh.f32 %v13857_v40  ;;  %v12891_v57 = vrot.slane %v7635_v42, %v9996_v48  ;;  %v7076_v36 = vpop.permute.xlu0 %7075  ;;  %v6311_v7 = vmul.f32 %v9463_v1, %v12598_v30  ;;  %v6301_v30 = vmul.f32 %v12838_v38, %v12557_v46 }
 0x5ac   : > { %v9467_v61 = vpop.eup %9466  ;;  %9486 = vtanh.f32 %v13858_v60  ;;  %v7208_v29 = vadd.f32 %v7076_v36, %v6298_v55  ;;  %7391 = vrot.lane.b32.xlu0 %v9465_v12, %s9737_s25  ;;  %v6302_v46 = vmul.f32 %v12865_v31, %v12568_v47  ;;  %v7769_v36 = vrot.slane %v7761_v4, %v9996_v48  ;;  %v13862_v31 = vld [vmem:[#allocation43_spill] sm:$0xff] }
 0x5ad   : > { %v9469_v62 = vpop.eup %9468  ;;  %9488 = vtanh.f32 %v12852_v21  ;;  %v7665_v2 = vcombine.low %v12888_v25, %v12891_v57  ;;  %7351 = vrot.lane.b32.xlu1 %v9467_v61, %s9737_s25  ;;  %v13867_v57 = vld [vmem:[#allocation106_spill] sm:$0xff] }
 0x5ae   : > { %v9471_v41 = vpop.eup %9470  ;;  %v6299_v43 = vmul.f32 %v9469_v62, %v12626_v17  ;;  %9490 = vtanh.f32 %v7208_v29  ;;  %v7078_v0 = vpop.permute.xlu1 %7077 }
 0x5af   : > { %v9473_v44 = vpop.eup %9472  ;;  %9492 = vtanh.f32 %v13859_v50  ;;  %v7102_v33 = vpop.permute.xlu0 %7101 }
 0x5b0   : > { %v9475_v58 = vpop.eup %9474  ;;  %9494 = vtanh.f32 %v13860_v54  ;;  %v7209_v21 = vadd.f32 %v7078_v0, %v6299_v43  ;;  %v7221_v35 = vadd.f32 %v7102_v33, %v6311_v7  ;;  %v6303_v43 = vmul.f32 %v9471_v41, %v12570_v11  ;;  %v13863_v54 = vld [vmem:[#allocation49_spill] sm:$0xff] }
 0x5b1   : > { %v9477_v27 = vpop.eup %9476  ;;  %9496 = vtanh.f32 %v12831_v16  ;;  %7359 = vrot.lane.b32.xlu0 %v9475_v58, %s9737_s25  ;;  %7357 = vrot.lane.b32.xlu1 %v9473_v44, %s9737_s25 }
 0x5b2   : > { %v9479_v17 = vpop.eup %9478  ;;  %9498 = vtanh.f32 %v7221_v35  ;;  %v7760_v49 = vrot.slane %v7221_v35, %v9996_v48  ;;  %v7082_v15 = vpop.permute.xlu1 %7081  ;;  %v7682_v5 = vcombine.low %v7208_v29, %v7209_v21  ;;  %v6304_v41 = vmul.f32 %v9477_v27, %v12572_v10 }
 0x5b3   : > { %v9481_v24 = vpop.eup %9480  ;;  %v6296_v39 = vmul.f32 %v9479_v17, %v12612_v51  ;;  %9500 = vtanh.f32 %v13861_v8  ;;  %v7080_v9 = vpop.permute.xlu0 %7079  ;;  %v12914_v42 = vadd.f32 %v7082_v15, %v6301_v30 }
 0x5b4   : > { %v9483_v16 = vpop.eup %9482  ;;  %v7762_v18 = vcombine.low %v7753_v26, %v7760_v49  ;;  %v7210_v1 = vadd.f32 %v7080_v9, %v6300_v63  ;;  %9502 = vtanh.f32 %v12869_v34  ;;  %v7691_v61 = vrot.slane %v7682_v5, %v9996_v48 }
 0x5b5   : > { %v9485_v55 = vpop.eup %9484  ;;  %v7206_v38 = vadd.f32 %v7072_v3, %v6296_v39  ;;  %7363 = vrot.lane.b32.xlu0 %v9483_v16, %s9737_s25  ;;  %7389 = vrot.lane.b32.xlu1 %v9481_v24, %s9737_s25  ;;  %v13864_v39 = vld [vmem:[#allocation60_spill] sm:$0xff] }
 0x5b6   : > { %v9487_v51 = vpop.eup %9486  ;;  %v7776_v6 = vrot.slane %v7762_v18, %v9996_v48  ;;  %9504 = vtanh.f32 %v7210_v1  ;;  %v7683_v12 = vcombine.low %v7210_v1, %v12914_v42  ;;  %v7086_v40 = vpop.permute.xlu1 %7085  ;;  %v6312_v28 = vmul.f32 %v9485_v55, %v12600_v52 }
 0x5b7   : > { %v9489_v47 = vpop.eup %9488  ;;  %9506 = vtanh.f32 %v13862_v31  ;;  %v7084_v34 = vpop.permute.xlu0 %7083  ;;  %v12936_v50 = vadd.f32 %v7086_v40, %v6303_v43  ;;  %v7636_v17 = vcombine.low %v12872_v22, %v7206_v38  ;;  %v6313_v18 = vmul.f32 %v9487_v51, %v12602_v32 }
 0x5b8   : > { %v9491_v3 = vpop.eup %9490  ;;  %v7698_v60 = vrot.slane %v7683_v12, %v9996_v48  ;;  %v7212_v29 = vadd.f32 %v7084_v34, %v6302_v46  ;;  %v12930_v62 = vcombine.low %v7769_v36, %v7776_v6  ;;  %9508 = vtanh.f32 %v7206_v38  ;;  %v13865_v34 = vld [vmem:[#allocation78_spill] sm:$0xff] }
 0x5b9   : > { %v9493_v7 = vpop.eup %9492  ;;  %7369 = vrot.lane.b32.xlu0 %v9491_v3, %s9737_s25  ;;  %7393 = vrot.lane.b32.xlu1 %v9489_v47, %s9737_s25  ;;  %v7657_v9 = vrot.slane %v7636_v17, %v9996_v48  ;;  %v6316_v1 = vmul.f32 %v12794_v45, %v12624_v19 }
 0x5ba   : > { %v9495_v14 = vpop.eup %9494  ;;  %v7713_v4 = vcombine.low %v7691_v61, %v7698_v60  ;;  %9510 = vtanh.f32 %v7212_v29  ;;  %v7106_v0 = vpop.permute.xlu1 %7105  ;;  %v7684_v63 = vcombine.low %v7212_v29, %v12936_v50  ;;  %v6297_v52 = vmul.f32 %v9493_v7, %v12614_v56  ;;  %v13866_v7 = vld [vmem:[#allocation50_spill] sm:$0xff] }
 0x5bb   : > { %v9497_v44 = vpop.eup %9496  ;;  %v7104_v33 = vpop.permute.xlu0 %7103  ;;  %9512 = vtanh.f32 %v13863_v54  ;;  %v6314_v27 = vmul.f32 %v9495_v14, %v12616_v23  ;;  %v7223_v47 = vadd.f32 %v7106_v0, %v6313_v18 }
 0x5bc   : > { %v9499_v58 = vpop.eup %9498  ;;  %v12939_v35 = vadd.f32 %v7104_v33, %v6312_v28  ;;  %9514 = vtanh.f32 %v7209_v21  ;;  %v7705_v8 = vrot.slane %v7684_v63, %v9996_v48  ;;  %v7721_v36 = vrot.slane %v7713_v4, %v9996_v48  ;;  %v13868_v33 = vld [vmem:[#allocation56_spill] sm:$0xff] }
 0x5bd   : > { %v9501_v11 = vpop.eup %9500  ;;  %7353 = vrot.lane.b32.xlu0 %v9497_v44, %s9737_s25  ;;  %7395 = vrot.lane.b32.xlu1 %v9499_v58, %s9737_s25 }
 0x5be   : > { %9516 = vtanh.f32 %v12939_v35  ;;  %v7088_v30 = vpop.permute.xlu1 %7087  ;;  %v9503_v26 = vpop.eup %9502  ;;  %v6315_v22 = vmul.f32 %v9501_v11, %v12618_v53  ;;  %v7778_v3 = vcombine.low %v12939_v35, %v7223_v47 }
 0x5bf   : > { %v12948_v49 = vadd.f32 %v7088_v30, %v6304_v41  ;;  %v7074_v15 = vpop.permute.xlu0 %7073  ;;  %9518 = vtanh.f32 %v13864_v39  ;;  %v13869_v41 = vld [vmem:[#allocation107_spill] sm:$0xff] }
 0x5c0   : > { %v9505_v24 = vpop.eup %9504  ;;  %v7207_v10 = vadd.f32 %v7074_v15, %v6297_v52  ;;  %v7787_v58 = vrot.slane %v7778_v3, %v9996_v48  ;;  %v13879_v3 = vld [vmem:[#allocation113_spill] sm:$0xff] }
 0x5c1   : > { %v9507_v21 = vpop.eup %9506  ;;  %v7712_v56 = vrot.slane %v12948_v49, %v9996_v48  ;;  %7373 = vrot.lane.b32.xlu0 %v9505_v24, %s9737_s25  ;;  %7361 = vrot.lane.b32.xlu1 %v9503_v26, %s9737_s25 }
 0x5c2   : > { %9520 = vtanh.f32 %v7207_v10  ;;  %v7664_v16 = vrot.slane %v7207_v10, %v9996_v48  ;;  %v7110_v5 = vpop.permute.xlu1 %7109  ;;  %v9509_v23 = vpop.eup %9508  ;;  %v6317_v6 = vmul.f32 %v9507_v21, %v12630_v20  ;;  %v7673_v20 = vrot.slane %v7665_v2, %v9996_v48  ;;  %v13871_v10 = vld [vmem:[#allocation55_spill] sm:$0xff] }
 0x5c3   : > { %v7714_v55 = vcombine.low %v7705_v8, %v7712_v56  ;;  %v7108_v46 = vpop.permute.xlu0 %7107  ;;  %v7225_v40 = vadd.f32 %v7110_v5, %v6315_v22  ;;  %9522 = vtanh.f32 %v12914_v42  ;;  %v13872_v8 = vld [vmem:[#allocation42_spill] sm:$0xff] }
 0x5c4   : > { %v9511_v38 = vpop.eup %9510  ;;  %v7666_v12 = vcombine.low %v7657_v9, %v7664_v16  ;;  %v7224_v53 = vadd.f32 %v7108_v46, %v6314_v27 }
 0x5c5   : > { %v7728_v31 = vrot.slane %v7714_v55, %v9996_v48  ;;  %7377 = vrot.lane.b32.xlu0 %v9511_v38, %s9737_s25  ;;  %7365 = vrot.lane.b32.xlu1 %v9509_v23, %s9737_s25  ;;  %v9513_v19 = vpop.eup %9512  ;;  %v13873_v23 = vld [vmem:[#allocation108_spill] sm:$0xff] }
 0x5c6   : > { %v7680_v32 = vrot.slane %v7666_v12, %v9996_v48  ;;  %9524 = vtanh.f32 %v7224_v53  ;;  %v7779_v45 = vcombine.low %v7224_v53, %v7225_v40  ;;  %v7114_v42 = vpop.permute.xlu1 %7113  ;;  %v9515_v51 = vpop.eup %9514  ;;  %v6318_v2 = vmul.f32 %v9513_v19, %v13867_v57 }
 0x5c7   : > { %9526 = vtanh.f32 %v13865_v34  ;;  %v7112_v61 = vpop.permute.xlu0 %7111  ;;  %v12976_v60 = vcombine.low %v7721_v36, %v7728_v31  ;;  %v7227_v43 = vadd.f32 %v7114_v42, %v6317_v6  ;;  %v13875_v6 = vld [vmem:[#allocation109_spill] sm:$0xff] }
 0x5c8   : > { %v9517_v29 = vpop.eup %9516  ;;  %9528 = vtanh.f32 %v13866_v7  ;;  %v7226_v14 = vadd.f32 %v7112_v61, %v6316_v1  ;;  %v12979_v25 = vcombine.low %v7673_v20, %v7680_v32  ;;  %v7794_v28 = vrot.slane %v7779_v45, %v9996_v48  ;;  %v13874_v1 = vld [vmem:[#allocation62_spill] sm:$0xff]  ;;  %v13877_v32 = vld [vmem:[#allocation112_spill] sm:$0xff]  ;;  %v13878_v42 = vld [vmem:[#allocation37_spill] sm:$0xff] }
 0x5c9   : > { %9530 = vtanh.f32 %v12936_v50  ;;  %7397 = vrot.lane.b32.xlu0 %v9517_v29, %s9737_s25  ;;  %7371 = vrot.lane.b32.xlu1 %v9515_v51, %s9737_s25  ;;  %v9519_v44 = vpop.eup %9518  ;;  %v13870_v50 = vld [vmem:[#allocation81_spill] sm:$0xff]  ;;  %v13880_v29 = vld [vmem:[#allocation86_spill] sm:$0xff] }
 0x5ca   : > { %9532 = vtanh.f32 %v7226_v14  ;;  %v7780_v4 = vcombine.low %v7226_v14, %v7227_v43  ;;  %v7116_v0 = vpop.permute.xlu1 %7115  ;;  %v6319_v63 = vmul.f32 %v9519_v44, %v13869_v41  ;;  %v7809_v17 = vcombine.low %v7787_v58, %v7794_v28  ;;  %v13883_v58 = vld [vmem:[#allocation114_spill] sm:$0xff] }
 0x5cb   : > { %9534 = vtanh.f32 %v13868_v33  ;;  %v7228_v54 = vadd.f32 %v7116_v0, %v6318_v2  ;;  %v7118_v35 = vpop.permute.xlu0 %7117  ;;  %v13882_v0 = vld [vmem:[#allocation110_spill] sm:$0xff] }
 0x5cc   : > { %v9521_v11 = vpop.eup %9520  ;;  %9536 = vtanh.f32 %v13870_v50  ;;  %v7801_v52 = vrot.slane %v7780_v4, %v9996_v48  ;;  %v12994_v26 = vadd.f32 %v7118_v35, %v6319_v63  ;;  %v7817_v22 = vrot.slane %v7809_v17, %v9996_v48  ;;  %v13881_v4 = vld [vmem:[#allocation51_spill] sm:$0xff] }
 0x5cd   : > { %9538 = vtanh.f32 %v7223_v47  ;;  %v7808_v30 = vrot.slane %v7228_v54, %v9996_v48  ;;  %7367 = vrot.lane.b32.xlu1 %v9521_v11, %s9737_s25  ;;  %v9523_v24 = vpop.eup %9522  ;;  %v13884_v35 = vld [vmem:[#allocation83_spill] sm:$0xff] }
 0x5ce   : > { %9540 = vtanh.f32 %v12948_v49  ;;  %v7120_v15 = vpop.permute.xlu1 %7119 }
 0x5cf   : > { %9542 = vtanh.f32 %v13871_v10  ;;  %v7810_v21 = vcombine.low %v7801_v52, %v7808_v30  ;;  %v7122_v27 = vpop.permute.xlu0 %7121 }
 0x5d0   : > { %v9525_v39 = vpop.eup %9524  ;;  %9544 = vtanh.f32 %v13872_v8 }
 0x5d1   : > { %v9527_v56 = vpop.eup %9526  ;;  %9546 = vtanh.f32 %v7225_v40  ;;  %v7824_v9 = vrot.slane %v7810_v21, %v9996_v48  ;;  %7401 = vrot.lane.b32.xlu0 %v9525_v39, %s9737_s25  ;;  %7375 = vrot.lane.b32.xlu1 %v9523_v24, %s9737_s25  ;;  %v13876_v40 = vld [vmem:[#allocation74_spill] sm:$0xff] }
 0x5d2   : > { %v9529_v49 = vpop.eup %9528  ;;  %9548 = vtanh.f32 %v12994_v26  ;;  %v7124_v16 = vpop.permute.xlu1 %7123  ;;  %v6320_v18 = vmul.f32 %v9527_v56, %v13873_v23  ;;  %v13886_v21 = vld [vmem:[#allocation82_spill] sm:$0xff] }
 0x5d3   : > { %v9531_v5 = vpop.eup %9530  ;;  %9550 = vtanh.f32 %v13874_v1  ;;  %v7126_v55 = vpop.permute.xlu0 %7125  ;;  %v13005_v46 = vcombine.low %v7817_v22, %v7824_v9  ;;  %v6321_v12 = vmul.f32 %v9529_v49, %v13875_v6 }
 0x5d4   : > { %v9533_v38 = vpop.eup %9532  ;;  %9552 = vtanh.f32 %v13876_v40  ;;  %v13009_v36 = vadd.f32 %v7120_v15, %v6320_v18  ;;  %v13885_v15 = vld [vmem:[#allocation115_spill] sm:$0xff] }
 0x5d5   : > { %v9535_v53 = vpop.eup %9534  ;;  %9554 = vtanh.f32 %v7227_v43  ;;  %7405 = vrot.lane.b32.xlu0 %v9533_v38, %s9737_s25  ;;  %7379 = vrot.lane.b32.xlu1 %v9531_v5, %s9737_s25  ;;  %v13013_v31 = vadd.f32 %v7122_v27, %v6321_v12  ;;  %v13887_v27 = vld [vmem:[#allocation116_spill] sm:$0xff]  ;;  %v13888_v5 = vld [vmem:[#allocation117_spill] sm:$0xff] }
 0x5d6   : > { %v9537_v47 = vpop.eup %9536  ;;  %9556 = vtanh.f32 %v7228_v54  ;;  %v7128_v19 = vpop.permute.xlu1 %7127  ;;  %v6322_v45 = vmul.f32 %v9535_v53, %v13877_v32  ;;  %v13889_v32 = vld [vmem:[#allocation105_spill] sm:$0xff] }
 0x5d7   : > { %v9539_v20 = vpop.eup %9538  ;;  %9558 = vtanh.f32 %v13878_v42  ;;  %v7132_v51 = vpop.permute.xlu0 %7131  ;;  %v6323_v61 = vmul.f32 %v9537_v47, %v13879_v3 }
 0x5d8   : > { %v9541_v34 = vpop.eup %9540  ;;  %9560 = vtanh.f32 %v13880_v29  ;;  %v13020_v43 = vadd.f32 %v7124_v16, %v6322_v45  ;;  %v13890_v29 = vld [vmem:[#allocation111_spill] sm:$0xff] }
 0x5d9   : > { %v9543_v7 = vpop.eup %9542  ;;  %9562 = vtanh.f32 %v13009_v36  ;;  %7399 = vrot.lane.b32.xlu1 %v9539_v20, %s9737_s25  ;;  %7381 = vrot.lane.b32.xlu0 %v9541_v34, %s9737_s25  ;;  %v13025_v57 = vadd.f32 %v7126_v55, %v6323_v61 }
 0x5da   : > { %v9545_v14 = vpop.eup %9544  ;;  %9564 = vtanh.f32 %v13013_v31  ;;  %v7134_v2 = vpop.permute.xlu1 %7133  ;;  %v6324_v44 = vmul.f32 %v9543_v7, %v13882_v0  ;;  %v7827_v0 = vcombine.low %v13013_v31, %v13020_v43 }
 0x5db   : > { %v9547_v28 = vpop.eup %9546  ;;  %9566 = vtanh.f32 %v13881_v4  ;;  %v6326_v54 = vmul.f32 %v9545_v14, %v13883_v58  ;;  %v7136_v63 = vpop.permute.xlu0 %7135  ;;  %v7826_v58 = vcombine.low %v12994_v26, %v13009_v36 }
 0x5dc   : > { %v9549_v33 = vpop.eup %9548  ;;  %9568 = vtanh.f32 %v13884_v35  ;;  %v13032_v41 = vadd.f32 %v7128_v19, %v6324_v44 }
 0x5dd   : > { %v9551_v11 = vpop.eup %9550  ;;  %9570 = vtanh.f32 %v13020_v43  ;;  %7411 = vrot.lane.b32.xlu0 %v9549_v33, %s9737_s25  ;;  %7403 = vrot.lane.b32.xlu1 %v9547_v28, %s9737_s25  ;;  %v13037_v52 = vadd.f32 %v7132_v51, %v6326_v54  ;;  %v7835_v31 = vrot.slane %v7826_v58, %v9996_v48 }
 0x5de   : > { %v9553_v50 = vpop.eup %9552  ;;  %9572 = vtanh.f32 %v13025_v57  ;;  %v7138_v17 = vpop.permute.xlu1 %7137  ;;  %v6327_v24 = vmul.f32 %v9551_v11, %v13885_v15  ;;  %v7828_v44 = vcombine.low %v13025_v57, %v13032_v41  ;;  %v7842_v11 = vrot.slane %v7827_v0, %v9996_v48 }
 0x5df   : > { %v9555_v30 = vpop.eup %9554  ;;  %9574 = vtanh.f32 %v13886_v21  ;;  %v6328_v39 = vmul.f32 %v9553_v50, %v13887_v27  ;;  %v7140_v18 = vpop.permute.xlu0 %7139 }
 0x5e0   : > { %v9557_v10 = vpop.eup %9556  ;;  %9576 = vtanh.f32 %v13032_v41  ;;  %v13043_v56 = vadd.f32 %v7134_v2, %v6327_v24  ;;  %v7857_v41 = vcombine.low %v7835_v31, %v7842_v11 }
 0x5e1   : > { %v9559_v8 = vpop.eup %9558  ;;  %7407 = vrot.lane.b32.xlu1 %v9555_v30, %s9737_s25  ;;  %7409 = vrot.lane.b32.xlu0 %v9557_v10, %s9737_s25  ;;  %9578 = vtanh.f32 %v13037_v52  ;;  %v13048_v9 = vadd.f32 %v7136_v63, %v6328_v39  ;;  %v7849_v63 = vrot.slane %v7828_v44, %v9996_v48  ;;  %v13899_v44 = vld [vmem:[#allocation66_spill] sm:$0xff] }
 0x5e2   : > { %v9561_v22 = vpop.eup %9560  ;;  %v7142_v49 = vpop.permute.xlu1 %7141  ;;  %v6329_v23 = vmul.f32 %v9559_v8, %v13888_v5  ;;  %9580 = vtanh.f32 %v13043_v56  ;;  %v7874_v26 = vcombine.low %v13037_v52, %v13043_v56  ;;  %v7865_v15 = vrot.slane %v7857_v41, %v9996_v48  ;;  %v13902_v41 = vld [vmem:[#allocation76_spill] sm:$0xff] }
 0x5e3   : > { %v9563_v16 = vpop.eup %9562  ;;  %v6330_v55 = vmul.f32 %v9561_v22, %v12675_v37  ;;  %9582 = vtanh.f32 %v13048_v9  ;;  %v7130_v3 = vpop.permute.xlu0 %7129 }
 0x5e4   : > { %v9565_v1 = vpop.eup %9564  ;;  %v7239_v6 = vadd.f32 %v7138_v17, %v6329_v23  ;;  %v7883_v21 = vrot.slane %v7874_v26, %v9996_v48 }
 0x5e5   : > { %v9567_v38 = vpop.eup %9566  ;;  %7415 = vrot.lane.b32.xlu0 %v9565_v1, %s9737_s25  ;;  %7413 = vrot.lane.b32.xlu1 %v9563_v16, %s9737_s25  ;;  %v7240_v40 = vadd.f32 %v7140_v18, %v6330_v55 }
 0x5e6   : > { %v9569_v12 = vpop.eup %9568  ;;  %v7144_v19 = vpop.permute.xlu1 %7143  ;;  %v6332_v45 = vmul.f32 %v9567_v38, %v13889_v32  ;;  %9584 = vtanh.f32 %v7239_v6  ;;  %v7875_v50 = vcombine.low %v13048_v9, %v7239_v6 }
 0x5e7   : > { %v9571_v53 = vpop.eup %9570  ;;  %v6331_v47 = vmul.f32 %v9569_v12, %v12706_v59  ;;  %9586 = vtanh.f32 %v7240_v40 }
 0x5e8   : > { %v9573_v20 = vpop.eup %9572  ;;  %v7242_v51 = vadd.f32 %v7144_v19, %v6332_v45  ;;  %v7890_v24 = vrot.slane %v7875_v50, %v9996_v48  ;;  %v13893_v45 = vld [vmem:[#allocation22_spill] sm:$0xff] }
 0x5e9   : > { %v7241_v37 = vadd.f32 %v7142_v49, %v6331_v47  ;;  %7419 = vrot.lane.b32.xlu0 %v9573_v20, %s9737_s25  ;;  %7417 = vrot.lane.b32.xlu1 %v9571_v53, %s9737_s25  ;;  %v9575_v42 = vpop.eup %9574  ;;  %v13891_v47 = vld [vmem:[#allocation20_spill] sm:$0xff]  ;;  %v13892_v20 = vld [vmem:[#allocation25_spill] sm:$0xff] }
 0x5ea   : > { %v9577_v34 = vpop.eup %9576  ;;  %v6325_v7 = vmul.f32 %v9575_v42, %v13890_v29  ;;  %v7904_v30 = vrot.slane %v7242_v51, %v9996_v48  ;;  %v7905_v39 = vcombine.low %v7883_v21, %v7890_v24 }
 0x5eb   : > { %v9579_v61 = vpop.eup %9578  ;;  %9588 = vtanh.f32 %v7241_v37  ;;  %v7876_v17 = vcombine.low %v7240_v40, %v7241_v37 }
 0x5ec   : > { %v7235_v59 = vadd.f32 %v7130_v3, %v6325_v7  ;;  %9590 = vtanh.f32 %v7242_v51  ;;  %v9581_v14 = vpop.eup %9580  ;;  %v7913_v22 = vrot.slane %v7905_v39, %v9996_v48  ;;  %v13896_v7 = vld [vmem:[#allocation47_spill] sm:$0xff] }
 0x5ed   : > { %7425 = vrot.lane.b32.xlu0 %v9579_v61, %s9737_s25  ;;  %7421 = vrot.lane.b32.xlu1 %v9577_v34, %s9737_s25  ;;  %v9583_v2 = vpop.eup %9582  ;;  %v7897_v10 = vrot.slane %v7876_v17, %v9996_v48  ;;  %v13894_v34 = vld [vmem:[#allocation35_spill] sm:$0xff] }
 0x5ee   : > { %9592 = vtanh.f32 %v7235_v59  ;;  %v7856_v54 = vrot.slane %v7235_v59, %v9996_v48  ;;  %v13895_v61 = vld [vmem:[#allocation31_spill] sm:$0xff] }
 0x5ef   : > { %v7906_v27 = vcombine.low %v7897_v10, %v7904_v30 }
 0x5f0   : > { %v9585_v28 = vpop.eup %9584  ;;  %v7858_v43 = vcombine.low %v7849_v63, %v7856_v54  ;;  %v13900_v63 = vld [vmem:[#allocation28_spill] sm:$0xff] }
 0x5f1   : > { %7429 = vrot.lane.b32.xlu0 %v9583_v2, %s9737_s25  ;;  %7427 = vrot.lane.b32.xlu1 %v9581_v14, %s9737_s25  ;;  %v9587_v4 = vpop.eup %9586  ;;  %v7920_v56 = vrot.slane %v7906_v27, %v9996_v48  ;;  %v13897_v14 = vld [vmem:[#allocation63_spill] sm:$0xff]  ;;  %v13903_v27 = vld [vmem:[#allocation54_spill] sm:$0xff] }
 0x5f2   : > { %v7872_v36 = vrot.slane %v7858_v43, %v9996_v48  ;;  %v13901_v43 = vld [vmem:[#allocation41_spill] sm:$0xff] }
 0x5f3   : > { %v13105_v49 = vcombine.low %v7913_v22, %v7920_v56 }
 0x5f4   : > { %v13095_v52 = vcombine.low %v7865_v15, %v7872_v36 }
 0x5f5   : > { %7433 = vrot.lane.b32.xlu0 %v9587_v4, %s9737_s25  ;;  %7431 = vrot.lane.b32.xlu1 %v9585_v28, %s9737_s25  ;;  %v9589_v33 = vpop.eup %9588  ;;  %v13898_v4 = vld [vmem:[#allocation23_spill] sm:$0xff] }
 0x5f6   : > { %v9591_v35 = vpop.eup %9590 }
 0x5f8   : > { %v9593_v57 = vpop.eup %9592 }
 0x5f9   : > { %7435 = vrot.lane.b32.xlu1 %v9589_v33, %s9737_s25  ;;  %7437 = vrot.lane.b32.xlu0 %v9591_v35, %s9737_s25 }
 0x5fd   : > { %7423 = vrot.lane.b32.xlu1 %v9593_v57, %s9737_s25  ;;  %7924 = vrot.lane.b32.xlu0 %v12979_v25, %s9739_s19 }
 0x601   : > { %7922 = vrot.lane.b32.xlu1 %v12881_v13, %s9739_s19  ;;  %7928 = vrot.lane.b32.xlu0 %v12930_v62, %s9739_s19 }
 0x605   : > { %7926 = vrot.lane.b32.xlu1 %v12976_v60, %s9739_s19  ;;  %7932 = vrot.lane.b32.xlu0 %v13095_v52, %s9739_s19 }
 0x606   : > { %v7342_v8 = vpop.permute.xlu0 %7341 }
 0x607   : > { %v7488_v29 = vmul.f32 %v13895_v61, %v7342_v8  ;;  %v13904_v8 = vld [vmem:[#allocation64_spill] sm:$0xff] }
 0x609   : > { %7930 = vrot.lane.b32.xlu1 %v13005_v46, %s9739_s19 }
 0x60a   : > { %v7384_v9 = vpop.permute.xlu0 %7383 }
 0x60b   : > { %v7344_v23 = vpop.permute.xlu1 %7343  ;;  %v7509_v33 = vmul.f32 %v13899_v44, %v7384_v9  ;;  %v13909_v44 = vld [vmem:[#allocation44_spill] sm:$0xff] }
 0x60c   : > { %v7489_v32 = vmul.f32 %v13892_v20, %v7344_v23 }
 0x60d   : > { %7934 = vrot.lane.b32.xlu1 %v13105_v49, %s9739_s19 }
 0x60e   : > { %v7346_v16 = vpop.permute.xlu0 %7345  ;;  %v7999_v58 = vcombine.low %v7488_v29, %v7489_v32  ;;  %v13907_v29 = vld [vmem:[#allocation33_spill] sm:$0xff] }
 0x60f   : > { %v7490_v37 = vmul.f32 %v13893_v45, %v7346_v16  ;;  %v13905_v45 = vld [vmem:[#allocation79_spill] sm:$0xff] }
 0x610   : > { %v8008_v15 = vrot.slane %v7999_v58, %v9996_v48 }
 0x612   : > { %v7350_v5 = vpop.permute.xlu0 %7349  ;;  %v7386_v1 = vpop.permute.xlu1 %7385 }
 0x613   : > { %v7510_v59 = vmul.f32 %v13896_v7, %v7386_v1  ;;  %v7492_v31 = vmul.f32 %v13900_v63, %v7350_v5 }
 0x615   : > { %v8143_v17 = vcombine.low %v7509_v33, %v7510_v59 }
 0x616   : > { %v7356_v18 = vpop.permute.xlu0 %7355 }
 0x617   : > { %v8152_v22 = vrot.slane %v8143_v17, %v9996_v48 }
 0x61a   : > { %v7388_v55 = vpop.permute.xlu0 %7387 }
 0x61b   : > { %v7348_v38 = vpop.permute.xlu1 %7347  ;;  %v7511_v2 = vmul.f32 %v13897_v14, %v7388_v55 }
 0x61c   : > { %v7491_v19 = vmul.f32 %v13891_v47, %v7348_v38 }
 0x61e   : > { %v7392_v6 = vpop.permute.xlu0 %7391  ;;  %v8000_v28 = vcombine.low %v7490_v37, %v7491_v19 }
 0x61f   : > { %v7352_v12 = vpop.permute.xlu1 %7351  ;;  %v7513_v57 = vmul.f32 %v13901_v43, %v7392_v6 }
 0x620   : > { %v7493_v0 = vmul.f32 %v13898_v4, %v7352_v12  ;;  %v8015_v26 = vrot.slane %v8000_v28, %v9996_v48  ;;  %v13908_v28 = vld [vmem:[#allocation80_spill] sm:$0xff] }
 0x621   : > { %v7495_v4 = vmul.f32 %v13908_v28, %v7356_v18 }
 0x622   : > { %v8001_v36 = vcombine.low %v7492_v31, %v7493_v0  ;;  %v8030_v9 = vcombine.low %v8008_v15, %v8015_v26  ;;  %v13912_v15 = vld [vmem:[#allocation52_spill] sm:$0xff] }
 0x623   : > { %v7360_v40 = vpop.permute.xlu0 %7359  ;;  %v7358_v53 = vpop.permute.xlu1 %7357 }
 0x624   : > { %v8022_v16 = vrot.slane %v8001_v36, %v9996_v48  ;;  %v8038_v19 = vrot.slane %v8030_v9, %v9996_v48  ;;  %v7496_v7 = vmul.f32 %v13907_v29, %v7358_v53  ;;  %v13919_v29 = vld [vmem:[#allocation70_spill] sm:$0xff] }
 0x627   : > { %v7364_v42 = vpop.permute.xlu0 %7363  ;;  %v7390_v51 = vpop.permute.xlu1 %7389 }
 0x628   : > { %v7512_v3 = vmul.f32 %v13894_v34, %v7390_v51 }
 0x62a   : > { %v8144_v54 = vcombine.low %v7511_v2, %v7512_v3  ;;  %v13906_v3 = vld [vmem:[#allocation77_spill] sm:$0xff] }
 0x62b   : > { %v7370_v35 = vpop.permute.xlu0 %7369  ;;  %v7394_v11 = vpop.permute.xlu1 %7393  ;;  %v7497_v61 = vmul.f32 %v13906_v3, %v7360_v40 }
 0x62c   : > { %v7514_v50 = vmul.f32 %v13902_v41, %v7394_v11  ;;  %v8159_v24 = vrot.slane %v8144_v54, %v9996_v48  ;;  %v8047_v54 = vcombine.low %v7495_v4, %v7496_v7  ;;  %v13910_v11 = vld [vmem:[#allocation68_spill] sm:$0xff]  ;;  %v13911_v41 = vld [vmem:[#allocation69_spill] sm:$0xff] }
 0x62d   : > { %v7499_v63 = vmul.f32 %v13910_v11, %v7364_v42  ;;  %v13921_v4 = vld [vmem:[#allocation73_spill] sm:$0xff] }
 0x62e   : > { %v8145_v30 = vcombine.low %v7513_v57, %v7514_v50  ;;  %v8174_v55 = vcombine.low %v8152_v22, %v8159_v24  ;;  %v8056_v57 = vrot.slane %v8047_v54, %v9996_v48 }
 0x62f   : > { %v7354_v10 = vpop.permute.xlu0 %7353  ;;  %v7396_v21 = vpop.permute.xlu1 %7395 }
 0x630   : > { %v7494_v39 = vmul.f32 %v13903_v27, %v7354_v10  ;;  %v7515_v56 = vmul.f32 %v13904_v8, %v7396_v21  ;;  %v8166_v5 = vrot.slane %v8145_v30, %v9996_v48  ;;  %v8182_v51 = vrot.slane %v8174_v55, %v9996_v48  ;;  %v13913_v10 = vld [vmem:[#allocation87_spill] sm:$0xff]  ;;  %v13914_v27 = vld [vmem:[#allocation65_spill] sm:$0xff] }
 0x631   : > { %v13915_v8 = vld [vmem:[#allocation85_spill] sm:$0xff] }
 0x632   : > { %v8029_v23 = vrot.slane %v7494_v39, %v9996_v48  ;;  %v8173_v1 = vrot.slane %v7515_v56, %v9996_v48  ;;  %v7502_v56 = vmul.f32 %v13915_v8, %v7370_v35 }
 0x633   : > { %v7374_v38 = vpop.permute.xlu0 %7373  ;;  %v7362_v6 = vpop.permute.xlu1 %7361 }
 0x634   : > { %v8031_v12 = vcombine.low %v8022_v16, %v8029_v23  ;;  %v8175_v47 = vcombine.low %v8166_v5, %v8173_v1  ;;  %v7498_v37 = vmul.f32 %v13905_v45, %v7362_v6  ;;  %v7504_v24 = vmul.f32 %v13912_v15, %v7374_v38  ;;  %v13916_v1 = vld [vmem:[#allocation32_spill] sm:$0xff] }
 0x636   : > { %v8045_v20 = vrot.slane %v8031_v12, %v9996_v48  ;;  %v8189_v32 = vrot.slane %v8175_v47, %v9996_v48  ;;  %v8048_v0 = vcombine.low %v7497_v61, %v7498_v37  ;;  %v13917_v12 = vld [vmem:[#allocation39_spill] sm:$0xff]  ;;  %v13918_v37 = vld [vmem:[#allocation18_spill] sm:$0xff] }
 0x637   : > { %v7366_v34 = vpop.permute.xlu1 %7365  ;;  %v7378_v14 = vpop.permute.xlu0 %7377 }
 0x638   : > { %v8046_v59 = vcombine.low %v8038_v19, %v8045_v20  ;;  %v8190_v2 = vcombine.low %v8182_v51, %v8189_v32  ;;  %v7500_v33 = vmul.f32 %v13909_v44, %v7366_v34  ;;  %v8063_v40 = vrot.slane %v8048_v0, %v9996_v48 }
 0x639   : > { %v7506_v55 = vmul.f32 %v13916_v1, %v7378_v14 }
 0x63a   : > { %8335 = vrot.lane.b32.xlu0 %v8046_v59, %s9737_s25  ;;  %8341 = vrot.lane.b32.xlu1 %v8190_v2, %s9737_s25  ;;  %v8049_v31 = vcombine.low %v7499_v63, %v7500_v33  ;;  %v8078_v50 = vcombine.low %v8056_v57, %v8063_v40  ;;  %v13920_v2 = vld [vmem:[#allocation61_spill] sm:$0xff]  ;;  %v13922_v33 = vld [vmem:[#allocation84_spill] sm:$0xff] }
 0x63b   : > { %v7372_v58 = vpop.permute.xlu1 %7371  ;;  %v7398_v53 = vpop.permute.xlu0 %7397 }
 0x63c   : > { %v8070_v17 = vrot.slane %v8049_v31, %v9996_v48  ;;  %v7503_v42 = vmul.f32 %v13913_v10, %v7372_v58  ;;  %v8086_v22 = vrot.slane %v8078_v50, %v9996_v48  ;;  %v7516_v28 = vmul.f32 %v13920_v2, %v7398_v53  ;;  %v13923_v31 = vld [vmem:[#allocation89_spill] sm:$0xff]  ;;  %v13924_v50 = vld [vmem:[#allocation91_spill] sm:$0xff]  ;;  %v13925_v53 = vld [vmem:[#allocation90_spill] sm:$0xff] }
 0x63e   : > { %v8095_v6 = vcombine.low %v7502_v56, %v7503_v42 }
 0x63f   : > { %v7368_v43 = vpop.permute.xlu1 %7367 }
 0x640   : > { %v7501_v18 = vmul.f32 %v13911_v41, %v7368_v43  ;;  %v8104_v45 = vrot.slane %v8095_v6, %v9996_v48  ;;  %v13926_v6 = vld [vmem:[#allocation97_spill] sm:$0xff] }
 0x642   : > { %v8077_v26 = vrot.slane %v7501_v18, %v9996_v48 }
 0x643   : > { %v7402_v36 = vpop.permute.xlu0 %7401  ;;  %v7376_v30 = vpop.permute.xlu1 %7375 }
 0x644   : > { %v8079_v21 = vcombine.low %v8070_v17, %v8077_v26  ;;  %v7505_v39 = vmul.f32 %v13914_v27, %v7376_v30  ;;  %v7518_v0 = vmul.f32 %v13921_v4, %v7402_v36  ;;  %v13934_v4 = vld [vmem:[#allocation95_spill] sm:$0xff] }
 0x646   : > { %v8093_v9 = vrot.slane %v8079_v21, %v9996_v48  ;;  %v8096_v16 = vcombine.low %v7504_v24, %v7505_v39 }
 0x647   : > { %v7406_v5 = vpop.permute.xlu0 %7405  ;;  %v7380_v23 = vpop.permute.xlu1 %7379 }
 0x648   : > { %v7507_v47 = vmul.f32 %v13917_v12, %v7380_v23  ;;  %v8094_v38 = vcombine.low %v8086_v22, %v8093_v9  ;;  %v8111_v19 = vrot.slane %v8096_v16, %v9996_v48  ;;  %v7520_v43 = vmul.f32 %v13923_v31, %v7406_v5  ;;  %v13936_v31 = vld [vmem:[#allocation104_spill] sm:$0xff] }
 0x64a   : > { %v8097_v20 = vcombine.low %v7506_v55, %v7507_v47  ;;  %8337 = vrot.lane.b32.xlu1 %v8094_v38, %s9737_s25  ;;  %v8126_v34 = vcombine.low %v8104_v45, %v8111_v19  ;;  %v13927_v47 = vld [vmem:[#allocation100_spill] sm:$0xff]  ;;  %v13928_v19 = vld [vmem:[#allocation93_spill] sm:$0xff]  ;;  %v13929_v45 = vld [vmem:[#allocation94_spill] sm:$0xff] }
 0x64b   : > { %v7382_v32 = vpop.permute.xlu0 %7381  ;;  %v7400_v35 = vpop.permute.xlu1 %7399 }
 0x64c   : > { %v7508_v51 = vmul.f32 %v13918_v37, %v7382_v32  ;;  %v8118_v3 = vrot.slane %v8097_v20, %v9996_v48  ;;  %v7517_v7 = vmul.f32 %v13919_v29, %v7400_v35  ;;  %v8134_v54 = vrot.slane %v8126_v34, %v9996_v48  ;;  %v13932_v29 = vld [vmem:[#allocation103_spill] sm:$0xff] }
 0x64e   : > { %v8125_v61 = vrot.slane %v7508_v51, %v9996_v48  ;;  %v8191_v63 = vcombine.low %v7516_v28, %v7517_v7  ;;  %v13930_v51 = vld [vmem:[#allocation99_spill] sm:$0xff] }
 0x64f   : > { %v7412_v59 = vpop.permute.xlu0 %7411  ;;  %v7404_v14 = vpop.permute.xlu1 %7403 }
 0x650   : > { %v8127_v44 = vcombine.low %v8118_v3, %v8125_v61  ;;  %v7519_v58 = vmul.f32 %v13922_v33, %v7404_v14  ;;  %v8200_v30 = vrot.slane %v8191_v63, %v9996_v48  ;;  %v13931_v3 = vld [vmem:[#allocation101_spill] sm:$0xff]  ;;  %v13933_v14 = vld [vmem:[#allocation92_spill] sm:$0xff] }
 0x651   : > { %v7523_v2 = vmul.f32 %v13933_v14, %v7412_v59  ;;  %v8375_v14 = vsel (!%p8847_p1), %vm8374_vm7, %v12881_v13, 0.0  ;;  %v8380_v13 = vsel (!%p8847_p1), %vm8374_vm7, %v12930_v62, 0.0 }
 0x652   : > { %v8141_v11 = vrot.slane %v8127_v44, %v9996_v48  ;;  %v8192_v40 = vcombine.low %v7518_v0, %v7519_v58 }
 0x653   : > { %v7410_v57 = vpop.permute.xlu0 %7409  ;;  %v7408_v41 = vpop.permute.xlu1 %7407 }
 0x654   : > { %v8207_v18 = vrot.slane %v8192_v40, %v9996_v48  ;;  %v7522_v17 = vmul.f32 %v13924_v50, %v7410_v57  ;;  %v7521_v26 = vmul.f32 %v13925_v53, %v7408_v41  ;;  %v8142_v36 = vcombine.low %v8134_v54, %v8141_v11  ;;  %v13935_v54 = vld [vmem:[#allocation98_spill] sm:$0xff]  ;;  %v13937_v41 = vld [vmem:[#allocation88_spill] sm:$0xff] }
 0x655   : > { %v13938_v50 = vld [vmem:[#allocation102_spill] sm:$0xff] }
 0x656   : > { %v8193_v15 = vcombine.low %v7520_v43, %v7521_v26  ;;  %8339 = vrot.lane.b32.xlu0 %v8142_v36, %s9737_s25  ;;  %v8222_v42 = vcombine.low %v8200_v30, %v8207_v18  ;;  %v8221_v21 = vrot.slane %v7522_v17, %v9996_v48 }
 0x657   : > { %v7416_v24 = vpop.permute.xlu0 %7415  ;;  %v7414_v10 = vpop.permute.xlu1 %7413 }
 0x658   : > { %v8214_v27 = vrot.slane %v8193_v15, %v9996_v48  ;;  %v8230_v22 = vrot.slane %v8222_v42, %v9996_v48  ;;  %v7524_v20 = vmul.f32 %v13928_v19, %v7414_v10  ;;  %v7525_v37 = vmul.f32 %v13929_v45, %v7416_v24 }
 0x65a   : > { %v8223_v39 = vcombine.low %v8214_v27, %v8221_v21  ;;  %v8239_v58 = vcombine.low %v7523_v2, %v7524_v20  ;;  %v13939_v27 = vld [vmem:[#allocation96_spill] sm:$0xff]  ;;  %v8376_v2 = vsel (!%p8847_p1), %vm8374_vm7, %v12979_v25, 0.0  ;;  %v8382_v25 = vsel (!%p8847_p1), %vm8374_vm7, %v13005_v46, 0.0 }
 0x65b   : > { %v7420_v8 = vpop.permute.xlu0 %7419  ;;  %v7418_v56 = vpop.permute.xlu1 %7417 }
 0x65c   : > { %v8237_v9 = vrot.slane %v8223_v39, %v9996_v48  ;;  %v7526_v12 = vmul.f32 %v13926_v6, %v7418_v56  ;;  %v7527_v11 = vmul.f32 %v13935_v54, %v7420_v8  ;;  %v8248_v30 = vrot.slane %v8239_v58, %v9996_v48 }
 0x65e   : > { %v8238_v16 = vcombine.low %v8230_v22, %v8237_v9  ;;  %v8240_v28 = vcombine.low %v7525_v37, %v7526_v12 }
 0x65f   : > { %v7426_v5 = vpop.permute.xlu0 %7425  ;;  %v7422_v23 = vpop.permute.xlu1 %7421 }
 0x660   : > { %8343 = vrot.lane.b32.xlu0 %v8238_v16, %s9737_s25  ;;  %v7530_v34 = vmul.f32 %v13930_v51, %v7426_v5  ;;  %v7528_v0 = vmul.f32 %v13934_v4, %v7422_v23  ;;  %v8255_v59 = vrot.slane %v8240_v28, %v9996_v48  ;;  %v8378_v28 = vsel (!%p8847_p1), %vm8374_vm7, %v12976_v60, 0.0 }
 0x661   : > { %v9740_v4 = vmov (!%p8847_p1), 0.0|0.0  }
 0x662   : > { %v8241_v53 = vcombine.low %v7527_v11, %v7528_v0  ;;  %v8270_v8 = vcombine.low %v8248_v30, %v8255_v59  ;;  %9039 = vmatprep.subr.bf16.mxu0 (!%p8847_p1), %v9740_v4  ;;  %v8377_v0 = vadd.f32 (!%p8847_p1), %v8376_v2, %v8375_v14 }
 0x663   : > { %v7430_v1 = vpop.permute.xlu0 %7429  ;;  %v7428_v55 = vpop.permute.xlu1 %7427 }
 0x664   : > { %v7531_v38 = vmul.f32 %v13927_v47, %v7428_v55  ;;  %v7532_v61 = vmul.f32 %v13931_v3, %v7430_v1  ;;  %v8262_v56 = vrot.slane %v8241_v53, %v9996_v48  ;;  %v8278_v6 = vrot.slane %v8270_v8, %v9996_v48 }
 0x665   : > { %v8379_v54 = vadd.f32 (!%p8847_p1), %v8378_v28, %v8377_v0 }
 0x666   : > { %v8287_v44 = vcombine.low %v7530_v34, %v7531_v38 }
 0x667   : > { %v7434_v32 = vpop.permute.xlu0 %7433  ;;  %v7432_v35 = vpop.permute.xlu1 %7431  ;;  %v8381_v11 = vadd.f32 (!%p8847_p1), %v8380_v13, %v8379_v54 }
 0x668   : > { %v7533_v7 = vmul.f32 %v13932_v29, %v7432_v35  ;;  %v7534_v43 = vmul.f32 %v13936_v31, %v7434_v32  ;;  %v8296_v26 = vrot.slane %v8287_v44, %v9996_v48  ;;  %v8395_v29 = vld [vmem:[%s13348_s8] sm:$0xff] (!%p8847_p1)  ;;  %v8397_v44 = vld [vmem:[%s13348_s8 + $0x10] sm:$0xff] (!%p8847_p1)  ;;  %v8386_v31 = vsel (!%p8847_p1), %vm8374_vm7, %v13105_v49, 0.0 }
 0x669   : > { %v8399_v49 = vld [vmem:[%s13349_s9] sm:$0x1] (!%p8847_p1) }
 0x66a   : > { %v8288_v33 = vcombine.low %v7532_v61, %v7533_v7  ;;  %v8396_v7 = vld [vmem:[%s13348_s8 + $0x8] sm:$0xff] (!%p8847_p1) }
 0x66b   : > { %v7438_v63 = vpop.permute.xlu0 %7437  ;;  %v7436_v40 = vpop.permute.xlu1 %7435  ;;  %v9040_v58 = vpack.c.bf16 (!%p8847_p1), %v8396_v7, %v8395_v29 }
 0x66c   : > { %v8303_v57 = vrot.slane %v8288_v33, %v9996_v48  ;;  %v7536_v18 = vmul.f32 %v13937_v41, %v7438_v63  ;;  %v7535_v17 = vmul.f32 %v13938_v50, %v7436_v40  ;;  %v8398_v33 = vld [vmem:[%s13348_s8 + $0x18] sm:$0xff] (!%p8847_p1)  ;;  %v8384_v63 = vsel (!%p8847_p1), %vm8374_vm7, %v13095_v52, 0.0 }
 0x66d   : > { %9041 = vmatpush3.bf16.msra.mxu0 (!%p8847_p1), %v9040_v58  ;;  %v9043_v60 = vpack.c.bf16 (!%p8847_p1), %v8398_v33, %v8397_v44  ;;  %v8383_v40 = vadd.f32 (!%p8847_p1), %v8382_v25, %v8381_v11  ;;  %v9742_v41 = vmov (!%p8847_p1), 0.0  }
 0x66e   : > { %v8289_v36 = vcombine.low %v7534_v43, %v7535_v17  ;;  %v8318_v10 = vcombine.low %v8296_v26, %v8303_v57  ;;  %v8317_v42 = vrot.slane %v7536_v18, %v9996_v48  ;;  %9042 = vmatprep.subr.bf16.mxu0 (!%p8847_p1), %v9740_v4 }
 0x66f   : > { %v7925_v15 = vpop.permute.xlu0 %7924  ;;  %v7424_v24 = vpop.permute.xlu1 %7423  ;;  %v8385_v43 = vadd.f32 (!%p8847_p1), %v8384_v63, %v8383_v40 }
 0x670   : > { %v8310_v21 = vrot.slane %v8289_v36, %v9996_v48  ;;  %7944 = vst.msk [vmem:[#allocation3 + $0x8] sm:$0x7f] %vm514_vm5, %v7925_v15  ;;  %v7529_v39 = vmul.f32 %v13939_v27, %v7424_v24  ;;  %v8326_v23 = vrot.slane %v8318_v10, %v9996_v48 }
 0x671   : > { %9044 = vmatpush3.bf16.msra.mxu0 (!%p8847_p1), %v9043_v60  ;;  %v8387_v62 = vadd.f32 (!%p8847_p1), %v8386_v31, %v8385_v43 }
 0x672   : > { %v8319_v22 = vcombine.low %v8310_v21, %v8317_v42  ;;  %v8269_v9 = vrot.slane %v7529_v39, %v9996_v48 }
 0x673   : > { %v7929_v16 = vpop.permute.xlu0 %7928  ;;  %v7923_v5 = vpop.permute.xlu1 %7922  ;;  %v8388_v57 = vrot.slane (!%p8847_p1), %v8387_v62, 4 }
 0x674   : > { %v8333_v1 = vrot.slane %v8319_v22, %v9996_v48  ;;  %v8271_v55 = vcombine.low %v8262_v56, %v8269_v9  ;;  %7946 = vst.msk [vmem:[#allocation3 + $0x18] sm:$0x7f] %vm514_vm5, %v7929_v16  ;;  %7943 = vst.msk [vmem:[#allocation3] sm:$0x7f] %vm514_vm5, %v7923_v5 }
 0x675   : > { %v8389_v46 = vadd.f32 (!%p8847_p1), %v8388_v57, %v8387_v62 }
 0x676   : > { %v8285_v12 = vrot.slane %v8271_v55, %v9996_v48  ;;  %v8334_v47 = vcombine.low %v8326_v23, %v8333_v1 }
 0x677   : > { %v7933_v38 = vpop.permute.xlu0 %7932  ;;  %v7927_v19 = vpop.permute.xlu1 %7926  ;;  %v8390_v18 = vrot.slane (!%p8847_p1), %v8389_v46, 2 }
 0x678   : > { %7948 = vst.msk [vmem:[#allocation3 + $0x28] sm:$0x7f] %vm514_vm5, %v7933_v38  ;;  %7945 = vst.msk [vmem:[#allocation3 + $0x10] sm:$0x7f] %vm514_vm5, %v7927_v19  ;;  %8347 = vrot.lane.b32.xlu0 %v8334_v47, %s9737_s25  ;;  %v8286_v20 = vcombine.low %v8278_v6, %v8285_v12 }
 0x679   : > { %v8391_v50 = vadd.f32 (!%p8847_p1), %v8390_v18, %v8389_v46 }
 0x67a   : > { %8345 = vrot.lane.b32.xlu1 %v8286_v20, %s9737_s25  ;;  %s13941_s25 = scalar_lea.vmem (!%p8847_p1), [#allocation5], %s9876_s15 }
 0x67b   : > { %v7931_v32 = vpop.permute.xlu1 %7930  ;;  %v8392_v17 = vrot.slane (!%p8847_p1), %v8391_v50, 1 }
 0x67c   : > { %7947 = vst.msk [vmem:[#allocation3 + $0x20] sm:$0x7f] %vm514_vm5, %v7931_v32 }
 0x67d   : > { %v8393_v59 = vadd.f32 (!%p8847_p1), %v8392_v17, %v8391_v50 }
 0x67f   : > { %v7935_v35 = vpop.permute.xlu1 %7934  ;;  %v8394_v53 = vmul.f32 (!%p8847_p1), 0.020408163, %v8393_v59 }
 0x680   : > { %7949 = vst.msk [vmem:[#allocation3 + $0x30] sm:$0x7f] %vm514_vm5, %v7935_v35 }
 0x681   : > { %8401 = vrot.lane.b32.xlu0 (!%p8847_p1), %v8394_v53, %s9743_s23 }
 0x6ac   : > { %v8336_v45 = vpop.permute.xlu0 %8335  ;;  %v8342_v48 = vpop.permute.xlu1 %8341 }
 0x6ad   : > { %8356 = vst.msk [vmem:[#allocation2 + $0x11] sm:$0x7f] %vm514_vm5, %v8336_v45  ;;  %8359 = vst.msk [vmem:[#allocation2 + $0x41] sm:$0x7f] %vm514_vm5, %v8342_v48 }
 0x6bc   : > { %v8338_v37 = vpop.permute.xlu1 %8337 }
 0x6bd   : > { %8357 = vst.msk [vmem:[#allocation2 + $0x21] sm:$0x7f] %vm514_vm5, %v8338_v37 }
 0x6c8   : > { %v8340_v51 = vpop.permute.xlu0 %8339 }
 0x6c9   : > { %8358 = vst.msk [vmem:[#allocation2 + $0x31] sm:$0x7f] %vm514_vm5, %v8340_v51 }
 0x6d2   : > { %v8344_v34 = vpop.permute.xlu0 %8343 }
 0x6d3   : > { %8360 = vst.msk [vmem:[#allocation2 + $0x51] sm:$0x7f] %vm514_vm5, %v8344_v34 }
 0x6e7   : > { %8366 = sbr.rel (%p8847_p1) target bundleno = 1995 (0x7cb), region = 68 }
 0x6ea   : > { %v8348_v3 = vpop.permute.xlu0 %8347 }
 0x6eb   : > { %8362 = vst.msk [vmem:[#allocation2 + $0x71] sm:$0x7f] %vm514_vm5, %v8348_v3 }
 0x6ec   : > { %v8346_v61 = vpop.permute.xlu1 %8345 }
 0x6ed   : > { %8361 = vst.msk [vmem:[#allocation2 + $0x61] sm:$0x7f] %vm514_vm5, %v8346_v61  ;;  %vm9741_vm5 = vmmov (!%p8847_p1), 0  }
 0x6ee   : > { %9018 = vmatprep.mubr.msk.f32.mxu0 %vm9741_vm5, %v9742_v41 }
 0x6f3   : > { %v8402_v52 = vpop.permute.xlu0 %8401 }
 0x6f4   : > { %8477 = vst.msk [vmem:[%s13940_s27] sm:$0x1] %vm1285_vm0, %v8402_v52  ;;  %9019 = vmatmul.mubr.msk.f32.vlgmr.msra.gmra.mrb[0].mxu0 %vm572_vm6, %v8402_v52 }
 0x7c7   : > { %v8471_v26 = vpop.f32.mrb[0].mxu0 }
 0x7c8   : > { %v8472_v36 = vadd.f32 %v8471_v26, %v8399_v49  ;;  %v9020_v30 = vpop.f32.mrb[1].mxu0 }
 0x7ca   : > { %8478 = vst [vmem:[%s13941_s25] sm:$0x1] %v8472_v36 }
 0x7cb PF: > { %s8849_s19 = sshll.u32 %s9716_s21, 4  ;;  %s13942_s12 = scalar_lea.vmem [#allocation5], %s9876_s15 }
 0x7cc   : > { %s13263_s20 = scalar_lea.hbm %s13350_s10, %s8849_s19  ;;  %s8496_s26 = sshll.u32 %s13942_s12, 4  ;;  %s8497_s26 = int_to_ptr.vmem [resolvable:$true] %s8496_s26 }
 0x7cd   : > { %s8480_s13 = scalar_lea.sflag [#allocation6], %s9876_s15  ;;  %s9602_s23 = scalar_lea.vmem %s8497_s26, 16 }
 0x7ce   : > { %p9603_p2 = scmp.ne.s32.totalorder %s8497_s26, %s9602_s23  ;;  %s9744_s27 = smov [#allocation5]  }
 0x7cf   : > { %s9606_s28 = sshll.u32 %s9744_s27, 4  ;;  %s9607_s28 = int_to_ptr.vmem [resolvable:$false] %s9606_s28 }
 0x7d0   : > { %p9604_p4 = pnand %p9603_p2, %p9855_p3  ;;  %s9608_s16 = scalar_lea.vmem %s9607_s28, 32 }
 0x7d1   : > { %p9609_p6 = scmp.lt.s32.totalorder %s8497_s26, %s9607_s28  ;;  %p9610_p7 = scmp.lt.s32.totalorder %s9608_s16, %s9602_s23 }
 0x7d2   : > { %p9605_p5 = pneg %p9604_p4 }
 0x7d3   : > { %p9611_p8 = por %p9610_p7, %p9609_p6 }
 0x7d5   : > { %p9612_p10 = pnand %p9611_p8, %p9605_p5 }
 0x7d7   : > { %9615 = shalt.err (!%p9612_p10)
}
 0x7d8   : > { %s9616_s25 = scalar_lea.hbm %s13263_s20, 16  ;;  %s9620_s12 = scalar_lea.hbm %s13350_s10, 32 }
 0x7d9   : > { %p9617_p11 = scmp.ne.s32.totalorder %s13263_s20, %s9616_s25  ;;  %p9621_p0 = scmp.lt.u32.totalorder %s13263_s20, %s13350_s10 }
 0x7da   : > { %p9622_p1 = scmp.lt.u32.totalorder %s9620_s12, %s9616_s25  ;;  %p9624_p4 = scmp.lt.u32.totalorder %s9616_s25, %s13263_s20 }
 0x7db   : > { %p9618_p12 = pnand %p9617_p11, %p9855_p3 }
 0x7dc   : > { %p9623_p2 = por %p9622_p1, %p9621_p0 }
 0x7dd   : > { %p9619_p13 = pneg %p9618_p12 }
 0x7de   : > { %p9625_p5 = por %p9624_p4, %p9623_p2 }
 0x7e0   : > { %p9626_p6 = pnand %p9625_p5, %p9619_p13 }
 0x7e2   : > { %9629 = shalt.err (!%p9626_p6)
}
 0x7e3   : > { %9047 = dma.vmem_to_hbm [thread:$0]  (%p9855_p3), %s8497_s26, 16, %s13263_s20, %s8480_s13  }
 0x7e4   : > { %s13290_s22 = scalar_lea.hbm %s13351_s11, %s8849_s19  ;;  %s13943_s14 = scalar_lea.vmem [#allocation7], %s9876_s15 }
 0x7e5   : > { %s8509_s12 = sshll.u32 %s13943_s14, 4  ;;  %s8484_s25 = scalar_lea.sflag [#allocation8], %s9876_s15  ;;  %s8510_s12 = int_to_ptr.vmem [resolvable:$true] %s8509_s12 }
 0x7e6   : > { %s9630_s27 = scalar_lea.vmem %s8510_s12, 16  ;;  %s9745_s28 = smov [#allocation7]  }
 0x7e7   : > { %p9631_p7 = scmp.ne.s32.totalorder %s8510_s12, %s9630_s27  ;;  %s9634_s0 = sshll.u32 %s9745_s28, 4  ;;  %s9635_s0 = int_to_ptr.vmem [resolvable:$false] %s9634_s0 }
 0x7e8   : > { %s9636_s1 = scalar_lea.vmem %s9635_s0, 32  ;;  %p9637_p11 = scmp.lt.s32.totalorder %s8510_s12, %s9635_s0 }
 0x7e9   : > { %p9632_p8 = pnand %p9631_p7, %p9855_p3  ;;  %p9638_p12 = scmp.lt.s32.totalorder %s9636_s1, %s9630_s27 }
 0x7eb   : > { %p9633_p10 = pneg %p9632_p8  ;;  %p9639_p13 = por %p9638_p12, %p9637_p11 }
 0x7ed   : > { %p9640_p0 = pnand %p9639_p13, %p9633_p10 }
 0x7ef   : > { %9643 = shalt.err (!%p9640_p0)
}
 0x7f0   : > { %s9644_s21 = scalar_lea.hbm %s13290_s22, 16  ;;  %s9648_s20 = scalar_lea.hbm %s13351_s11, 32 }
 0x7f1   : > { %p9645_p1 = scmp.ne.s32.totalorder %s13290_s22, %s9644_s21  ;;  %p9649_p5 = scmp.lt.u32.totalorder %s13290_s22, %s13351_s11 }
 0x7f2   : > { %p9650_p6 = scmp.lt.u32.totalorder %s9648_s20, %s9644_s21  ;;  %p9652_p8 = scmp.lt.u32.totalorder %s9644_s21, %s13290_s22 }
 0x7f3   : > { %p9646_p2 = pnand %p9645_p1, %p9855_p3 }
 0x7f4   : > { %p9651_p7 = por %p9650_p6, %p9649_p5 }
 0x7f5   : > { %p9647_p4 = pneg %p9646_p2 }
 0x7f6   : > { %p9653_p10 = por %p9652_p8, %p9651_p7 }
 0x7f8   : > { %p9654_p11 = pnand %p9653_p10, %p9647_p4 }
 0x7fa   : > { %9657 = shalt.err (!%p9654_p11)
}
 0x7fb   : > { %9048 = dma.vmem_to_hbm [thread:$0]  (%p9855_p3), %s8510_s12, 16, %s13290_s22, %s8484_s25  }
 0x7fc PF: > { %p9058_p12 = scmp.ge.s32.totalorder %s9728_s24, 2  ;;  %s8521_s1 = sand.u32 1, %s9700_s17  }
 0x7fd   : > { %s8522_s13 = scalar_lea.sflag [#allocation6], %s8521_s1 }
 0x7fe   : > { %p9052_p13 = pnand %p9058_p12, %p9865_p9 }
 0x800   : > { %9691 = dma.done.wait (!%p9052_p13), %s8522_s13, 16  }
 0x801   : > { %9693 = vsyncadd (!%p9052_p13), %s8522_s13, 4294967280  ;;  %s8530_s23 = scalar_lea.sflag [#allocation8], %s8521_s1 }
 0x802   : > { %9695 = dma.done.wait (!%p9052_p13), %s8530_s23, 16  }
 0x803   : > { %9697 = vsyncadd (!%p9052_p13), %s8530_s23, 4294967280  ;;  %s28_s24 = sadd.s32 1, %s9728_s24   ;;  %s13944_s29 = sld [smem:[#allocation11_spill]] }
 0x804   : > { %p25_p0 = scmp.ge.s32.totalorder %s28_s24, 10   ;;  %s13945_s19 = sld [smem:[#allocation16_spill]] }
 0x805   : > { %s13946_s20 = sld [smem:[#allocation12_spill]]  ;;  %s13947_s21 = sld [smem:[#allocation13_spill]] }
 0x806   : > { %s13948_s22 = sld [smem:[#allocation14_spill]]  ;;  %s13949_s23 = sld [smem:[#allocation15_spill]] }
 0x807   : > { %s13950_s17 = smov %s9704_s18  ;;  %27 = sbr.rel (!%p25_p0) target bundleno = 10 (0xa), region = 121 }
 0x809   : > { %s13951_s18 = smov %s13944_s29 }
 0x80e   :  { %8534 = vsyncpa [#allocation6], 1 }
 0x80f   :  { %8536 = vsyncpa [#allocation6 + $0x1], 1 }
 0x810   :  { %8537 = vsyncpa [#allocation8], 1 }
 0x811   :  { %8539 = vsyncpa [#allocation8 + $0x1], 1 }

</bundles_post_ra>
